<compile_context>
chip_gen: v5e
topology: v5e:2x2
jax: 0.10.0
libtpu: 0.0.40
codegen_flags: <defaults>
</compile_context>

<pallas_src>
import functools

import jax
import jax.numpy as jnp
import numpy as np
from jax.experimental import pallas as pl
from jax.experimental.pallas import tpu as pltpu


# -----------------------------------------------------------------------------
# Generation-aware tuning (v5e/v6e: 128 MiB VMEM, v7x: 64 MiB)
# -----------------------------------------------------------------------------
def _detect_limits():
    try:
        phys = pltpu.get_tpu_info().vmem_capacity_bytes
    except Exception:
        phys = None
    if phys is not None and phys >= 100 * 1024 * 1024:      # v5e / v6e
        return 96 * 1024 * 1024, 1024
    return 48 * 1024 * 1024, 512                             # v7x or unknown


_VMEM_LIMIT, _ROW_TILE = _detect_limits()
_LANE = 128


def _compiler_params():
    return pltpu.CompilerParams(
        dimension_semantics=("parallel",),
        vmem_limit_bytes=_VMEM_LIMIT,
    )


# -----------------------------------------------------------------------------
# In-kernel helpers (operate on a (rows, D) f32 tile, D = P*C)
# -----------------------------------------------------------------------------
def _apply_block(x, p):
    """Pre-activation residual unit: x + W2·relu(bn2(W1·relu(bn1(x))))."""
    s1, b1, w1, s2, b2, w2 = p
    h = jnp.maximum(x * s1[...] + b1[...], 0.0)
    h = jnp.dot(h.astype(jnp.bfloat16), w1[...], preferred_element_type=jnp.float32)
    h = jnp.maximum(h * s2[...] + b2[...], 0.0)
    h = jnp.dot(h.astype(jnp.bfloat16), w2[...], preferred_element_type=jnp.float32)
    return x + h


def _mask_head(x, p):
    """softmax6_blocks: BN-ReLU-1x1conv-BN-ReLU-1x1conv-Sigmoid."""
    s1, b1, w1, s2, b2, w2 = p
    h = jnp.maximum(x * s1[...] + b1[...], 0.0)
    h = jnp.dot(h.astype(jnp.bfloat16), w1[...], preferred_element_type=jnp.float32)
    h = jnp.maximum(h * s2[...] + b2[...], 0.0)
    h = jnp.dot(h.astype(jnp.bfloat16), w2[...], preferred_element_type=jnp.float32)
    return jax.nn.sigmoid(h)


# -----------------------------------------------------------------------------
# Per-row (lane-packed) kernels
# -----------------------------------------------------------------------------
def _resblock_kernel(x_ref, *refs):
    o_ref = refs[6]
    y = _apply_block(x_ref[...].astype(jnp.float32), refs[0:6])
    o_ref[...] = y.astype(o_ref.dtype)


def _resblock2_kernel(x_ref, *refs):
    o_ref = refs[12]
    y = _apply_block(x_ref[...].astype(jnp.float32), refs[0:6])
    o_ref[...] = _apply_block(y, refs[6:12]).astype(o_ref.dtype)


def _resblock2_both_kernel(x_ref, *refs):
    o1_ref, o2_ref = refs[12], refs[13]
    y = _apply_block(x_ref[...].astype(jnp.float32), refs[0:6])
    o1_ref[...] = y.astype(o1_ref.dtype)
    o2_ref[...] = _apply_block(y, refs[6:12]).astype(o2_ref.dtype)


def _resblock_add_kernel(a_ref, b_ref, *refs):
    o_ref = refs[6]
    s = a_ref[...].astype(jnp.float32) + b_ref[...].astype(jnp.float32)
    o_ref[...] = _apply_block(s, refs[0:6]).astype(o_ref.dtype)


def _mask_combine_last_kernel(interp_ref, trunk_ref, *refs):
    mask_p, last_p = refs[0:6], refs[6:12]
    w1_ref, w2_ref = refs[12], refs[13]
    o_ref = refs[14]
    trunk = trunk_ref[...].astype(jnp.float32)
    mask = _mask_head(interp_ref[...].astype(jnp.float32), mask_p)
    combined = w1_ref[0] * (mask * trunk) + w2_ref[0] * trunk
    o_ref[...] = _apply_block(combined, last_p).astype(o_ref.dtype)


# -----------------------------------------------------------------------------
# Lane packing helpers
# -----------------------------------------------------------------------------
def _pack_factor(n_rows, C):
    """Largest P <= 128//C dividing n_rows: pack P positions per lane-dense row."""
    if C >= _LANE:
        return 1
    p = min(_LANE // C, n_rows)
    while p > 1 and n_rows % p:
        p -= 1
    return p


def _pack_rows(x):
    B, H, W, C = x.shape
    n = B * H * W
    P = _pack_factor(n, C)
    return x.reshape(n // P, P * C), P


def _expand_params(p, P):
    """Tile BN affines and kron-expand 1x1 weights to the packed (P*C) lane layout."""
    if P == 1:
        return p
    s1, b1, w1, s2, b2, w2 = p
    eye = jnp.eye(P, dtype=w1.dtype)
    return (jnp.tile(s1, (1, P)), jnp.tile(b1, (1, P)), jnp.kron(eye, w1),
            jnp.tile(s2, (1, P)), jnp.tile(b2, (1, P)), jnp.kron(eye, w2))


def _choose_row_tile(R):
    if R <= 8:
        return R
    tile = min(_ROW_TILE, (R // 8) * 8)
    if tile >= R and R >= 16:
        # v7x has 2 TensorCores sharing the "parallel" grid axis: avoid grid=1.
        tile = max(8, (pl.cdiv(R, 2) // 8) * 8)
    return tile


def _per_row_call(kernel, row_args, param_sets, smem_args=(), num_outputs=1,
                  out_dtype=jnp.bfloat16):
    """Run a per-row kernel tiled over lane-packed (rows, D) activations."""
    R, D = row_args[0].shape
    tile = _choose_row_tile(R)
    grid = (pl.cdiv(R, tile),)          # remainder blocks OK: rows are independent

    row_spec = pl.BlockSpec((tile, D), lambda i: (i, 0))
    # Constant operands: single-buffered (index_map is constant -> 2nd buffer is waste).
    vec_spec = pl.BlockSpec((1, D), lambda i: (0, 0), pipeline_mode=pl.Buffered(1))
    mat_spec = pl.BlockSpec((D, D), lambda i: (0, 0), pipeline_mode=pl.Buffered(1))
    smem_spec = pl.BlockSpec(memory_space=pltpu.MemorySpace.SMEM)

    in_specs = [row_spec] * len(row_args)
    flat_params = []
    for p in param_sets:
        in_specs += [vec_spec, vec_spec, mat_spec, vec_spec, vec_spec, mat_spec]
        flat_params += list(p)
    in_specs += [smem_spec] * len(smem_args)

    one = jax.ShapeDtypeStruct((R, D), out_dtype)
    if num_outputs == 1:
        out_shape, out_specs = one, row_spec
    else:
        out_shape = tuple(one for _ in range(num_outputs))
        out_specs = tuple(row_spec for _ in range(num_outputs))

    return pl.pallas_call(
        kernel,
        grid=grid,
        in_specs=in_specs,
        out_specs=out_specs,
        out_shape=out_shape,
        compiler_params=_compiler_params(),
    )(*row_args, *flat_params, *smem_args)


def residual_block(x, p):
    B, H, W, C = x.shape
    rows, P = _pack_rows(x)
    y = _per_row_call(_resblock_kernel, [rows], [_expand_params(p, P)])
    return y.reshape(B, H, W, C)


def residual_block2(x, pa, pb):
    B, H, W, C = x.shape
    rows, P = _pack_rows(x)
    y = _per_row_call(_resblock2_kernel, [rows],
                      [_expand_params(pa, P), _expand_params(pb, P)])
    return y.reshape(B, H, W, C)


def residual_block2_both(x, pa, pb):
    B, H, W, C = x.shape
    rows, P = _pack_rows(x)
    y1, y2 = _per_row_call(_resblock2_both_kernel, [rows],
                           [_expand_params(pa, P), _expand_params(pb, P)],
                           num_outputs=2)
    return y1.reshape(B, H, W, C), y2.reshape(B, H, W, C)


def residual_block_add(a, skip, p):
    B, H, W, C = a.shape
    a_rows, P = _pack_rows(a)
    s_rows, _ = _pack_rows(skip)
    y = _per_row_call(_resblock_add_kernel, [a_rows, s_rows],
                      [_expand_params(p, P)])
    return y.reshape(B, H, W, C)


def mask_combine_last(interp, trunk, mask_p, last_p, w1, w2):
    B, H, W, C = interp.shape
    i_rows, P = _pack_rows(interp)
    t_rows, _ = _pack_rows(trunk)
    y = _per_row_call(_mask_combine_last_kernel, [i_rows, t_rows],
                      [_expand_params(mask_p, P), _expand_params(last_p, P)],
                      smem_args=(w1, w2), out_dtype=jnp.float32)
    return y.reshape(B, H, W, C)


# -----------------------------------------------------------------------------
# MaxPool2d(kernel_size=3, stride=2, padding=1)
# -----------------------------------------------------------------------------
def _maxpool_kernel(x_ref, o_ref):
    """Direct stride-2 separable 3x3 window max; -inf boundary handled in-kernel.

    x_ref: (1, Ho, 2, Wo, 2C) view of one (H, W, C) image (even/odd rows & cols packed).
    o_ref: (1, Ho, Wo, C)
    """
    C = o_ref.shape[3]
    x = x_ref[0]                                       # (Ho, 2, Wo, 2C)
    r_even = x[:, 0]
    r_odd = x[:, 1]
    neg_row = jnp.full((1,) + r_odd.shape[1:], -jnp.inf, x.dtype)
    r_up = jnp.concatenate([neg_row, r_odd[:-1]], axis=0)          # rows 2*oh - 1
    rmax = jnp.maximum(jnp.maximum(r_even, r_odd), r_up)           # (Ho, Wo, 2C)
    c_even = rmax[:, :, :C]                                        # cols 2*ow
    c_odd = rmax[:, :, C:]                                         # cols 2*ow + 1
    neg_col = jnp.full((c_odd.shape[0], 1, C), -jnp.inf, x.dtype)
    c_left = jnp.concatenate([neg_col, c_odd[:, :-1, :]], axis=1)  # cols 2*ow - 1
    o_ref[0] = jnp.maximum(jnp.maximum(c_even, c_odd), c_left)


def maxpool_3x3_s2_p1(x):
    """MaxPool2d(3, stride=2, padding=1) in NHWC (H and W even)."""
    B, H, W, C = x.shape
    assert H % 2 == 0 and W % 2 == 0  # TODO(synk): odd spatial dims not supported
    Ho, Wo = H // 2, W // 2
    xr = x.reshape(B, Ho, 2, Wo, 2 * C)        # layout-preserving reshape
    return pl.pallas_call(
        _maxpool_kernel,
        grid=(B,),
        in_specs=[pl.BlockSpec((1, Ho, 2, Wo, 2 * C),
                               lambda b: (b, 0, 0, 0, 0))],
        out_specs=pl.BlockSpec((1, Ho, Wo, C), lambda b: (b, 0, 0, 0)),
        out_shape=jax.ShapeDtypeStruct((B, Ho, Wo, C), x.dtype),
        compiler_params=_compiler_params(),
    )(xr)


# -----------------------------------------------------------------------------
# UpsamplingBilinear2d (align_corners=True) — two dense MXU matmuls per image.
# -----------------------------------------------------------------------------
def _bilinear_matrix_np(out_size, in_size):
    m = np.zeros((out_size, in_size), np.float32)
    if in_size == 1:
        m[:, 0] = 1.0
        return m
    for o in range(out_size):
        src = 0.0 if out_size == 1 else o * (in_size - 1) / (out_size - 1)
        lo = min(int(np.floor(src)), in_size - 2)
        f = src - lo
        m[o, lo] += 1.0 - f
        m[o, lo + 1] += f
    return m


def _upsample_mats(out_h, out_w, in_h, in_w, C):
    ah = _bilinear_matrix_np(out_h, in_h)                          # (Hout, Hin)
    aw = _bilinear_matrix_np(out_w, in_w)                          # (Wout, Win)
    kw = np.kron(aw, np.eye(C, dtype=np.float32)).T                # (Win*C, Wout*C)
    return jnp.asarray(ah, jnp.bfloat16), jnp.asarray(kw, jnp.bfloat16)


def _upsample_kernel(x_ref, ah_ref, kw_ref, o_ref):
    x = x_ref[0].astype(jnp.bfloat16)                              # (Hin, Win*C)
    t = jnp.dot(ah_ref[...], x, preferred_element_type=jnp.float32)      # (Hout, Win*C)
    y = jnp.dot(t.astype(jnp.bfloat16), kw_ref[...],
                preferred_element_type=jnp.float32)                      # (Hout, Wout*C)
    o_ref[0] = y.astype(o_ref.dtype)


def upsample_bilinear(x, out_h, out_w):
    """UpsamplingBilinear2d(size=(out_h, out_w)), align_corners=True, NHWC."""
    B, Hin, Win, C = x.shape
    ah, kw = _upsample_mats(out_h, out_w, Hin, Win, C)
    xm = x.reshape(B, Hin, Win * C)
    const = lambda shape: pl.BlockSpec(shape, lambda b: (0, 0),
                                       pipeline_mode=pl.Buffered(1))
    out = pl.pallas_call(
        _upsample_kernel,
        grid=(B,),
        in_specs=[pl.BlockSpec((1, Hin, Win * C), lambda b: (b, 0, 0)),
                  const((out_h, Hin)),
                  const((Win * C, out_w * C))],
        out_specs=pl.BlockSpec((1, out_h, out_w * C), lambda b: (b, 0, 0)),
        out_shape=jax.ShapeDtypeStruct((B, out_h, out_w * C), jnp.bfloat16),
        compiler_params=_compiler_params(),
    )(xm, ah, kw)
    return out.reshape(B, out_h, out_w, C)


# -----------------------------------------------------------------------------
# Parameters
# -----------------------------------------------------------------------------
def _make_block_params(key, C):
    ks = jax.random.split(key, 10)

    def folded_bn(kg, kb, km, kv):
        gamma = 1.0 + 0.1 * jax.random.normal(kg, (C,), jnp.float32)
        beta = 0.1 * jax.random.normal(kb, (C,), jnp.float32)
        mean = 0.1 * jax.random.normal(km, (C,), jnp.float32)
        var = 1.0 + 0.1 * jax.random.uniform(kv, (C,), jnp.float32)
        scale = gamma / jnp.sqrt(var + 1e-5)
        bias = beta - mean * scale
        return scale.reshape(1, C), bias.reshape(1, C)

    s1, b1 = folded_bn(ks[0], ks[1], ks[2], ks[3])
    s2, b2 = folded_bn(ks[4], ks[5], ks[6], ks[7])
    # 1x1 conv weights stored transposed as (Cin, Cout) in bf16, so out = x @ W.
    w1 = (0.3 * jax.random.normal(ks[8], (C, C), jnp.float32)).astype(jnp.bfloat16)
    w2 = (0.3 * jax.random.normal(ks[9], (C, C), jnp.float32)).astype(jnp.bfloat16)
    return (s1, b1, w1, s2, b2, w2)


_BLOCK_NAMES = ["first", "trunk_a", "trunk_b", "sm1", "skip1", "sm2", "skip2",
                "sm3_a", "sm3_b", "sm4", "sm5", "last"]


def init_params(key, C):
    params = {}
    for i, name in enumerate(_BLOCK_NAMES):
        params[name] = _make_block_params(jax.random.fold_in(key, i), C)
    params["mask_head"] = _make_block_params(jax.random.fold_in(key, 100), C)
    params["w1"] = jnp.ones((1,), jnp.float32)   # nn.Parameter filled with 1.0
    params["w2"] = jnp.ones((1,), jnp.float32)   # nn.Parameter filled with 1.0
    return params


# -----------------------------------------------------------------------------
# Forward pass (mirrors RANet.forward, with fused stages)
# -----------------------------------------------------------------------------
@functools.partial(jax.jit, static_argnames=("size1", "size2", "size3"))
def ranet_forward(x_nchw, params, *, size1, size2, size3):
    x = jnp.transpose(x_nchw, (0, 2, 3, 1)).astype(jnp.float32)   # NCHW -> NHWC

    x = residual_block(x, params["first"])
    out_trunk = residual_block2(x, params["trunk_a"], params["trunk_b"])

    out_mpool1 = maxpool_3x3_s2_p1(x)
    out_softmax1, out_skip1 = residual_block2_both(
        out_mpool1, params["sm1"], params["skip1"])

    out_mpool2 = maxpool_3x3_s2_p1(out_softmax1)
    out_softmax2, out_skip2 = residual_block2_both(
        out_mpool2, params["sm2"], params["skip2"])

    out_mpool3 = maxpool_3x3_s2_p1(out_softmax2)
    out_softmax3 = residual_block2(out_mpool3, params["sm3_a"], params["sm3_b"])

    out_interp3 = upsample_bilinear(out_softmax3, size3, size3)
    out_softmax4 = residual_block_add(out_interp3, out_skip2, params["sm4"])

    out_interp2 = upsample_bilinear(out_softmax4, size2, size2)
    out_softmax5 = residual_block_add(out_interp2, out_skip1, params["sm5"])

    out_interp1 = upsample_bilinear(out_softmax5, size1, size1)
    out_last = mask_combine_last(out_interp1, out_trunk,
                                 params["mask_head"], params["last"],
                                 params["w1"], params["w2"])

    return jnp.transpose(out_last, (0, 3, 1, 2))                  # back to NCHW


# -----------------------------------------------------------------------------
if __name__ == "__main__":
    key = jax.random.PRNGKey(0)
    B, C, H, W = 2, 4, 16, 16
    x = jax.random.normal(jax.random.fold_in(key, 999), (B, C, H, W),
                          jnp.float32)
    params = init_params(key, C)

    out = ranet_forward(x, params, size1=H, size2=H // 2, size3=H // 4)
    out = jax.block_until_ready(out)
    assert out.shape == (B, C, H, W), out.shape
    assert bool(jnp.all(jnp.isfinite(out)))
    print("KERNEL_OK")
</pallas_src>

<mosaic_0001>
module attributes {stable_mosaic.version = 11 : i64} {
  func.func @_resblock_kernel(%arg0: i32, %arg1: memref<8x128xf32, #tpu.memory_space<vmem>>, %arg2: memref<1x128xf32, #tpu.memory_space<vmem>>, %arg3: memref<1x128xf32, #tpu.memory_space<vmem>>, %arg4: memref<128x128xbf16, #tpu.memory_space<vmem>>, %arg5: memref<1x128xf32, #tpu.memory_space<vmem>>, %arg6: memref<1x128xf32, #tpu.memory_space<vmem>>, %arg7: memref<128x128xbf16, #tpu.memory_space<vmem>>, %arg8: memref<8x128xbf16, #tpu.memory_space<vmem>>) attributes {dimension_semantics = [#tpu.dimension_semantics<parallel>], iteration_bounds = array<i64: 2>, scalar_prefetch = 0 : i64, scratch_operands = 0 : i64, tpu.core_type = #tpu.core_type<tc>, window_params = [{transform_indices = @transform_0, window_bounds = array<i64: 8, 128>}, {pipeline_mode = #tpu.pipeline_mode<synchronous>, transform_indices = @transform_1, window_bounds = array<i64: 1, 128>}, {pipeline_mode = #tpu.pipeline_mode<synchronous>, transform_indices = @transform_2, window_bounds = array<i64: 1, 128>}, {pipeline_mode = #tpu.pipeline_mode<synchronous>, transform_indices = @transform_3, window_bounds = array<i64: 128, 128>}, {pipeline_mode = #tpu.pipeline_mode<synchronous>, transform_indices = @transform_4, window_bounds = array<i64: 1, 128>}, {pipeline_mode = #tpu.pipeline_mode<synchronous>, transform_indices = @transform_5, window_bounds = array<i64: 1, 128>}, {pipeline_mode = #tpu.pipeline_mode<synchronous>, transform_indices = @transform_6, window_bounds = array<i64: 128, 128>}, {transform_indices = @transform_7, window_bounds = array<i64: 8, 128>}]} {
    %c0 = arith.constant 0 : index
    %c0_0 = arith.constant 0 : index
    %0 = vector.load %arg1[%c0, %c0_0] : memref<8x128xf32, #tpu.memory_space<vmem>>, vector<8x128xf32>
    %c0_1 = arith.constant 0 : index
    %c0_2 = arith.constant 0 : index
    %1 = vector.load %arg2[%c0_1, %c0_2] : memref<1x128xf32, #tpu.memory_space<vmem>>, vector<1x128xf32>
    %2 = vector.broadcast %1 : vector<1x128xf32> to vector<8x128xf32>
    %3 = arith.mulf %0, %2 : vector<8x128xf32>
    %c0_3 = arith.constant 0 : index
    %c0_4 = arith.constant 0 : index
    %4 = vector.load %arg3[%c0_3, %c0_4] : memref<1x128xf32, #tpu.memory_space<vmem>>, vector<1x128xf32>
    %5 = vector.broadcast %4 : vector<1x128xf32> to vector<8x128xf32>
    %6 = arith.addf %3, %5 : vector<8x128xf32>
    %cst = arith.constant 0.000000e+00 : f32
    %7 = vector.broadcast %cst : f32 to vector<8x128xf32>
    %8 = arith.maximumf %6, %7 : vector<8x128xf32>
    %9 = arith.truncf %8 : vector<8x128xf32> to vector<8x128xbf16>
    %c0_5 = arith.constant 0 : index
    %c0_6 = arith.constant 0 : index
    %10 = vector.load %arg4[%c0_5, %c0_6] : memref<128x128xbf16, #tpu.memory_space<vmem>>, vector<128x128xbf16>
    %cst_7 = arith.constant dense<0.000000e+00> : vector<8x128xf32>
    %11 = tpu.matmul %9, %10, %cst_7 {dimension_numbers = #tpu.dot_dimension_numbers<[1], [0], [0], [1], [0, 0, 1, 1], [], []>} : vector<8x128xbf16>, vector<128x128xbf16>, vector<8x128xf32> -> vector<8x128xf32>
    %c0_8 = arith.constant 0 : index
    %c0_9 = arith.constant 0 : index
    %12 = vector.load %arg5[%c0_8, %c0_9] : memref<1x128xf32, #tpu.memory_space<vmem>>, vector<1x128xf32>
    %13 = vector.broadcast %12 : vector<1x128xf32> to vector<8x128xf32>
    %14 = arith.mulf %11, %13 : vector<8x128xf32>
    %c0_10 = arith.constant 0 : index
    %c0_11 = arith.constant 0 : index
    %15 = vector.load %arg6[%c0_10, %c0_11] : memref<1x128xf32, #tpu.memory_space<vmem>>, vector<1x128xf32>
    %16 = vector.broadcast %15 : vector<1x128xf32> to vector<8x128xf32>
    %17 = arith.addf %14, %16 : vector<8x128xf32>
    %cst_12 = arith.constant 0.000000e+00 : f32
    %18 = vector.broadcast %cst_12 : f32 to vector<8x128xf32>
    %19 = arith.maximumf %17, %18 : vector<8x128xf32>
    %20 = arith.truncf %19 : vector<8x128xf32> to vector<8x128xbf16>
    %c0_13 = arith.constant 0 : index
    %c0_14 = arith.constant 0 : index
    %21 = vector.load %arg7[%c0_13, %c0_14] : memref<128x128xbf16, #tpu.memory_space<vmem>>, vector<128x128xbf16>
    %cst_15 = arith.constant dense<0.000000e+00> : vector<8x128xf32>
    %22 = tpu.matmul %20, %21, %cst_15 {dimension_numbers = #tpu.dot_dimension_numbers<[1], [0], [0], [1], [0, 0, 1, 1], [], []>} : vector<8x128xbf16>, vector<128x128xbf16>, vector<8x128xf32> -> vector<8x128xf32>
    %23 = arith.addf %0, %22 : vector<8x128xf32>
    %24 = arith.truncf %23 : vector<8x128xf32> to vector<8x128xbf16>
    %c0_16 = arith.constant 0 : index
    %c0_17 = arith.constant 0 : index
    %25 = vector.load %arg8[%c0_16, %c0_17] : memref<8x128xbf16, #tpu.memory_space<vmem>>, vector<8x128xbf16>
    tpu.vector_store %arg8[%c0_16, %c0_17], %24 {strides = array<i32>} : memref<8x128xbf16, #tpu.memory_space<vmem>>, vector<8x128xbf16>,
    return
  }
  func.func @transform_0(%arg0: i32) -> (i32, i32) {
    %c0_i32 = arith.constant 0 : i32
    %c0_i32_0 = arith.constant 0 : i32
    return %arg0, %c0_i32 : i32, i32
  }
  func.func @transform_1(%arg0: i32) -> (i32, i32) {
    %c0_i32 = arith.constant 0 : i32
    %c0_i32_0 = arith.constant 0 : i32
    %c0_i32_1 = arith.constant 0 : i32
    return %c0_i32, %c0_i32_0 : i32, i32
  }
  func.func @transform_2(%arg0: i32) -> (i32, i32) {
    %c0_i32 = arith.constant 0 : i32
    %c0_i32_0 = arith.constant 0 : i32
    %c0_i32_1 = arith.constant 0 : i32
    return %c0_i32, %c0_i32_0 : i32, i32
  }
  func.func @transform_3(%arg0: i32) -> (i32, i32) {
    %c0_i32 = arith.constant 0 : i32
    %c0_i32_0 = arith.constant 0 : i32
    %c0_i32_1 = arith.constant 0 : i32
    return %c0_i32, %c0_i32_0 : i32, i32
  }
  func.func @transform_4(%arg0: i32) -> (i32, i32) {
    %c0_i32 = arith.constant 0 : i32
    %c0_i32_0 = arith.constant 0 : i32
    %c0_i32_1 = arith.constant 0 : i32
    return %c0_i32, %c0_i32_0 : i32, i32
  }
  func.func @transform_5(%arg0: i32) -> (i32, i32) {
    %c0_i32 = arith.constant 0 : i32
    %c0_i32_0 = arith.constant 0 : i32
    %c0_i32_1 = arith.constant 0 : i32
    return %c0_i32, %c0_i32_0 : i32, i32
  }
  func.func @transform_6(%arg0: i32) -> (i32, i32) {
    %c0_i32 = arith.constant 0 : i32
    %c0_i32_0 = arith.constant 0 : i32
    %c0_i32_1 = arith.constant 0 : i32
    return %c0_i32, %c0_i32_0 : i32, i32
  }
  func.func @transform_7(%arg0: i32) -> (i32, i32) {
    %c0_i32 = arith.constant 0 : i32
    %c0_i32_0 = arith.constant 0 : i32
    return %arg0, %c0_i32 : i32, i32
  }
}

module attributes {stable_mosaic.version = 11 : i64} {
  func.func @_maxpool_kernel(%arg0: i32, %arg1: memref<1x8x2x8x8xbf16, #tpu.memory_space<vmem>>, %arg2: memref<1x8x8x4xbf16, #tpu.memory_space<vmem>>) attributes {dimension_semantics = [#tpu.dimension_semantics<parallel>], iteration_bounds = array<i64: 2>, scalar_prefetch = 0 : i64, scratch_operands = 0 : i64, tpu.core_type = #tpu.core_type<tc>, window_params = [{transform_indices = @transform_0, window_bounds = array<i64: 1, 8, 2, 8, 8>}, {transform_indices = @transform_1, window_bounds = array<i64: 1, 8, 8, 4>}]} {
    %c0 = arith.constant 0 : index
    %c0_0 = arith.constant 0 : index
    %c0_1 = arith.constant 0 : index
    %c0_2 = arith.constant 0 : index
    %c0_3 = arith.constant 0 : index
    %0 = vector.load %arg1[%c0, %c0_0, %c0_1, %c0_2, %c0_3] : memref<1x8x2x8x8xbf16, #tpu.memory_space<vmem>>, vector<1x8x2x8x8xbf16>
    %1 = vector.shape_cast %0 : vector<1x8x2x8x8xbf16> to vector<8x2x8x8xbf16>
    %2 = vector.extract_strided_slice %1 {offsets = [0, 0, 0, 0], sizes = [8, 1, 8, 8], strides = [1, 1, 1, 1]} : vector<8x2x8x8xbf16> to vector<8x1x8x8xbf16>
    %3 = vector.shape_cast %2 : vector<8x1x8x8xbf16> to vector<8x8x8xbf16>
    %4 = vector.extract_strided_slice %1 {offsets = [0, 1, 0, 0], sizes = [8, 1, 8, 8], strides = [1, 1, 1, 1]} : vector<8x2x8x8xbf16> to vector<8x1x8x8xbf16>
    %5 = vector.shape_cast %4 : vector<8x1x8x8xbf16> to vector<8x8x8xbf16>
    %cst = arith.constant 0xFF80 : bf16
    %6 = vector.broadcast %cst : bf16 to vector<1x8x8xbf16>
    %7 = vector.extract_strided_slice %5 {offsets = [0, 0, 0], sizes = [7, 8, 8], strides = [1, 1, 1]} : vector<8x8x8xbf16> to vector<7x8x8xbf16>
    %8 = tpu.concatenate %6, %7 in 0 : vector<1x8x8xbf16>, vector<7x8x8xbf16> -> vector<8x8x8xbf16>
    %9 = arith.maximumf %3, %5 : vector<8x8x8xbf16>
    %10 = arith.maximumf %9, %8 : vector<8x8x8xbf16>
    %11 = vector.extract_strided_slice %10 {offsets = [0, 0, 0], sizes = [8, 8, 4], strides = [1, 1, 1]} : vector<8x8x8xbf16> to vector<8x8x4xbf16>
    %12 = vector.extract_strided_slice %10 {offsets = [0, 0, 4], sizes = [8, 8, 4], strides = [1, 1, 1]} : vector<8x8x8xbf16> to vector<8x8x4xbf16>
    %cst_4 = arith.constant 0xFF80 : bf16
    %13 = vector.broadcast %cst_4 : bf16 to vector<8x1x4xbf16>
    %14 = vector.extract_strided_slice %12 {offsets = [0, 0, 0], sizes = [8, 7, 4], strides = [1, 1, 1]} : vector<8x8x4xbf16> to vector<8x7x4xbf16>
    %15 = tpu.concatenate %13, %14 in 1 : vector<8x1x4xbf16>, vector<8x7x4xbf16> -> vector<8x8x4xbf16>
    %16 = arith.maximumf %11, %12 : vector<8x8x4xbf16>
    %17 = arith.maximumf %16, %15 : vector<8x8x4xbf16>
    %c0_5 = arith.constant 0 : index
    %c0_6 = arith.constant 0 : index
    %c0_7 = arith.constant 0 : index
    %c0_8 = arith.constant 0 : index
    %18 = vector.load %arg2[%c0_5, %c0_6, %c0_7, %c0_8] : memref<1x8x8x4xbf16, #tpu.memory_space<vmem>>, vector<1x8x8x4xbf16>
    %19 = vector.shape_cast %18 : vector<1x8x8x4xbf16> to vector<8x8x4xbf16>
    %20 = vector.shape_cast %17 : vector<8x8x4xbf16> to vector<1x8x8x4xbf16>
    tpu.vector_store %arg2[%c0_5, %c0_6, %c0_7, %c0_8], %20 {strides = array<i32>} : memref<1x8x8x4xbf16, #tpu.memory_space<vmem>>, vector<1x8x8x4xbf16>,
    return
  }
  func.func @transform_0(%arg0: i32) -> (i32, i32, i32, i32, i32) {
    %c0_i32 = arith.constant 0 : i32
    %c0_i32_0 = arith.constant 0 : i32
    %c0_i32_1 = arith.constant 0 : i32
    %c0_i32_2 = arith.constant 0 : i32
    %c0_i32_3 = arith.constant 0 : i32
    return %arg0, %c0_i32, %c0_i32_0, %c0_i32_1, %c0_i32_2 : i32, i32, i32, i32, i32
  }
  func.func @transform_1(%arg0: i32) -> (i32, i32, i32, i32) {
    %c0_i32 = arith.constant 0 : i32
    %c0_i32_0 = arith.constant 0 : i32
    %c0_i32_1 = arith.constant 0 : i32
    %c0_i32_2 = arith.constant 0 : i32
    return %arg0, %c0_i32, %c0_i32_0, %c0_i32_1 : i32, i32, i32, i32
  }
}

module attributes {stable_mosaic.version = 11 : i64} {
  func.func @_resblock2_both_kernel(%arg0: i32, %arg1: memref<4x128xbf16, #tpu.memory_space<vmem>>, %arg2: memref<1x128xf32, #tpu.memory_space<vmem>>, %arg3: memref<1x128xf32, #tpu.memory_space<vmem>>, %arg4: memref<128x128xbf16, #tpu.memory_space<vmem>>, %arg5: memref<1x128xf32, #tpu.memory_space<vmem>>, %arg6: memref<1x128xf32, #tpu.memory_space<vmem>>, %arg7: memref<128x128xbf16, #tpu.memory_space<vmem>>, %arg8: memref<1x128xf32, #tpu.memory_space<vmem>>, %arg9: memref<1x128xf32, #tpu.memory_space<vmem>>, %arg10: memref<128x128xbf16, #tpu.memory_space<vmem>>, %arg11: memref<1x128xf32, #tpu.memory_space<vmem>>, %arg12: memref<1x128xf32, #tpu.memory_space<vmem>>, %arg13: memref<128x128xbf16, #tpu.memory_space<vmem>>, %arg14: memref<4x128xbf16, #tpu.memory_space<vmem>>, %arg15: memref<4x128xbf16, #tpu.memory_space<vmem>>) attributes {dimension_semantics = [#tpu.dimension_semantics<parallel>], iteration_bounds = array<i64: 1>, scalar_prefetch = 0 : i64, scratch_operands = 0 : i64, tpu.core_type = #tpu.core_type<tc>, window_params = [{transform_indices = @transform_0, window_bounds = array<i64: 4, 128>}, {pipeline_mode = #tpu.pipeline_mode<synchronous>, transform_indices = @transform_1, window_bounds = array<i64: 1, 128>}, {pipeline_mode = #tpu.pipeline_mode<synchronous>, transform_indices = @transform_2, window_bounds = array<i64: 1, 128>}, {pipeline_mode = #tpu.pipeline_mode<synchronous>, transform_indices = @transform_3, window_bounds = array<i64: 128, 128>}, {pipeline_mode = #tpu.pipeline_mode<synchronous>, transform_indices = @transform_4, window_bounds = array<i64: 1, 128>}, {pipeline_mode = #tpu.pipeline_mode<synchronous>, transform_indices = @transform_5, window_bounds = array<i64: 1, 128>}, {pipeline_mode = #tpu.pipeline_mode<synchronous>, transform_indices = @transform_6, window_bounds = array<i64: 128, 128>}, {pipeline_mode = #tpu.pipeline_mode<synchronous>, transform_indices = @transform_7, window_bounds = array<i64: 1, 128>}, {pipeline_mode = #tpu.pipeline_mode<synchronous>, transform_indices = @transform_8, window_bounds = array<i64: 1, 128>}, {pipeline_mode = #tpu.pipeline_mode<synchronous>, transform_indices = @transform_9, window_bounds = array<i64: 128, 128>}, {pipeline_mode = #tpu.pipeline_mode<synchronous>, transform_indices = @transform_10, window_bounds = array<i64: 1, 128>}, {pipeline_mode = #tpu.pipeline_mode<synchronous>, transform_indices = @transform_11, window_bounds = array<i64: 1, 128>}, {pipeline_mode = #tpu.pipeline_mode<synchronous>, transform_indices = @transform_12, window_bounds = array<i64: 128, 128>}, {transform_indices = @transform_13, window_bounds = array<i64: 4, 128>}, {transform_indices = @transform_14, window_bounds = array<i64: 4, 128>}]} {
    %c0 = arith.constant 0 : index
    %c0_0 = arith.constant 0 : index
    %0 = vector.load %arg1[%c0, %c0_0] : memref<4x128xbf16, #tpu.memory_space<vmem>>, vector<4x128xbf16>
    %1 = arith.extf %0 : vector<4x128xbf16> to vector<4x128xf32>
    %c0_1 = arith.constant 0 : index
    %c0_2 = arith.constant 0 : index
    %2 = vector.load %arg2[%c0_1, %c0_2] : memref<1x128xf32, #tpu.memory_space<vmem>>, vector<1x128xf32>
    %3 = vector.broadcast %2 : vector<1x128xf32> to vector<4x128xf32>
    %4 = arith.mulf %1, %3 : vector<4x128xf32>
    %c0_3 = arith.constant 0 : index
    %c0_4 = arith.constant 0 : index
    %5 = vector.load %arg3[%c0_3, %c0_4] : memref<1x128xf32, #tpu.memory_space<vmem>>, vector<1x128xf32>
    %6 = vector.broadcast %5 : vector<1x128xf32> to vector<4x128xf32>
    %7 = arith.addf %4, %6 : vector<4x128xf32>
    %cst = arith.constant 0.000000e+00 : f32
    %8 = vector.broadcast %cst : f32 to vector<4x128xf32>
    %9 = arith.maximumf %7, %8 : vector<4x128xf32>
    %10 = arith.truncf %9 : vector<4x128xf32> to vector<4x128xbf16>
    %c0_5 = arith.constant 0 : index
    %c0_6 = arith.constant 0 : index
    %11 = vector.load %arg4[%c0_5, %c0_6] : memref<128x128xbf16, #tpu.memory_space<vmem>>, vector<128x128xbf16>
    %cst_7 = arith.constant dense<0.000000e+00> : vector<4x128xf32>
    %12 = tpu.matmul %10, %11, %cst_7 {dimension_numbers = #tpu.dot_dimension_numbers<[1], [0], [0], [1], [0, 0, 1, 1], [], []>} : vector<4x128xbf16>, vector<128x128xbf16>, vector<4x128xf32> -> vector<4x128xf32>
    %c0_8 = arith.constant 0 : index
    %c0_9 = arith.constant 0 : index
    %13 = vector.load %arg5[%c0_8, %c0_9] : memref<1x128xf32, #tpu.memory_space<vmem>>, vector<1x128xf32>
    %14 = vector.broadcast %13 : vector<1x128xf32> to vector<4x128xf32>
    %15 = arith.mulf %12, %14 : vector<4x128xf32>
    %c0_10 = arith.constant 0 : index
    %c0_11 = arith.constant 0 : index
    %16 = vector.load %arg6[%c0_10, %c0_11] : memref<1x128xf32, #tpu.memory_space<vmem>>, vector<1x128xf32>
    %17 = vector.broadcast %16 : vector<1x128xf32> to vector<4x128xf32>
    %18 = arith.addf %15, %17 : vector<4x128xf32>
    %cst_12 = arith.constant 0.000000e+00 : f32
    %19 = vector.broadcast %cst_12 : f32 to vector<4x128xf32>
    %20 = arith.maximumf %18, %19 : vector<4x128xf32>
    %21 = arith.truncf %20 : vector<4x128xf32> to vector<4x128xbf16>
    %c0_13 = arith.constant 0 : index
    %c0_14 = arith.constant 0 : index
    %22 = vector.load %arg7[%c0_13, %c0_14] : memref<128x128xbf16, #tpu.memory_space<vmem>>, vector<128x128xbf16>
    %cst_15 = arith.constant dense<0.000000e+00> : vector<4x128xf32>
    %23 = tpu.matmul %21, %22, %cst_15 {dimension_numbers = #tpu.dot_dimension_numbers<[1], [0], [0], [1], [0, 0, 1, 1], [], []>} : vector<4x128xbf16>, vector<128x128xbf16>, vector<4x128xf32> -> vector<4x128xf32>
    %24 = arith.addf %1, %23 : vector<4x128xf32>
    %25 = arith.truncf %24 : vector<4x128xf32> to vector<4x128xbf16>
    %c0_16 = arith.constant 0 : index
    %c0_17 = arith.constant 0 : index
    %26 = vector.load %arg14[%c0_16, %c0_17] : memref<4x128xbf16, #tpu.memory_space<vmem>>, vector<4x128xbf16>
    tpu.vector_store %arg14[%c0_16, %c0_17], %25 {strides = array<i32>} : memref<4x128xbf16, #tpu.memory_space<vmem>>, vector<4x128xbf16>,
    %c0_18 = arith.constant 0 : index
    %c0_19 = arith.constant 0 : index
    %27 = vector.load %arg8[%c0_18, %c0_19] : memref<1x128xf32, #tpu.memory_space<vmem>>, vector<1x128xf32>
    %28 = vector.broadcast %27 : vector<1x128xf32> to vector<4x128xf32>
    %29 = arith.mulf %24, %28 : vector<4x128xf32>
    %c0_20 = arith.constant 0 : index
    %c0_21 = arith.constant 0 : index
    %30 = vector.load %arg9[%c0_20, %c0_21] : memref<1x128xf32, #tpu.memory_space<vmem>>, vector<1x128xf32>
    %31 = vector.broadcast %30 : vector<1x128xf32> to vector<4x128xf32>
    %32 = arith.addf %29, %31 : vector<4x128xf32>
    %cst_22 = arith.constant 0.000000e+00 : f32
    %33 = vector.broadcast %cst_22 : f32 to vector<4x128xf32>
    %34 = arith.maximumf %32, %33 : vector<4x128xf32>
    %35 = arith.truncf %34 : vector<4x128xf32> to vector<4x128xbf16>
    %c0_23 = arith.constant 0 : index
    %c0_24 = arith.constant 0 : index
    %36 = vector.load %arg10[%c0_23, %c0_24] : memref<128x128xbf16, #tpu.memory_space<vmem>>, vector<128x128xbf16>
    %cst_25 = arith.constant dense<0.000000e+00> : vector<4x128xf32>
    %37 = tpu.matmul %35, %36, %cst_25 {dimension_numbers = #tpu.dot_dimension_numbers<[1], [0], [0], [1], [0, 0, 1, 1], [], []>} : vector<4x128xbf16>, vector<128x128xbf16>, vector<4x128xf32> -> vector<4x128xf32>
    %c0_26 = arith.constant 0 : index
    %c0_27 = arith.constant 0 : index
    %38 = vector.load %arg11[%c0_26, %c0_27] : memref<1x128xf32, #tpu.memory_space<vmem>>, vector<1x128xf32>
    %39 = vector.broadcast %38 : vector<1x128xf32> to vector<4x128xf32>
    %40 = arith.mulf %37, %39 : vector<4x128xf32>
    %c0_28 = arith.constant 0 : index
    %c0_29 = arith.constant 0 : index
    %41 = vector.load %arg12[%c0_28, %c0_29] : memref<1x128xf32, #tpu.memory_space<vmem>>, vector<1x128xf32>
    %42 = vector.broadcast %41 : vector<1x128xf32> to vector<4x128xf32>
    %43 = arith.addf %40, %42 : vector<4x128xf32>
    %cst_30 = arith.constant 0.000000e+00 : f32
    %44 = vector.broadcast %cst_30 : f32 to vector<4x128xf32>
    %45 = arith.maximumf %43, %44 : vector<4x128xf32>
    %46 = arith.truncf %45 : vector<4x128xf32> to vector<4x128xbf16>
    %c0_31 = arith.constant 0 : index
    %c0_32 = arith.constant 0 : index
    %47 = vector.load %arg13[%c0_31, %c0_32] : memref<128x128xbf16, #tpu.memory_space<vmem>>, vector<128x128xbf16>
    %cst_33 = arith.constant dense<0.000000e+00> : vector<4x128xf32>
    %48 = tpu.matmul %46, %47, %cst_33 {dimension_numbers = #tpu.dot_dimension_numbers<[1], [0], [0], [1], [0, 0, 1, 1], [], []>} : vector<4x128xbf16>, vector<128x128xbf16>, vector<4x128xf32> -> vector<4x128xf32>
    %49 = arith.addf %24, %48 : vector<4x128xf32>
    %50 = arith.truncf %49 : vector<4x128xf32> to vector<4x128xbf16>
    %c0_34 = arith.constant 0 : index
    %c0_35 = arith.constant 0 : index
    %51 = vector.load %arg15[%c0_34, %c0_35] : memref<4x128xbf16, #tpu.memory_space<vmem>>, vector<4x128xbf16>
    tpu.vector_store %arg15[%c0_34, %c0_35], %50 {strides = array<i32>} : memref<4x128xbf16, #tpu.memory_space<vmem>>, vector<4x128xbf16>,
    return
  }
  func.func @transform_0(%arg0: i32) -> (i32, i32) {
    %c0_i32 = arith.constant 0 : i32
    %c0_i32_0 = arith.constant 0 : i32
    return %arg0, %c0_i32 : i32, i32
  }
  func.func @transform_1(%arg0: i32) -> (i32, i32) {
    %c0_i32 = arith.constant 0 : i32
    %c0_i32_0 = arith.constant 0 : i32
    %c0_i32_1 = arith.constant 0 : i32
    return %c0_i32, %c0_i32_0 : i32, i32
  }
  func.func @transform_2(%arg0: i32) -> (i32, i32) {
    %c0_i32 = arith.constant 0 : i32
    %c0_i32_0 = arith.constant 0 : i32
    %c0_i32_1 = arith.constant 0 : i32
    return %c0_i32, %c0_i32_0 : i32, i32
  }
  func.func @transform_3(%arg0: i32) -> (i32, i32) {
    %c0_i32 = arith.constant 0 : i32
    %c0_i32_0 = arith.constant 0 : i32
    %c0_i32_1 = arith.constant 0 : i32
    return %c0_i32, %c0_i32_0 : i32, i32
  }
  func.func @transform_4(%arg0: i32) -> (i32, i32) {
    %c0_i32 = arith.constant 0 : i32
    %c0_i32_0 = arith.constant 0 : i32
    %c0_i32_1 = arith.constant 0 : i32
    return %c0_i32, %c0_i32_0 : i32, i32
  }
  func.func @transform_5(%arg0: i32) -> (i32, i32) {
    %c0_i32 = arith.constant 0 : i32
    %c0_i32_0 = arith.constant 0 : i32
    %c0_i32_1 = arith.constant 0 : i32
    return %c0_i32, %c0_i32_0 : i32, i32
  }
  func.func @transform_6(%arg0: i32) -> (i32, i32) {
    %c0_i32 = arith.constant 0 : i32
    %c0_i32_0 = arith.constant 0 : i32
    %c0_i32_1 = arith.constant 0 : i32
    return %c0_i32, %c0_i32_0 : i32, i32
  }
  func.func @transform_7(%arg0: i32) -> (i32, i32) {
    %c0_i32 = arith.constant 0 : i32
    %c0_i32_0 = arith.constant 0 : i32
    %c0_i32_1 = arith.constant 0 : i32
    return %c0_i32, %c0_i32_0 : i32, i32
  }
  func.func @transform_8(%arg0: i32) -> (i32, i32) {
    %c0_i32 = arith.constant 0 : i32
    %c0_i32_0 = arith.constant 0 : i32
    %c0_i32_1 = arith.constant 0 : i32
    return %c0_i32, %c0_i32_0 : i32, i32
  }
  func.func @transform_9(%arg0: i32) -> (i32, i32) {
    %c0_i32 = arith.constant 0 : i32
    %c0_i32_0 = arith.constant 0 : i32
    %c0_i32_1 = arith.constant 0 : i32
    return %c0_i32, %c0_i32_0 : i32, i32
  }
  func.func @transform_10(%arg0: i32) -> (i32, i32) {
    %c0_i32 = arith.constant 0 : i32
    %c0_i32_0 = arith.constant 0 : i32
    %c0_i32_1 = arith.constant 0 : i32
    return %c0_i32, %c0_i32_0 : i32, i32
  }
  func.func @transform_11(%arg0: i32) -> (i32, i32) {
    %c0_i32 = arith.constant 0 : i32
    %c0_i32_0 = arith.constant 0 : i32
    %c0_i32_1 = arith.constant 0 : i32
    return %c0_i32, %c0_i32_0 : i32, i32
  }
  func.func @transform_12(%arg0: i32) -> (i32, i32) {
    %c0_i32 = arith.constant 0 : i32
    %c0_i32_0 = arith.constant 0 : i32
    %c0_i32_1 = arith.constant 0 : i32
    return %c0_i32, %c0_i32_0 : i32, i32
  }
  func.func @transform_13(%arg0: i32) -> (i32, i32) {
    %c0_i32 = arith.constant 0 : i32
    %c0_i32_0 = arith.constant 0 : i32
    return %arg0, %c0_i32 : i32, i32
  }
  func.func @transform_14(%arg0: i32) -> (i32, i32) {
    %c0_i32 = arith.constant 0 : i32
    %c0_i32_0 = arith.constant 0 : i32
    return %arg0, %c0_i32 : i32, i32
  }
}

module attributes {stable_mosaic.version = 11 : i64} {
  func.func @_maxpool_kernel(%arg0: i32, %arg1: memref<1x4x2x4x8xbf16, #tpu.memory_space<vmem>>, %arg2: memref<1x4x4x4xbf16, #tpu.memory_space<vmem>>) attributes {dimension_semantics = [#tpu.dimension_semantics<parallel>], iteration_bounds = array<i64: 2>, scalar_prefetch = 0 : i64, scratch_operands = 0 : i64, tpu.core_type = #tpu.core_type<tc>, window_params = [{transform_indices = @transform_0, window_bounds = array<i64: 1, 4, 2, 4, 8>}, {transform_indices = @transform_1, window_bounds = array<i64: 1, 4, 4, 4>}]} {
    %c0 = arith.constant 0 : index
    %c0_0 = arith.constant 0 : index
    %c0_1 = arith.constant 0 : index
    %c0_2 = arith.constant 0 : index
    %c0_3 = arith.constant 0 : index
    %0 = vector.load %arg1[%c0, %c0_0, %c0_1, %c0_2, %c0_3] : memref<1x4x2x4x8xbf16, #tpu.memory_space<vmem>>, vector<1x4x2x4x8xbf16>
    %1 = vector.shape_cast %0 : vector<1x4x2x4x8xbf16> to vector<4x2x4x8xbf16>
    %2 = vector.extract_strided_slice %1 {offsets = [0, 0, 0, 0], sizes = [4, 1, 4, 8], strides = [1, 1, 1, 1]} : vector<4x2x4x8xbf16> to vector<4x1x4x8xbf16>
    %3 = vector.shape_cast %2 : vector<4x1x4x8xbf16> to vector<4x4x8xbf16>
    %4 = vector.extract_strided_slice %1 {offsets = [0, 1, 0, 0], sizes = [4, 1, 4, 8], strides = [1, 1, 1, 1]} : vector<4x2x4x8xbf16> to vector<4x1x4x8xbf16>
    %5 = vector.shape_cast %4 : vector<4x1x4x8xbf16> to vector<4x4x8xbf16>
    %cst = arith.constant 0xFF80 : bf16
    %6 = vector.broadcast %cst : bf16 to vector<1x4x8xbf16>
    %7 = vector.extract_strided_slice %5 {offsets = [0, 0, 0], sizes = [3, 4, 8], strides = [1, 1, 1]} : vector<4x4x8xbf16> to vector<3x4x8xbf16>
    %8 = tpu.concatenate %6, %7 in 0 : vector<1x4x8xbf16>, vector<3x4x8xbf16> -> vector<4x4x8xbf16>
    %9 = arith.maximumf %3, %5 : vector<4x4x8xbf16>
    %10 = arith.maximumf %9, %8 : vector<4x4x8xbf16>
    %11 = vector.extract_strided_slice %10 {offsets = [0, 0, 0], sizes = [4, 4, 4], strides = [1, 1, 1]} : vector<4x4x8xbf16> to vector<4x4x4xbf16>
    %12 = vector.extract_strided_slice %10 {offsets = [0, 0, 4], sizes = [4, 4, 4], strides = [1, 1, 1]} : vector<4x4x8xbf16> to vector<4x4x4xbf16>
    %cst_4 = arith.constant 0xFF80 : bf16
    %13 = vector.broadcast %cst_4 : bf16 to vector<4x1x4xbf16>
    %14 = vector.extract_strided_slice %12 {offsets = [0, 0, 0], sizes = [4, 3, 4], strides = [1, 1, 1]} : vector<4x4x4xbf16> to vector<4x3x4xbf16>
    %15 = tpu.concatenate %13, %14 in 1 : vector<4x1x4xbf16>, vector<4x3x4xbf16> -> vector<4x4x4xbf16>
    %16 = arith.maximumf %11, %12 : vector<4x4x4xbf16>
    %17 = arith.maximumf %16, %15 : vector<4x4x4xbf16>
    %c0_5 = arith.constant 0 : index
    %c0_6 = arith.constant 0 : index
    %c0_7 = arith.constant 0 : index
    %c0_8 = arith.constant 0 : index
    %18 = vector.load %arg2[%c0_5, %c0_6, %c0_7, %c0_8] : memref<1x4x4x4xbf16, #tpu.memory_space<vmem>>, vector<1x4x4x4xbf16>
    %19 = vector.shape_cast %18 : vector<1x4x4x4xbf16> to vector<4x4x4xbf16>
    %20 = vector.shape_cast %17 : vector<4x4x4xbf16> to vector<1x4x4x4xbf16>
    tpu.vector_store %arg2[%c0_5, %c0_6, %c0_7, %c0_8], %20 {strides = array<i32>} : memref<1x4x4x4xbf16, #tpu.memory_space<vmem>>, vector<1x4x4x4xbf16>,
    return
  }
  func.func @transform_0(%arg0: i32) -> (i32, i32, i32, i32, i32) {
    %c0_i32 = arith.constant 0 : i32
    %c0_i32_0 = arith.constant 0 : i32
    %c0_i32_1 = arith.constant 0 : i32
    %c0_i32_2 = arith.constant 0 : i32
    %c0_i32_3 = arith.constant 0 : i32
    return %arg0, %c0_i32, %c0_i32_0, %c0_i32_1, %c0_i32_2 : i32, i32, i32, i32, i32
  }
  func.func @transform_1(%arg0: i32) -> (i32, i32, i32, i32) {
    %c0_i32 = arith.constant 0 : i32
    %c0_i32_0 = arith.constant 0 : i32
    %c0_i32_1 = arith.constant 0 : i32
    %c0_i32_2 = arith.constant 0 : i32
    return %arg0, %c0_i32, %c0_i32_0, %c0_i32_1 : i32, i32, i32, i32
  }
}

module attributes {stable_mosaic.version = 11 : i64} {
  func.func @_resblock2_both_kernel(%arg0: i32, %arg1: memref<1x128xbf16, #tpu.memory_space<vmem>>, %arg2: memref<1x128xf32, #tpu.memory_space<vmem>>, %arg3: memref<1x128xf32, #tpu.memory_space<vmem>>, %arg4: memref<128x128xbf16, #tpu.memory_space<vmem>>, %arg5: memref<1x128xf32, #tpu.memory_space<vmem>>, %arg6: memref<1x128xf32, #tpu.memory_space<vmem>>, %arg7: memref<128x128xbf16, #tpu.memory_space<vmem>>, %arg8: memref<1x128xf32, #tpu.memory_space<vmem>>, %arg9: memref<1x128xf32, #tpu.memory_space<vmem>>, %arg10: memref<128x128xbf16, #tpu.memory_space<vmem>>, %arg11: memref<1x128xf32, #tpu.memory_space<vmem>>, %arg12: memref<1x128xf32, #tpu.memory_space<vmem>>, %arg13: memref<128x128xbf16, #tpu.memory_space<vmem>>, %arg14: memref<1x128xbf16, #tpu.memory_space<vmem>>, %arg15: memref<1x128xbf16, #tpu.memory_space<vmem>>) attributes {dimension_semantics = [#tpu.dimension_semantics<parallel>], iteration_bounds = array<i64: 1>, scalar_prefetch = 0 : i64, scratch_operands = 0 : i64, tpu.core_type = #tpu.core_type<tc>, window_params = [{transform_indices = @transform_0, window_bounds = array<i64: 1, 128>}, {pipeline_mode = #tpu.pipeline_mode<synchronous>, transform_indices = @transform_1, window_bounds = array<i64: 1, 128>}, {pipeline_mode = #tpu.pipeline_mode<synchronous>, transform_indices = @transform_2, window_bounds = array<i64: 1, 128>}, {pipeline_mode = #tpu.pipeline_mode<synchronous>, transform_indices = @transform_3, window_bounds = array<i64: 128, 128>}, {pipeline_mode = #tpu.pipeline_mode<synchronous>, transform_indices = @transform_4, window_bounds = array<i64: 1, 128>}, {pipeline_mode = #tpu.pipeline_mode<synchronous>, transform_indices = @transform_5, window_bounds = array<i64: 1, 128>}, {pipeline_mode = #tpu.pipeline_mode<synchronous>, transform_indices = @transform_6, window_bounds = array<i64: 128, 128>}, {pipeline_mode = #tpu.pipeline_mode<synchronous>, transform_indices = @transform_7, window_bounds = array<i64: 1, 128>}, {pipeline_mode = #tpu.pipeline_mode<synchronous>, transform_indices = @transform_8, window_bounds = array<i64: 1, 128>}, {pipeline_mode = #tpu.pipeline_mode<synchronous>, transform_indices = @transform_9, window_bounds = array<i64: 128, 128>}, {pipeline_mode = #tpu.pipeline_mode<synchronous>, transform_indices = @transform_10, window_bounds = array<i64: 1, 128>}, {pipeline_mode = #tpu.pipeline_mode<synchronous>, transform_indices = @transform_11, window_bounds = array<i64: 1, 128>}, {pipeline_mode = #tpu.pipeline_mode<synchronous>, transform_indices = @transform_12, window_bounds = array<i64: 128, 128>}, {transform_indices = @transform_13, window_bounds = array<i64: 1, 128>}, {transform_indices = @transform_14, window_bounds = array<i64: 1, 128>}]} {
    %c0 = arith.constant 0 : index
    %c0_0 = arith.constant 0 : index
    %0 = vector.load %arg1[%c0, %c0_0] : memref<1x128xbf16, #tpu.memory_space<vmem>>, vector<1x128xbf16>
    %1 = arith.extf %0 : vector<1x128xbf16> to vector<1x128xf32>
    %c0_1 = arith.constant 0 : index
    %c0_2 = arith.constant 0 : index
    %2 = vector.load %arg2[%c0_1, %c0_2] : memref<1x128xf32, #tpu.memory_space<vmem>>, vector<1x128xf32>
    %3 = arith.mulf %1, %2 : vector<1x128xf32>
    %c0_3 = arith.constant 0 : index
    %c0_4 = arith.constant 0 : index
    %4 = vector.load %arg3[%c0_3, %c0_4] : memref<1x128xf32, #tpu.memory_space<vmem>>, vector<1x128xf32>
    %5 = arith.addf %3, %4 : vector<1x128xf32>
    %cst = arith.constant 0.000000e+00 : f32
    %6 = vector.broadcast %cst : f32 to vector<1x128xf32>
    %7 = arith.maximumf %5, %6 : vector<1x128xf32>
    %8 = arith.truncf %7 : vector<1x128xf32> to vector<1x128xbf16>
    %c0_5 = arith.constant 0 : index
    %c0_6 = arith.constant 0 : index
    %9 = vector.load %arg4[%c0_5, %c0_6] : memref<128x128xbf16, #tpu.memory_space<vmem>>, vector<128x128xbf16>
    %cst_7 = arith.constant dense<0.000000e+00> : vector<1x128xf32>
    %10 = tpu.matmul %8, %9, %cst_7 {dimension_numbers = #tpu.dot_dimension_numbers<[1], [0], [0], [1], [0, 0, 1, 1], [], []>} : vector<1x128xbf16>, vector<128x128xbf16>, vector<1x128xf32> -> vector<1x128xf32>
    %c0_8 = arith.constant 0 : index
    %c0_9 = arith.constant 0 : index
    %11 = vector.load %arg5[%c0_8, %c0_9] : memref<1x128xf32, #tpu.memory_space<vmem>>, vector<1x128xf32>
    %12 = arith.mulf %10, %11 : vector<1x128xf32>
    %c0_10 = arith.constant 0 : index
    %c0_11 = arith.constant 0 : index
    %13 = vector.load %arg6[%c0_10, %c0_11] : memref<1x128xf32, #tpu.memory_space<vmem>>, vector<1x128xf32>
    %14 = arith.addf %12, %13 : vector<1x128xf32>
    %cst_12 = arith.constant 0.000000e+00 : f32
    %15 = vector.broadcast %cst_12 : f32 to vector<1x128xf32>
    %16 = arith.maximumf %14, %15 : vector<1x128xf32>
    %17 = arith.truncf %16 : vector<1x128xf32> to vector<1x128xbf16>
    %c0_13 = arith.constant 0 : index
    %c0_14 = arith.constant 0 : index
    %18 = vector.load %arg7[%c0_13, %c0_14] : memref<128x128xbf16, #tpu.memory_space<vmem>>, vector<128x128xbf16>
    %cst_15 = arith.constant dense<0.000000e+00> : vector<1x128xf32>
    %19 = tpu.matmul %17, %18, %cst_15 {dimension_numbers = #tpu.dot_dimension_numbers<[1], [0], [0], [1], [0, 0, 1, 1], [], []>} : vector<1x128xbf16>, vector<128x128xbf16>, vector<1x128xf32> -> vector<1x128xf32>
    %20 = arith.addf %1, %19 : vector<1x128xf32>
    %21 = arith.truncf %20 : vector<1x128xf32> to vector<1x128xbf16>
    %c0_16 = arith.constant 0 : index
    %c0_17 = arith.constant 0 : index
    %22 = vector.load %arg14[%c0_16, %c0_17] : memref<1x128xbf16, #tpu.memory_space<vmem>>, vector<1x128xbf16>
    tpu.vector_store %arg14[%c0_16, %c0_17], %21 {strides = array<i32>} : memref<1x128xbf16, #tpu.memory_space<vmem>>, vector<1x128xbf16>,
    %c0_18 = arith.constant 0 : index
    %c0_19 = arith.constant 0 : index
    %23 = vector.load %arg8[%c0_18, %c0_19] : memref<1x128xf32, #tpu.memory_space<vmem>>, vector<1x128xf32>
    %24 = arith.mulf %20, %23 : vector<1x128xf32>
    %c0_20 = arith.constant 0 : index
    %c0_21 = arith.constant 0 : index
    %25 = vector.load %arg9[%c0_20, %c0_21] : memref<1x128xf32, #tpu.memory_space<vmem>>, vector<1x128xf32>
    %26 = arith.addf %24, %25 : vector<1x128xf32>
    %cst_22 = arith.constant 0.000000e+00 : f32
    %27 = vector.broadcast %cst_22 : f32 to vector<1x128xf32>
    %28 = arith.maximumf %26, %27 : vector<1x128xf32>
    %29 = arith.truncf %28 : vector<1x128xf32> to vector<1x128xbf16>
    %c0_23 = arith.constant 0 : index
    %c0_24 = arith.constant 0 : index
    %30 = vector.load %arg10[%c0_23, %c0_24] : memref<128x128xbf16, #tpu.memory_space<vmem>>, vector<128x128xbf16>
    %cst_25 = arith.constant dense<0.000000e+00> : vector<1x128xf32>
    %31 = tpu.matmul %29, %30, %cst_25 {dimension_numbers = #tpu.dot_dimension_numbers<[1], [0], [0], [1], [0, 0, 1, 1], [], []>} : vector<1x128xbf16>, vector<128x128xbf16>, vector<1x128xf32> -> vector<1x128xf32>
    %c0_26 = arith.constant 0 : index
    %c0_27 = arith.constant 0 : index
    %32 = vector.load %arg11[%c0_26, %c0_27] : memref<1x128xf32, #tpu.memory_space<vmem>>, vector<1x128xf32>
    %33 = arith.mulf %31, %32 : vector<1x128xf32>
    %c0_28 = arith.constant 0 : index
    %c0_29 = arith.constant 0 : index
    %34 = vector.load %arg12[%c0_28, %c0_29] : memref<1x128xf32, #tpu.memory_space<vmem>>, vector<1x128xf32>
    %35 = arith.addf %33, %34 : vector<1x128xf32>
    %cst_30 = arith.constant 0.000000e+00 : f32
    %36 = vector.broadcast %cst_30 : f32 to vector<1x128xf32>
    %37 = arith.maximumf %35, %36 : vector<1x128xf32>
    %38 = arith.truncf %37 : vector<1x128xf32> to vector<1x128xbf16>
    %c0_31 = arith.constant 0 : index
    %c0_32 = arith.constant 0 : index
    %39 = vector.load %arg13[%c0_31, %c0_32] : memref<128x128xbf16, #tpu.memory_space<vmem>>, vector<128x128xbf16>
    %cst_33 = arith.constant dense<0.000000e+00> : vector<1x128xf32>
    %40 = tpu.matmul %38, %39, %cst_33 {dimension_numbers = #tpu.dot_dimension_numbers<[1], [0], [0], [1], [0, 0, 1, 1], [], []>} : vector<1x128xbf16>, vector<128x128xbf16>, vector<1x128xf32> -> vector<1x128xf32>
    %41 = arith.addf %20, %40 : vector<1x128xf32>
    %42 = arith.truncf %41 : vector<1x128xf32> to vector<1x128xbf16>
    %c0_34 = arith.constant 0 : index
    %c0_35 = arith.constant 0 : index
    %43 = vector.load %arg15[%c0_34, %c0_35] : memref<1x128xbf16, #tpu.memory_space<vmem>>, vector<1x128xbf16>
    tpu.vector_store %arg15[%c0_34, %c0_35], %42 {strides = array<i32>} : memref<1x128xbf16, #tpu.memory_space<vmem>>, vector<1x128xbf16>,
    return
  }
  func.func @transform_0(%arg0: i32) -> (i32, i32) {
    %c0_i32 = arith.constant 0 : i32
    %c0_i32_0 = arith.constant 0 : i32
    return %arg0, %c0_i32 : i32, i32
  }
  func.func @transform_1(%arg0: i32) -> (i32, i32) {
    %c0_i32 = arith.constant 0 : i32
    %c0_i32_0 = arith.constant 0 : i32
    %c0_i32_1 = arith.constant 0 : i32
    return %c0_i32, %c0_i32_0 : i32, i32
  }
  func.func @transform_2(%arg0: i32) -> (i32, i32) {
    %c0_i32 = arith.constant 0 : i32
    %c0_i32_0 = arith.constant 0 : i32
    %c0_i32_1 = arith.constant 0 : i32
    return %c0_i32, %c0_i32_0 : i32, i32
  }
  func.func @transform_3(%arg0: i32) -> (i32, i32) {
    %c0_i32 = arith.constant 0 : i32
    %c0_i32_0 = arith.constant 0 : i32
    %c0_i32_1 = arith.constant 0 : i32
    return %c0_i32, %c0_i32_0 : i32, i32
  }
  func.func @transform_4(%arg0: i32) -> (i32, i32) {
    %c0_i32 = arith.constant 0 : i32
    %c0_i32_0 = arith.constant 0 : i32
    %c0_i32_1 = arith.constant 0 : i32
    return %c0_i32, %c0_i32_0 : i32, i32
  }
  func.func @transform_5(%arg0: i32) -> (i32, i32) {
    %c0_i32 = arith.constant 0 : i32
    %c0_i32_0 = arith.constant 0 : i32
    %c0_i32_1 = arith.constant 0 : i32
    return %c0_i32, %c0_i32_0 : i32, i32
  }
  func.func @transform_6(%arg0: i32) -> (i32, i32) {
    %c0_i32 = arith.constant 0 : i32
    %c0_i32_0 = arith.constant 0 : i32
    %c0_i32_1 = arith.constant 0 : i32
    return %c0_i32, %c0_i32_0 : i32, i32
  }
  func.func @transform_7(%arg0: i32) -> (i32, i32) {
    %c0_i32 = arith.constant 0 : i32
    %c0_i32_0 = arith.constant 0 : i32
    %c0_i32_1 = arith.constant 0 : i32
    return %c0_i32, %c0_i32_0 : i32, i32
  }
  func.func @transform_8(%arg0: i32) -> (i32, i32) {
    %c0_i32 = arith.constant 0 : i32
    %c0_i32_0 = arith.constant 0 : i32
    %c0_i32_1 = arith.constant 0 : i32
    return %c0_i32, %c0_i32_0 : i32, i32
  }
  func.func @transform_9(%arg0: i32) -> (i32, i32) {
    %c0_i32 = arith.constant 0 : i32
    %c0_i32_0 = arith.constant 0 : i32
    %c0_i32_1 = arith.constant 0 : i32
    return %c0_i32, %c0_i32_0 : i32, i32
  }
  func.func @transform_10(%arg0: i32) -> (i32, i32) {
    %c0_i32 = arith.constant 0 : i32
    %c0_i32_0 = arith.constant 0 : i32
    %c0_i32_1 = arith.constant 0 : i32
    return %c0_i32, %c0_i32_0 : i32, i32
  }
  func.func @transform_11(%arg0: i32) -> (i32, i32) {
    %c0_i32 = arith.constant 0 : i32
    %c0_i32_0 = arith.constant 0 : i32
    %c0_i32_1 = arith.constant 0 : i32
    return %c0_i32, %c0_i32_0 : i32, i32
  }
  func.func @transform_12(%arg0: i32) -> (i32, i32) {
    %c0_i32 = arith.constant 0 : i32
    %c0_i32_0 = arith.constant 0 : i32
    %c0_i32_1 = arith.constant 0 : i32
    return %c0_i32, %c0_i32_0 : i32, i32
  }
  func.func @transform_13(%arg0: i32) -> (i32, i32) {
    %c0_i32 = arith.constant 0 : i32
    %c0_i32_0 = arith.constant 0 : i32
    return %arg0, %c0_i32 : i32, i32
  }
  func.func @transform_14(%arg0: i32) -> (i32, i32) {
    %c0_i32 = arith.constant 0 : i32
    %c0_i32_0 = arith.constant 0 : i32
    return %arg0, %c0_i32 : i32, i32
  }
}

module attributes {stable_mosaic.version = 11 : i64} {
  func.func @_maxpool_kernel(%arg0: i32, %arg1: memref<1x2x2x2x8xbf16, #tpu.memory_space<vmem>>, %arg2: memref<1x2x2x4xbf16, #tpu.memory_space<vmem>>) attributes {dimension_semantics = [#tpu.dimension_semantics<parallel>], iteration_bounds = array<i64: 2>, scalar_prefetch = 0 : i64, scratch_operands = 0 : i64, tpu.core_type = #tpu.core_type<tc>, window_params = [{transform_indices = @transform_0, window_bounds = array<i64: 1, 2, 2, 2, 8>}, {transform_indices = @transform_1, window_bounds = array<i64: 1, 2, 2, 4>}]} {
    %c0 = arith.constant 0 : index
    %c0_0 = arith.constant 0 : index
    %c0_1 = arith.constant 0 : index
    %c0_2 = arith.constant 0 : index
    %c0_3 = arith.constant 0 : index
    %0 = vector.load %arg1[%c0, %c0_0, %c0_1, %c0_2, %c0_3] : memref<1x2x2x2x8xbf16, #tpu.memory_space<vmem>>, vector<1x2x2x2x8xbf16>
    %1 = vector.shape_cast %0 : vector<1x2x2x2x8xbf16> to vector<2x2x2x8xbf16>
    %2 = vector.extract_strided_slice %1 {offsets = [0, 0, 0, 0], sizes = [2, 1, 2, 8], strides = [1, 1, 1, 1]} : vector<2x2x2x8xbf16> to vector<2x1x2x8xbf16>
    %3 = vector.shape_cast %2 : vector<2x1x2x8xbf16> to vector<2x2x8xbf16>
    %4 = vector.extract_strided_slice %1 {offsets = [0, 1, 0, 0], sizes = [2, 1, 2, 8], strides = [1, 1, 1, 1]} : vector<2x2x2x8xbf16> to vector<2x1x2x8xbf16>
    %5 = vector.shape_cast %4 : vector<2x1x2x8xbf16> to vector<2x2x8xbf16>
    %cst = arith.constant 0xFF80 : bf16
    %6 = vector.broadcast %cst : bf16 to vector<1x2x8xbf16>
    %7 = vector.extract_strided_slice %5 {offsets = [0, 0, 0], sizes = [1, 2, 8], strides = [1, 1, 1]} : vector<2x2x8xbf16> to vector<1x2x8xbf16>
    %8 = tpu.concatenate %6, %7 in 0 : vector<1x2x8xbf16>, vector<1x2x8xbf16> -> vector<2x2x8xbf16>
    %9 = arith.maximumf %3, %5 : vector<2x2x8xbf16>
    %10 = arith.maximumf %9, %8 : vector<2x2x8xbf16>
    %11 = vector.extract_strided_slice %10 {offsets = [0, 0, 0], sizes = [2, 2, 4], strides = [1, 1, 1]} : vector<2x2x8xbf16> to vector<2x2x4xbf16>
    %12 = vector.extract_strided_slice %10 {offsets = [0, 0, 4], sizes = [2, 2, 4], strides = [1, 1, 1]} : vector<2x2x8xbf16> to vector<2x2x4xbf16>
    %cst_4 = arith.constant 0xFF80 : bf16
    %13 = vector.broadcast %cst_4 : bf16 to vector<2x1x4xbf16>
    %14 = vector.extract_strided_slice %12 {offsets = [0, 0, 0], sizes = [2, 1, 4], strides = [1, 1, 1]} : vector<2x2x4xbf16> to vector<2x1x4xbf16>
    %15 = tpu.concatenate %13, %14 in 1 : vector<2x1x4xbf16>, vector<2x1x4xbf16> -> vector<2x2x4xbf16>
    %16 = arith.maximumf %11, %12 : vector<2x2x4xbf16>
    %17 = arith.maximumf %16, %15 : vector<2x2x4xbf16>
    %c0_5 = arith.constant 0 : index
    %c0_6 = arith.constant 0 : index
    %c0_7 = arith.constant 0 : index
    %c0_8 = arith.constant 0 : index
    %18 = vector.load %arg2[%c0_5, %c0_6, %c0_7, %c0_8] : memref<1x2x2x4xbf16, #tpu.memory_space<vmem>>, vector<1x2x2x4xbf16>
    %19 = vector.shape_cast %18 : vector<1x2x2x4xbf16> to vector<2x2x4xbf16>
    %20 = vector.shape_cast %17 : vector<2x2x4xbf16> to vector<1x2x2x4xbf16>
    tpu.vector_store %arg2[%c0_5, %c0_6, %c0_7, %c0_8], %20 {strides = array<i32>} : memref<1x2x2x4xbf16, #tpu.memory_space<vmem>>, vector<1x2x2x4xbf16>,
    return
  }
  func.func @transform_0(%arg0: i32) -> (i32, i32, i32, i32, i32) {
    %c0_i32 = arith.constant 0 : i32
    %c0_i32_0 = arith.constant 0 : i32
    %c0_i32_1 = arith.constant 0 : i32
    %c0_i32_2 = arith.constant 0 : i32
    %c0_i32_3 = arith.constant 0 : i32
    return %arg0, %c0_i32, %c0_i32_0, %c0_i32_1, %c0_i32_2 : i32, i32, i32, i32, i32
  }
  func.func @transform_1(%arg0: i32) -> (i32, i32, i32, i32) {
    %c0_i32 = arith.constant 0 : i32
    %c0_i32_0 = arith.constant 0 : i32
    %c0_i32_1 = arith.constant 0 : i32
    %c0_i32_2 = arith.constant 0 : i32
    return %arg0, %c0_i32, %c0_i32_0, %c0_i32_1 : i32, i32, i32, i32
  }
}

module attributes {stable_mosaic.version = 11 : i64} {
  func.func @_upsample_kernel(%arg0: i32, %arg1: memref<1x2x8xbf16, #tpu.memory_space<vmem>>, %arg2: memref<4x2xbf16, #tpu.memory_space<vmem>>, %arg3: memref<8x16xbf16, #tpu.memory_space<vmem>>, %arg4: memref<1x4x16xbf16, #tpu.memory_space<vmem>>) attributes {dimension_semantics = [#tpu.dimension_semantics<parallel>], iteration_bounds = array<i64: 2>, scalar_prefetch = 0 : i64, scratch_operands = 0 : i64, tpu.core_type = #tpu.core_type<tc>, window_params = [{transform_indices = @transform_0, window_bounds = array<i64: 1, 2, 8>}, {pipeline_mode = #tpu.pipeline_mode<synchronous>, transform_indices = @transform_1, window_bounds = array<i64: 4, 2>}, {pipeline_mode = #tpu.pipeline_mode<synchronous>, transform_indices = @transform_2, window_bounds = array<i64: 8, 16>}, {transform_indices = @transform_3, window_bounds = array<i64: 1, 4, 16>}]} {
    %c0 = arith.constant 0 : index
    %c0_0 = arith.constant 0 : index
    %c0_1 = arith.constant 0 : index
    %0 = vector.load %arg1[%c0, %c0_0, %c0_1] : memref<1x2x8xbf16, #tpu.memory_space<vmem>>, vector<1x2x8xbf16>
    %1 = vector.shape_cast %0 : vector<1x2x8xbf16> to vector<2x8xbf16>
    %c0_2 = arith.constant 0 : index
    %c0_3 = arith.constant 0 : index
    %2 = vector.load %arg2[%c0_2, %c0_3] : memref<4x2xbf16, #tpu.memory_space<vmem>>, vector<4x2xbf16>
    %cst = arith.constant dense<0.000000e+00> : vector<4x8xf32>
    %3 = tpu.matmul %2, %1, %cst {dimension_numbers = #tpu.dot_dimension_numbers<[1], [0], [0], [1], [0, 0, 1, 1], [], []>} : vector<4x2xbf16>, vector<2x8xbf16>, vector<4x8xf32> -> vector<4x8xf32>
    %4 = arith.truncf %3 : vector<4x8xf32> to vector<4x8xbf16>
    %c0_4 = arith.constant 0 : index
    %c0_5 = arith.constant 0 : index
    %5 = vector.load %arg3[%c0_4, %c0_5] : memref<8x16xbf16, #tpu.memory_space<vmem>>, vector<8x16xbf16>
    %cst_6 = arith.constant dense<0.000000e+00> : vector<4x16xf32>
    %6 = tpu.matmul %4, %5, %cst_6 {dimension_numbers = #tpu.dot_dimension_numbers<[1], [0], [0], [1], [0, 0, 1, 1], [], []>} : vector<4x8xbf16>, vector<8x16xbf16>, vector<4x16xf32> -> vector<4x16xf32>
    %7 = arith.truncf %6 : vector<4x16xf32> to vector<4x16xbf16>
    %c0_7 = arith.constant 0 : index
    %c0_8 = arith.constant 0 : index
    %c0_9 = arith.constant 0 : index
    %8 = vector.load %arg4[%c0_7, %c0_8, %c0_9] : memref<1x4x16xbf16, #tpu.memory_space<vmem>>, vector<1x4x16xbf16>
    %9 = vector.shape_cast %8 : vector<1x4x16xbf16> to vector<4x16xbf16>
    %10 = vector.shape_cast %7 : vector<4x16xbf16> to vector<1x4x16xbf16>
    tpu.vector_store %arg4[%c0_7, %c0_8, %c0_9], %10 {strides = array<i32>} : memref<1x4x16xbf16, #tpu.memory_space<vmem>>, vector<1x4x16xbf16>,
    return
  }
  func.func @transform_0(%arg0: i32) -> (i32, i32, i32) {
    %c0_i32 = arith.constant 0 : i32
    %c0_i32_0 = arith.constant 0 : i32
    %c0_i32_1 = arith.constant 0 : i32
    return %arg0, %c0_i32, %c0_i32_0 : i32, i32, i32
  }
  func.func @transform_1(%arg0: i32) -> (i32, i32) {
    %c0_i32 = arith.constant 0 : i32
    %c0_i32_0 = arith.constant 0 : i32
    %c0_i32_1 = arith.constant 0 : i32
    return %c0_i32, %c0_i32_0 : i32, i32
  }
  func.func @transform_2(%arg0: i32) -> (i32, i32) {
    %c0_i32 = arith.constant 0 : i32
    %c0_i32_0 = arith.constant 0 : i32
    %c0_i32_1 = arith.constant 0 : i32
    return %c0_i32, %c0_i32_0 : i32, i32
  }
  func.func @transform_3(%arg0: i32) -> (i32, i32, i32) {
    %c0_i32 = arith.constant 0 : i32
    %c0_i32_0 = arith.constant 0 : i32
    %c0_i32_1 = arith.constant 0 : i32
    return %arg0, %c0_i32, %c0_i32_0 : i32, i32, i32
  }
}

module attributes {stable_mosaic.version = 11 : i64} {
  func.func @_resblock2_kernel(%arg0: i32, %arg1: memref<1x32xbf16, #tpu.memory_space<vmem>>, %arg2: memref<1x32xf32, #tpu.memory_space<vmem>>, %arg3: memref<1x32xf32, #tpu.memory_space<vmem>>, %arg4: memref<32x32xbf16, #tpu.memory_space<vmem>>, %arg5: memref<1x32xf32, #tpu.memory_space<vmem>>, %arg6: memref<1x32xf32, #tpu.memory_space<vmem>>, %arg7: memref<32x32xbf16, #tpu.memory_space<vmem>>, %arg8: memref<1x32xf32, #tpu.memory_space<vmem>>, %arg9: memref<1x32xf32, #tpu.memory_space<vmem>>, %arg10: memref<32x32xbf16, #tpu.memory_space<vmem>>, %arg11: memref<1x32xf32, #tpu.memory_space<vmem>>, %arg12: memref<1x32xf32, #tpu.memory_space<vmem>>, %arg13: memref<32x32xbf16, #tpu.memory_space<vmem>>, %arg14: memref<1x32xbf16, #tpu.memory_space<vmem>>) attributes {dimension_semantics = [#tpu.dimension_semantics<parallel>], iteration_bounds = array<i64: 1>, scalar_prefetch = 0 : i64, scratch_operands = 0 : i64, tpu.core_type = #tpu.core_type<tc>, window_params = [{transform_indices = @transform_0, window_bounds = array<i64: 1, 32>}, {pipeline_mode = #tpu.pipeline_mode<synchronous>, transform_indices = @transform_1, window_bounds = array<i64: 1, 32>}, {pipeline_mode = #tpu.pipeline_mode<synchronous>, transform_indices = @transform_2, window_bounds = array<i64: 1, 32>}, {pipeline_mode = #tpu.pipeline_mode<synchronous>, transform_indices = @transform_3, window_bounds = array<i64: 32, 32>}, {pipeline_mode = #tpu.pipeline_mode<synchronous>, transform_indices = @transform_4, window_bounds = array<i64: 1, 32>}, {pipeline_mode = #tpu.pipeline_mode<synchronous>, transform_indices = @transform_5, window_bounds = array<i64: 1, 32>}, {pipeline_mode = #tpu.pipeline_mode<synchronous>, transform_indices = @transform_6, window_bounds = array<i64: 32, 32>}, {pipeline_mode = #tpu.pipeline_mode<synchronous>, transform_indices = @transform_7, window_bounds = array<i64: 1, 32>}, {pipeline_mode = #tpu.pipeline_mode<synchronous>, transform_indices = @transform_8, window_bounds = array<i64: 1, 32>}, {pipeline_mode = #tpu.pipeline_mode<synchronous>, transform_indices = @transform_9, window_bounds = array<i64: 32, 32>}, {pipeline_mode = #tpu.pipeline_mode<synchronous>, transform_indices = @transform_10, window_bounds = array<i64: 1, 32>}, {pipeline_mode = #tpu.pipeline_mode<synchronous>, transform_indices = @transform_11, window_bounds = array<i64: 1, 32>}, {pipeline_mode = #tpu.pipeline_mode<synchronous>, transform_indices = @transform_12, window_bounds = array<i64: 32, 32>}, {transform_indices = @transform_13, window_bounds = array<i64: 1, 32>}]} {
    %c0 = arith.constant 0 : index
    %c0_0 = arith.constant 0 : index
    %0 = vector.load %arg1[%c0, %c0_0] : memref<1x32xbf16, #tpu.memory_space<vmem>>, vector<1x32xbf16>
    %1 = arith.extf %0 : vector<1x32xbf16> to vector<1x32xf32>
    %c0_1 = arith.constant 0 : index
    %c0_2 = arith.constant 0 : index
    %2 = vector.load %arg2[%c0_1, %c0_2] : memref<1x32xf32, #tpu.memory_space<vmem>>, vector<1x32xf32>
    %3 = arith.mulf %1, %2 : vector<1x32xf32>
    %c0_3 = arith.constant 0 : index
    %c0_4 = arith.constant 0 : index
    %4 = vector.load %arg3[%c0_3, %c0_4] : memref<1x32xf32, #tpu.memory_space<vmem>>, vector<1x32xf32>
    %5 = arith.addf %3, %4 : vector<1x32xf32>
    %cst = arith.constant 0.000000e+00 : f32
    %6 = vector.broadcast %cst : f32 to vector<1x32xf32>
    %7 = arith.maximumf %5, %6 : vector<1x32xf32>
    %8 = arith.truncf %7 : vector<1x32xf32> to vector<1x32xbf16>
    %c0_5 = arith.constant 0 : index
    %c0_6 = arith.constant 0 : index
    %9 = vector.load %arg4[%c0_5, %c0_6] : memref<32x32xbf16, #tpu.memory_space<vmem>>, vector<32x32xbf16>
    %cst_7 = arith.constant dense<0.000000e+00> : vector<1x32xf32>
    %10 = tpu.matmul %8, %9, %cst_7 {dimension_numbers = #tpu.dot_dimension_numbers<[1], [0], [0], [1], [0, 0, 1, 1], [], []>} : vector<1x32xbf16>, vector<32x32xbf16>, vector<1x32xf32> -> vector<1x32xf32>
    %c0_8 = arith.constant 0 : index
    %c0_9 = arith.constant 0 : index
    %11 = vector.load %arg5[%c0_8, %c0_9] : memref<1x32xf32, #tpu.memory_space<vmem>>, vector<1x32xf32>
    %12 = arith.mulf %10, %11 : vector<1x32xf32>
    %c0_10 = arith.constant 0 : index
    %c0_11 = arith.constant 0 : index
    %13 = vector.load %arg6[%c0_10, %c0_11] : memref<1x32xf32, #tpu.memory_space<vmem>>, vector<1x32xf32>
    %14 = arith.addf %12, %13 : vector<1x32xf32>
    %cst_12 = arith.constant 0.000000e+00 : f32
    %15 = vector.broadcast %cst_12 : f32 to vector<1x32xf32>
    %16 = arith.maximumf %14, %15 : vector<1x32xf32>
    %17 = arith.truncf %16 : vector<1x32xf32> to vector<1x32xbf16>
    %c0_13 = arith.constant 0 : index
    %c0_14 = arith.constant 0 : index
    %18 = vector.load %arg7[%c0_13, %c0_14] : memref<32x32xbf16, #tpu.memory_space<vmem>>, vector<32x32xbf16>
    %cst_15 = arith.constant dense<0.000000e+00> : vector<1x32xf32>
    %19 = tpu.matmul %17, %18, %cst_15 {dimension_numbers = #tpu.dot_dimension_numbers<[1], [0], [0], [1], [0, 0, 1, 1], [], []>} : vector<1x32xbf16>, vector<32x32xbf16>, vector<1x32xf32> -> vector<1x32xf32>
    %20 = arith.addf %1, %19 : vector<1x32xf32>
    %c0_16 = arith.constant 0 : index
    %c0_17 = arith.constant 0 : index
    %21 = vector.load %arg8[%c0_16, %c0_17] : memref<1x32xf32, #tpu.memory_space<vmem>>, vector<1x32xf32>
    %22 = arith.mulf %20, %21 : vector<1x32xf32>
    %c0_18 = arith.constant 0 : index
    %c0_19 = arith.constant 0 : index
    %23 = vector.load %arg9[%c0_18, %c0_19] : memref<1x32xf32, #tpu.memory_space<vmem>>, vector<1x32xf32>
    %24 = arith.addf %22, %23 : vector<1x32xf32>
    %cst_20 = arith.constant 0.000000e+00 : f32
    %25 = vector.broadcast %cst_20 : f32 to vector<1x32xf32>
    %26 = arith.maximumf %24, %25 : vector<1x32xf32>
    %27 = arith.truncf %26 : vector<1x32xf32> to vector<1x32xbf16>
    %c0_21 = arith.constant 0 : index
    %c0_22 = arith.constant 0 : index
    %28 = vector.load %arg10[%c0_21, %c0_22] : memref<32x32xbf16, #tpu.memory_space<vmem>>, vector<32x32xbf16>
    %cst_23 = arith.constant dense<0.000000e+00> : vector<1x32xf32>
    %29 = tpu.matmul %27, %28, %cst_23 {dimension_numbers = #tpu.dot_dimension_numbers<[1], [0], [0], [1], [0, 0, 1, 1], [], []>} : vector<1x32xbf16>, vector<32x32xbf16>, vector<1x32xf32> -> vector<1x32xf32>
    %c0_24 = arith.constant 0 : index
    %c0_25 = arith.constant 0 : index
    %30 = vector.load %arg11[%c0_24, %c0_25] : memref<1x32xf32, #tpu.memory_space<vmem>>, vector<1x32xf32>
    %31 = arith.mulf %29, %30 : vector<1x32xf32>
    %c0_26 = arith.constant 0 : index
    %c0_27 = arith.constant 0 : index
    %32 = vector.load %arg12[%c0_26, %c0_27] : memref<1x32xf32, #tpu.memory_space<vmem>>, vector<1x32xf32>
    %33 = arith.addf %31, %32 : vector<1x32xf32>
    %cst_28 = arith.constant 0.000000e+00 : f32
    %34 = vector.broadcast %cst_28 : f32 to vector<1x32xf32>
    %35 = arith.maximumf %33, %34 : vector<1x32xf32>
    %36 = arith.truncf %35 : vector<1x32xf32> to vector<1x32xbf16>
    %c0_29 = arith.constant 0 : index
    %c0_30 = arith.constant 0 : index
    %37 = vector.load %arg13[%c0_29, %c0_30] : memref<32x32xbf16, #tpu.memory_space<vmem>>, vector<32x32xbf16>
    %cst_31 = arith.constant dense<0.000000e+00> : vector<1x32xf32>
    %38 = tpu.matmul %36, %37, %cst_31 {dimension_numbers = #tpu.dot_dimension_numbers<[1], [0], [0], [1], [0, 0, 1, 1], [], []>} : vector<1x32xbf16>, vector<32x32xbf16>, vector<1x32xf32> -> vector<1x32xf32>
    %39 = arith.addf %20, %38 : vector<1x32xf32>
    %40 = arith.truncf %39 : vector<1x32xf32> to vector<1x32xbf16>
    %c0_32 = arith.constant 0 : index
    %c0_33 = arith.constant 0 : index
    %41 = vector.load %arg14[%c0_32, %c0_33] : memref<1x32xbf16, #tpu.memory_space<vmem>>, vector<1x32xbf16>
    tpu.vector_store %arg14[%c0_32, %c0_33], %40 {strides = array<i32>} : memref<1x32xbf16, #tpu.memory_space<vmem>>, vector<1x32xbf16>,
    return
  }
  func.func @transform_0(%arg0: i32) -> (i32, i32) {
    %c0_i32 = arith.constant 0 : i32
    %c0_i32_0 = arith.constant 0 : i32
    return %arg0, %c0_i32 : i32, i32
  }
  func.func @transform_1(%arg0: i32) -> (i32, i32) {
    %c0_i32 = arith.constant 0 : i32
    %c0_i32_0 = arith.constant 0 : i32
    %c0_i32_1 = arith.constant 0 : i32
    return %c0_i32, %c0_i32_0 : i32, i32
  }
  func.func @transform_2(%arg0: i32) -> (i32, i32) {
    %c0_i32 = arith.constant 0 : i32
    %c0_i32_0 = arith.constant 0 : i32
    %c0_i32_1 = arith.constant 0 : i32
    return %c0_i32, %c0_i32_0 : i32, i32
  }
  func.func @transform_3(%arg0: i32) -> (i32, i32) {
    %c0_i32 = arith.constant 0 : i32
    %c0_i32_0 = arith.constant 0 : i32
    %c0_i32_1 = arith.constant 0 : i32
    return %c0_i32, %c0_i32_0 : i32, i32
  }
  func.func @transform_4(%arg0: i32) -> (i32, i32) {
    %c0_i32 = arith.constant 0 : i32
    %c0_i32_0 = arith.constant 0 : i32
    %c0_i32_1 = arith.constant 0 : i32
    return %c0_i32, %c0_i32_0 : i32, i32
  }
  func.func @transform_5(%arg0: i32) -> (i32, i32) {
    %c0_i32 = arith.constant 0 : i32
    %c0_i32_0 = arith.constant 0 : i32
    %c0_i32_1 = arith.constant 0 : i32
    return %c0_i32, %c0_i32_0 : i32, i32
  }
  func.func @transform_6(%arg0: i32) -> (i32, i32) {
    %c0_i32 = arith.constant 0 : i32
    %c0_i32_0 = arith.constant 0 : i32
    %c0_i32_1 = arith.constant 0 : i32
    return %c0_i32, %c0_i32_0 : i32, i32
  }
  func.func @transform_7(%arg0: i32) -> (i32, i32) {
    %c0_i32 = arith.constant 0 : i32
    %c0_i32_0 = arith.constant 0 : i32
    %c0_i32_1 = arith.constant 0 : i32
    return %c0_i32, %c0_i32_0 : i32, i32
  }
  func.func @transform_8(%arg0: i32) -> (i32, i32) {
    %c0_i32 = arith.constant 0 : i32
    %c0_i32_0 = arith.constant 0 : i32
    %c0_i32_1 = arith.constant 0 : i32
    return %c0_i32, %c0_i32_0 : i32, i32
  }
  func.func @transform_9(%arg0: i32) -> (i32, i32) {
    %c0_i32 = arith.constant 0 : i32
    %c0_i32_0 = arith.constant 0 : i32
    %c0_i32_1 = arith.constant 0 : i32
    return %c0_i32, %c0_i32_0 : i32, i32
  }
  func.func @transform_10(%arg0: i32) -> (i32, i32) {
    %c0_i32 = arith.constant 0 : i32
    %c0_i32_0 = arith.constant 0 : i32
    %c0_i32_1 = arith.constant 0 : i32
    return %c0_i32, %c0_i32_0 : i32, i32
  }
  func.func @transform_11(%arg0: i32) -> (i32, i32) {
    %c0_i32 = arith.constant 0 : i32
    %c0_i32_0 = arith.constant 0 : i32
    %c0_i32_1 = arith.constant 0 : i32
    return %c0_i32, %c0_i32_0 : i32, i32
  }
  func.func @transform_12(%arg0: i32) -> (i32, i32) {
    %c0_i32 = arith.constant 0 : i32
    %c0_i32_0 = arith.constant 0 : i32
    %c0_i32_1 = arith.constant 0 : i32
    return %c0_i32, %c0_i32_0 : i32, i32
  }
  func.func @transform_13(%arg0: i32) -> (i32, i32) {
    %c0_i32 = arith.constant 0 : i32
    %c0_i32_0 = arith.constant 0 : i32
    return %arg0, %c0_i32 : i32, i32
  }
}

module attributes {stable_mosaic.version = 11 : i64} {
  func.func @_resblock_add_kernel(%arg0: i32, %arg1: memref<1x128xbf16, #tpu.memory_space<vmem>>, %arg2: memref<1x128xbf16, #tpu.memory_space<vmem>>, %arg3: memref<1x128xf32, #tpu.memory_space<vmem>>, %arg4: memref<1x128xf32, #tpu.memory_space<vmem>>, %arg5: memref<128x128xbf16, #tpu.memory_space<vmem>>, %arg6: memref<1x128xf32, #tpu.memory_space<vmem>>, %arg7: memref<1x128xf32, #tpu.memory_space<vmem>>, %arg8: memref<128x128xbf16, #tpu.memory_space<vmem>>, %arg9: memref<1x128xbf16, #tpu.memory_space<vmem>>) attributes {dimension_semantics = [#tpu.dimension_semantics<parallel>], iteration_bounds = array<i64: 1>, scalar_prefetch = 0 : i64, scratch_operands = 0 : i64, tpu.core_type = #tpu.core_type<tc>, window_params = [{transform_indices = @transform_0, window_bounds = array<i64: 1, 128>}, {transform_indices = @transform_1, window_bounds = array<i64: 1, 128>}, {pipeline_mode = #tpu.pipeline_mode<synchronous>, transform_indices = @transform_2, window_bounds = array<i64: 1, 128>}, {pipeline_mode = #tpu.pipeline_mode<synchronous>, transform_indices = @transform_3, window_bounds = array<i64: 1, 128>}, {pipeline_mode = #tpu.pipeline_mode<synchronous>, transform_indices = @transform_4, window_bounds = array<i64: 128, 128>}, {pipeline_mode = #tpu.pipeline_mode<synchronous>, transform_indices = @transform_5, window_bounds = array<i64: 1, 128>}, {pipeline_mode = #tpu.pipeline_mode<synchronous>, transform_indices = @transform_6, window_bounds = array<i64: 1, 128>}, {pipeline_mode = #tpu.pipeline_mode<synchronous>, transform_indices = @transform_7, window_bounds = array<i64: 128, 128>}, {transform_indices = @transform_8, window_bounds = array<i64: 1, 128>}]} {
    %c0 = arith.constant 0 : index
    %c0_0 = arith.constant 0 : index
    %0 = vector.load %arg1[%c0, %c0_0] : memref<1x128xbf16, #tpu.memory_space<vmem>>, vector<1x128xbf16>
    %1 = arith.extf %0 : vector<1x128xbf16> to vector<1x128xf32>
    %c0_1 = arith.constant 0 : index
    %c0_2 = arith.constant 0 : index
    %2 = vector.load %arg2[%c0_1, %c0_2] : memref<1x128xbf16, #tpu.memory_space<vmem>>, vector<1x128xbf16>
    %3 = arith.extf %2 : vector<1x128xbf16> to vector<1x128xf32>
    %4 = arith.addf %1, %3 : vector<1x128xf32>
    %c0_3 = arith.constant 0 : index
    %c0_4 = arith.constant 0 : index
    %5 = vector.load %arg3[%c0_3, %c0_4] : memref<1x128xf32, #tpu.memory_space<vmem>>, vector<1x128xf32>
    %6 = arith.mulf %4, %5 : vector<1x128xf32>
    %c0_5 = arith.constant 0 : index
    %c0_6 = arith.constant 0 : index
    %7 = vector.load %arg4[%c0_5, %c0_6] : memref<1x128xf32, #tpu.memory_space<vmem>>, vector<1x128xf32>
    %8 = arith.addf %6, %7 : vector<1x128xf32>
    %cst = arith.constant 0.000000e+00 : f32
    %9 = vector.broadcast %cst : f32 to vector<1x128xf32>
    %10 = arith.maximumf %8, %9 : vector<1x128xf32>
    %11 = arith.truncf %10 : vector<1x128xf32> to vector<1x128xbf16>
    %c0_7 = arith.constant 0 : index
    %c0_8 = arith.constant 0 : index
    %12 = vector.load %arg5[%c0_7, %c0_8] : memref<128x128xbf16, #tpu.memory_space<vmem>>, vector<128x128xbf16>
    %cst_9 = arith.constant dense<0.000000e+00> : vector<1x128xf32>
    %13 = tpu.matmul %11, %12, %cst_9 {dimension_numbers = #tpu.dot_dimension_numbers<[1], [0], [0], [1], [0, 0, 1, 1], [], []>} : vector<1x128xbf16>, vector<128x128xbf16>, vector<1x128xf32> -> vector<1x128xf32>
    %c0_10 = arith.constant 0 : index
    %c0_11 = arith.constant 0 : index
    %14 = vector.load %arg6[%c0_10, %c0_11] : memref<1x128xf32, #tpu.memory_space<vmem>>, vector<1x128xf32>
    %15 = arith.mulf %13, %14 : vector<1x128xf32>
    %c0_12 = arith.constant 0 : index
    %c0_13 = arith.constant 0 : index
    %16 = vector.load %arg7[%c0_12, %c0_13] : memref<1x128xf32, #tpu.memory_space<vmem>>, vector<1x128xf32>
    %17 = arith.addf %15, %16 : vector<1x128xf32>
    %cst_14 = arith.constant 0.000000e+00 : f32
    %18 = vector.broadcast %cst_14 : f32 to vector<1x128xf32>
    %19 = arith.maximumf %17, %18 : vector<1x128xf32>
    %20 = arith.truncf %19 : vector<1x128xf32> to vector<1x128xbf16>
    %c0_15 = arith.constant 0 : index
    %c0_16 = arith.constant 0 : index
    %21 = vector.load %arg8[%c0_15, %c0_16] : memref<128x128xbf16, #tpu.memory_space<vmem>>, vector<128x128xbf16>
    %cst_17 = arith.constant dense<0.000000e+00> : vector<1x128xf32>
    %22 = tpu.matmul %20, %21, %cst_17 {dimension_numbers = #tpu.dot_dimension_numbers<[1], [0], [0], [1], [0, 0, 1, 1], [], []>} : vector<1x128xbf16>, vector<128x128xbf16>, vector<1x128xf32> -> vector<1x128xf32>
    %23 = arith.addf %4, %22 : vector<1x128xf32>
    %24 = arith.truncf %23 : vector<1x128xf32> to vector<1x128xbf16>
    %c0_18 = arith.constant 0 : index
    %c0_19 = arith.constant 0 : index
    %25 = vector.load %arg9[%c0_18, %c0_19] : memref<1x128xbf16, #tpu.memory_space<vmem>>, vector<1x128xbf16>
    tpu.vector_store %arg9[%c0_18, %c0_19], %24 {strides = array<i32>} : memref<1x128xbf16, #tpu.memory_space<vmem>>, vector<1x128xbf16>,
    return
  }
  func.func @transform_0(%arg0: i32) -> (i32, i32) {
    %c0_i32 = arith.constant 0 : i32
    %c0_i32_0 = arith.constant 0 : i32
    return %arg0, %c0_i32 : i32, i32
  }
  func.func @transform_1(%arg0: i32) -> (i32, i32) {
    %c0_i32 = arith.constant 0 : i32
    %c0_i32_0 = arith.constant 0 : i32
    return %arg0, %c0_i32 : i32, i32
  }
  func.func @transform_2(%arg0: i32) -> (i32, i32) {
    %c0_i32 = arith.constant 0 : i32
    %c0_i32_0 = arith.constant 0 : i32
    %c0_i32_1 = arith.constant 0 : i32
    return %c0_i32, %c0_i32_0 : i32, i32
  }
  func.func @transform_3(%arg0: i32) -> (i32, i32) {
    %c0_i32 = arith.constant 0 : i32
    %c0_i32_0 = arith.constant 0 : i32
    %c0_i32_1 = arith.constant 0 : i32
    return %c0_i32, %c0_i32_0 : i32, i32
  }
  func.func @transform_4(%arg0: i32) -> (i32, i32) {
    %c0_i32 = arith.constant 0 : i32
    %c0_i32_0 = arith.constant 0 : i32
    %c0_i32_1 = arith.constant 0 : i32
    return %c0_i32, %c0_i32_0 : i32, i32
  }
  func.func @transform_5(%arg0: i32) -> (i32, i32) {
    %c0_i32 = arith.constant 0 : i32
    %c0_i32_0 = arith.constant 0 : i32
    %c0_i32_1 = arith.constant 0 : i32
    return %c0_i32, %c0_i32_0 : i32, i32
  }
  func.func @transform_6(%arg0: i32) -> (i32, i32) {
    %c0_i32 = arith.constant 0 : i32
    %c0_i32_0 = arith.constant 0 : i32
    %c0_i32_1 = arith.constant 0 : i32
    return %c0_i32, %c0_i32_0 : i32, i32
  }
  func.func @transform_7(%arg0: i32) -> (i32, i32) {
    %c0_i32 = arith.constant 0 : i32
    %c0_i32_0 = arith.constant 0 : i32
    %c0_i32_1 = arith.constant 0 : i32
    return %c0_i32, %c0_i32_0 : i32, i32
  }
  func.func @transform_8(%arg0: i32) -> (i32, i32) {
    %c0_i32 = arith.constant 0 : i32
    %c0_i32_0 = arith.constant 0 : i32
    return %arg0, %c0_i32 : i32, i32
  }
}

module attributes {stable_mosaic.version = 11 : i64} {
  func.func @_upsample_kernel(%arg0: i32, %arg1: memref<1x4x16xbf16, #tpu.memory_space<vmem>>, %arg2: memref<8x4xbf16, #tpu.memory_space<vmem>>, %arg3: memref<16x32xbf16, #tpu.memory_space<vmem>>, %arg4: memref<1x8x32xbf16, #tpu.memory_space<vmem>>) attributes {dimension_semantics = [#tpu.dimension_semantics<parallel>], iteration_bounds = array<i64: 2>, scalar_prefetch = 0 : i64, scratch_operands = 0 : i64, tpu.core_type = #tpu.core_type<tc>, window_params = [{transform_indices = @transform_0, window_bounds = array<i64: 1, 4, 16>}, {pipeline_mode = #tpu.pipeline_mode<synchronous>, transform_indices = @transform_1, window_bounds = array<i64: 8, 4>}, {pipeline_mode = #tpu.pipeline_mode<synchronous>, transform_indices = @transform_2, window_bounds = array<i64: 16, 32>}, {transform_indices = @transform_3, window_bounds = array<i64: 1, 8, 32>}]} {
    %c0 = arith.constant 0 : index
    %c0_0 = arith.constant 0 : index
    %c0_1 = arith.constant 0 : index
    %0 = vector.load %arg1[%c0, %c0_0, %c0_1] : memref<1x4x16xbf16, #tpu.memory_space<vmem>>, vector<1x4x16xbf16>
    %1 = vector.shape_cast %0 : vector<1x4x16xbf16> to vector<4x16xbf16>
    %c0_2 = arith.constant 0 : index
    %c0_3 = arith.constant 0 : index
    %2 = vector.load %arg2[%c0_2, %c0_3] : memref<8x4xbf16, #tpu.memory_space<vmem>>, vector<8x4xbf16>
    %cst = arith.constant dense<0.000000e+00> : vector<8x16xf32>
    %3 = tpu.matmul %2, %1, %cst {dimension_numbers = #tpu.dot_dimension_numbers<[1], [0], [0], [1], [0, 0, 1, 1], [], []>} : vector<8x4xbf16>, vector<4x16xbf16>, vector<8x16xf32> -> vector<8x16xf32>
    %4 = arith.truncf %3 : vector<8x16xf32> to vector<8x16xbf16>
    %c0_4 = arith.constant 0 : index
    %c0_5 = arith.constant 0 : index
    %5 = vector.load %arg3[%c0_4, %c0_5] : memref<16x32xbf16, #tpu.memory_space<vmem>>, vector<16x32xbf16>
    %cst_6 = arith.constant dense<0.000000e+00> : vector<8x32xf32>
    %6 = tpu.matmul %4, %5, %cst_6 {dimension_numbers = #tpu.dot_dimension_numbers<[1], [0], [0], [1], [0, 0, 1, 1], [], []>} : vector<8x16xbf16>, vector<16x32xbf16>, vector<8x32xf32> -> vector<8x32xf32>
    %7 = arith.truncf %6 : vector<8x32xf32> to vector<8x32xbf16>
    %c0_7 = arith.constant 0 : index
    %c0_8 = arith.constant 0 : index
    %c0_9 = arith.constant 0 : index
    %8 = vector.load %arg4[%c0_7, %c0_8, %c0_9] : memref<1x8x32xbf16, #tpu.memory_space<vmem>>, vector<1x8x32xbf16>
    %9 = vector.shape_cast %8 : vector<1x8x32xbf16> to vector<8x32xbf16>
    %10 = vector.shape_cast %7 : vector<8x32xbf16> to vector<1x8x32xbf16>
    tpu.vector_store %arg4[%c0_7, %c0_8, %c0_9], %10 {strides = array<i32>} : memref<1x8x32xbf16, #tpu.memory_space<vmem>>, vector<1x8x32xbf16>,
    return
  }
  func.func @transform_0(%arg0: i32) -> (i32, i32, i32) {
    %c0_i32 = arith.constant 0 : i32
    %c0_i32_0 = arith.constant 0 : i32
    %c0_i32_1 = arith.constant 0 : i32
    return %arg0, %c0_i32, %c0_i32_0 : i32, i32, i32
  }
  func.func @transform_1(%arg0: i32) -> (i32, i32) {
    %c0_i32 = arith.constant 0 : i32
    %c0_i32_0 = arith.constant 0 : i32
    %c0_i32_1 = arith.constant 0 : i32
    return %c0_i32, %c0_i32_0 : i32, i32
  }
  func.func @transform_2(%arg0: i32) -> (i32, i32) {
    %c0_i32 = arith.constant 0 : i32
    %c0_i32_0 = arith.constant 0 : i32
    %c0_i32_1 = arith.constant 0 : i32
    return %c0_i32, %c0_i32_0 : i32, i32
  }
  func.func @transform_3(%arg0: i32) -> (i32, i32, i32) {
    %c0_i32 = arith.constant 0 : i32
    %c0_i32_0 = arith.constant 0 : i32
    %c0_i32_1 = arith.constant 0 : i32
    return %arg0, %c0_i32, %c0_i32_0 : i32, i32, i32
  }
}

module attributes {stable_mosaic.version = 11 : i64} {
  func.func @_resblock_add_kernel(%arg0: i32, %arg1: memref<4x128xbf16, #tpu.memory_space<vmem>>, %arg2: memref<4x128xbf16, #tpu.memory_space<vmem>>, %arg3: memref<1x128xf32, #tpu.memory_space<vmem>>, %arg4: memref<1x128xf32, #tpu.memory_space<vmem>>, %arg5: memref<128x128xbf16, #tpu.memory_space<vmem>>, %arg6: memref<1x128xf32, #tpu.memory_space<vmem>>, %arg7: memref<1x128xf32, #tpu.memory_space<vmem>>, %arg8: memref<128x128xbf16, #tpu.memory_space<vmem>>, %arg9: memref<4x128xbf16, #tpu.memory_space<vmem>>) attributes {dimension_semantics = [#tpu.dimension_semantics<parallel>], iteration_bounds = array<i64: 1>, scalar_prefetch = 0 : i64, scratch_operands = 0 : i64, tpu.core_type = #tpu.core_type<tc>, window_params = [{transform_indices = @transform_0, window_bounds = array<i64: 4, 128>}, {transform_indices = @transform_1, window_bounds = array<i64: 4, 128>}, {pipeline_mode = #tpu.pipeline_mode<synchronous>, transform_indices = @transform_2, window_bounds = array<i64: 1, 128>}, {pipeline_mode = #tpu.pipeline_mode<synchronous>, transform_indices = @transform_3, window_bounds = array<i64: 1, 128>}, {pipeline_mode = #tpu.pipeline_mode<synchronous>, transform_indices = @transform_4, window_bounds = array<i64: 128, 128>}, {pipeline_mode = #tpu.pipeline_mode<synchronous>, transform_indices = @transform_5, window_bounds = array<i64: 1, 128>}, {pipeline_mode = #tpu.pipeline_mode<synchronous>, transform_indices = @transform_6, window_bounds = array<i64: 1, 128>}, {pipeline_mode = #tpu.pipeline_mode<synchronous>, transform_indices = @transform_7, window_bounds = array<i64: 128, 128>}, {transform_indices = @transform_8, window_bounds = array<i64: 4, 128>}]} {
    %c0 = arith.constant 0 : index
    %c0_0 = arith.constant 0 : index
    %0 = vector.load %arg1[%c0, %c0_0] : memref<4x128xbf16, #tpu.memory_space<vmem>>, vector<4x128xbf16>
    %1 = arith.extf %0 : vector<4x128xbf16> to vector<4x128xf32>
    %c0_1 = arith.constant 0 : index
    %c0_2 = arith.constant 0 : index
    %2 = vector.load %arg2[%c0_1, %c0_2] : memref<4x128xbf16, #tpu.memory_space<vmem>>, vector<4x128xbf16>
    %3 = arith.extf %2 : vector<4x128xbf16> to vector<4x128xf32>
    %4 = arith.addf %1, %3 : vector<4x128xf32>
    %c0_3 = arith.constant 0 : index
    %c0_4 = arith.constant 0 : index
    %5 = vector.load %arg3[%c0_3, %c0_4] : memref<1x128xf32, #tpu.memory_space<vmem>>, vector<1x128xf32>
    %6 = vector.broadcast %5 : vector<1x128xf32> to vector<4x128xf32>
    %7 = arith.mulf %4, %6 : vector<4x128xf32>
    %c0_5 = arith.constant 0 : index
    %c0_6 = arith.constant 0 : index
    %8 = vector.load %arg4[%c0_5, %c0_6] : memref<1x128xf32, #tpu.memory_space<vmem>>, vector<1x128xf32>
    %9 = vector.broadcast %8 : vector<1x128xf32> to vector<4x128xf32>
    %10 = arith.addf %7, %9 : vector<4x128xf32>
    %cst = arith.constant 0.000000e+00 : f32
    %11 = vector.broadcast %cst : f32 to vector<4x128xf32>
    %12 = arith.maximumf %10, %11 : vector<4x128xf32>
    %13 = arith.truncf %12 : vector<4x128xf32> to vector<4x128xbf16>
    %c0_7 = arith.constant 0 : index
    %c0_8 = arith.constant 0 : index
    %14 = vector.load %arg5[%c0_7, %c0_8] : memref<128x128xbf16, #tpu.memory_space<vmem>>, vector<128x128xbf16>
    %cst_9 = arith.constant dense<0.000000e+00> : vector<4x128xf32>
    %15 = tpu.matmul %13, %14, %cst_9 {dimension_numbers = #tpu.dot_dimension_numbers<[1], [0], [0], [1], [0, 0, 1, 1], [], []>} : vector<4x128xbf16>, vector<128x128xbf16>, vector<4x128xf32> -> vector<4x128xf32>
    %c0_10 = arith.constant 0 : index
    %c0_11 = arith.constant 0 : index
    %16 = vector.load %arg6[%c0_10, %c0_11] : memref<1x128xf32, #tpu.memory_space<vmem>>, vector<1x128xf32>
    %17 = vector.broadcast %16 : vector<1x128xf32> to vector<4x128xf32>
    %18 = arith.mulf %15, %17 : vector<4x128xf32>
    %c0_12 = arith.constant 0 : index
    %c0_13 = arith.constant 0 : index
    %19 = vector.load %arg7[%c0_12, %c0_13] : memref<1x128xf32, #tpu.memory_space<vmem>>, vector<1x128xf32>
    %20 = vector.broadcast %19 : vector<1x128xf32> to vector<4x128xf32>
    %21 = arith.addf %18, %20 : vector<4x128xf32>
    %cst_14 = arith.constant 0.000000e+00 : f32
    %22 = vector.broadcast %cst_14 : f32 to vector<4x128xf32>
    %23 = arith.maximumf %21, %22 : vector<4x128xf32>
    %24 = arith.truncf %23 : vector<4x128xf32> to vector<4x128xbf16>
    %c0_15 = arith.constant 0 : index
    %c0_16 = arith.constant 0 : index
    %25 = vector.load %arg8[%c0_15, %c0_16] : memref<128x128xbf16, #tpu.memory_space<vmem>>, vector<128x128xbf16>
    %cst_17 = arith.constant dense<0.000000e+00> : vector<4x128xf32>
    %26 = tpu.matmul %24, %25, %cst_17 {dimension_numbers = #tpu.dot_dimension_numbers<[1], [0], [0], [1], [0, 0, 1, 1], [], []>} : vector<4x128xbf16>, vector<128x128xbf16>, vector<4x128xf32> -> vector<4x128xf32>
    %27 = arith.addf %4, %26 : vector<4x128xf32>
    %28 = arith.truncf %27 : vector<4x128xf32> to vector<4x128xbf16>
    %c0_18 = arith.constant 0 : index
    %c0_19 = arith.constant 0 : index
    %29 = vector.load %arg9[%c0_18, %c0_19] : memref<4x128xbf16, #tpu.memory_space<vmem>>, vector<4x128xbf16>
    tpu.vector_store %arg9[%c0_18, %c0_19], %28 {strides = array<i32>} : memref<4x128xbf16, #tpu.memory_space<vmem>>, vector<4x128xbf16>,
    return
  }
  func.func @transform_0(%arg0: i32) -> (i32, i32) {
    %c0_i32 = arith.constant 0 : i32
    %c0_i32_0 = arith.constant 0 : i32
    return %arg0, %c0_i32 : i32, i32
  }
  func.func @transform_1(%arg0: i32) -> (i32, i32) {
    %c0_i32 = arith.constant 0 : i32
    %c0_i32_0 = arith.constant 0 : i32
    return %arg0, %c0_i32 : i32, i32
  }
  func.func @transform_2(%arg0: i32) -> (i32, i32) {
    %c0_i32 = arith.constant 0 : i32
    %c0_i32_0 = arith.constant 0 : i32
    %c0_i32_1 = arith.constant 0 : i32
    return %c0_i32, %c0_i32_0 : i32, i32
  }
  func.func @transform_3(%arg0: i32) -> (i32, i32) {
    %c0_i32 = arith.constant 0 : i32
    %c0_i32_0 = arith.constant 0 : i32
    %c0_i32_1 = arith.constant 0 : i32
    return %c0_i32, %c0_i32_0 : i32, i32
  }
  func.func @transform_4(%arg0: i32) -> (i32, i32) {
    %c0_i32 = arith.constant 0 : i32
    %c0_i32_0 = arith.constant 0 : i32
    %c0_i32_1 = arith.constant 0 : i32
    return %c0_i32, %c0_i32_0 : i32, i32
  }
  func.func @transform_5(%arg0: i32) -> (i32, i32) {
    %c0_i32 = arith.constant 0 : i32
    %c0_i32_0 = arith.constant 0 : i32
    %c0_i32_1 = arith.constant 0 : i32
    return %c0_i32, %c0_i32_0 : i32, i32
  }
  func.func @transform_6(%arg0: i32) -> (i32, i32) {
    %c0_i32 = arith.constant 0 : i32
    %c0_i32_0 = arith.constant 0 : i32
    %c0_i32_1 = arith.constant 0 : i32
    return %c0_i32, %c0_i32_0 : i32, i32
  }
  func.func @transform_7(%arg0: i32) -> (i32, i32) {
    %c0_i32 = arith.constant 0 : i32
    %c0_i32_0 = arith.constant 0 : i32
    %c0_i32_1 = arith.constant 0 : i32
    return %c0_i32, %c0_i32_0 : i32, i32
  }
  func.func @transform_8(%arg0: i32) -> (i32, i32) {
    %c0_i32 = arith.constant 0 : i32
    %c0_i32_0 = arith.constant 0 : i32
    return %arg0, %c0_i32 : i32, i32
  }
}

module attributes {stable_mosaic.version = 11 : i64} {
  func.func @_upsample_kernel(%arg0: i32, %arg1: memref<1x8x32xbf16, #tpu.memory_space<vmem>>, %arg2: memref<16x8xbf16, #tpu.memory_space<vmem>>, %arg3: memref<32x64xbf16, #tpu.memory_space<vmem>>, %arg4: memref<1x16x64xbf16, #tpu.memory_space<vmem>>) attributes {dimension_semantics = [#tpu.dimension_semantics<parallel>], iteration_bounds = array<i64: 2>, scalar_prefetch = 0 : i64, scratch_operands = 0 : i64, tpu.core_type = #tpu.core_type<tc>, window_params = [{transform_indices = @transform_0, window_bounds = array<i64: 1, 8, 32>}, {pipeline_mode = #tpu.pipeline_mode<synchronous>, transform_indices = @transform_1, window_bounds = array<i64: 16, 8>}, {pipeline_mode = #tpu.pipeline_mode<synchronous>, transform_indices = @transform_2, window_bounds = array<i64: 32, 64>}, {transform_indices = @transform_3, window_bounds = array<i64: 1, 16, 64>}]} {
    %c0 = arith.constant 0 : index
    %c0_0 = arith.constant 0 : index
    %c0_1 = arith.constant 0 : index
    %0 = vector.load %arg1[%c0, %c0_0, %c0_1] : memref<1x8x32xbf16, #tpu.memory_space<vmem>>, vector<1x8x32xbf16>
    %1 = vector.shape_cast %0 : vector<1x8x32xbf16> to vector<8x32xbf16>
    %c0_2 = arith.constant 0 : index
    %c0_3 = arith.constant 0 : index
    %2 = vector.load %arg2[%c0_2, %c0_3] : memref<16x8xbf16, #tpu.memory_space<vmem>>, vector<16x8xbf16>
    %cst = arith.constant dense<0.000000e+00> : vector<16x32xf32>
    %3 = tpu.matmul %2, %1, %cst {dimension_numbers = #tpu.dot_dimension_numbers<[1], [0], [0], [1], [0, 0, 1, 1], [], []>} : vector<16x8xbf16>, vector<8x32xbf16>, vector<16x32xf32> -> vector<16x32xf32>
    %4 = arith.truncf %3 : vector<16x32xf32> to vector<16x32xbf16>
    %c0_4 = arith.constant 0 : index
    %c0_5 = arith.constant 0 : index
    %5 = vector.load %arg3[%c0_4, %c0_5] : memref<32x64xbf16, #tpu.memory_space<vmem>>, vector<32x64xbf16>
    %cst_6 = arith.constant dense<0.000000e+00> : vector<16x64xf32>
    %6 = tpu.matmul %4, %5, %cst_6 {dimension_numbers = #tpu.dot_dimension_numbers<[1], [0], [0], [1], [0, 0, 1, 1], [], []>} : vector<16x32xbf16>, vector<32x64xbf16>, vector<16x64xf32> -> vector<16x64xf32>
    %7 = arith.truncf %6 : vector<16x64xf32> to vector<16x64xbf16>
    %c0_7 = arith.constant 0 : index
    %c0_8 = arith.constant 0 : index
    %c0_9 = arith.constant 0 : index
    %8 = vector.load %arg4[%c0_7, %c0_8, %c0_9] : memref<1x16x64xbf16, #tpu.memory_space<vmem>>, vector<1x16x64xbf16>
    %9 = vector.shape_cast %8 : vector<1x16x64xbf16> to vector<16x64xbf16>
    %10 = vector.shape_cast %7 : vector<16x64xbf16> to vector<1x16x64xbf16>
    tpu.vector_store %arg4[%c0_7, %c0_8, %c0_9], %10 {strides = array<i32>} : memref<1x16x64xbf16, #tpu.memory_space<vmem>>, vector<1x16x64xbf16>,
    return
  }
  func.func @transform_0(%arg0: i32) -> (i32, i32, i32) {
    %c0_i32 = arith.constant 0 : i32
    %c0_i32_0 = arith.constant 0 : i32
    %c0_i32_1 = arith.constant 0 : i32
    return %arg0, %c0_i32, %c0_i32_0 : i32, i32, i32
  }
  func.func @transform_1(%arg0: i32) -> (i32, i32) {
    %c0_i32 = arith.constant 0 : i32
    %c0_i32_0 = arith.constant 0 : i32
    %c0_i32_1 = arith.constant 0 : i32
    return %c0_i32, %c0_i32_0 : i32, i32
  }
  func.func @transform_2(%arg0: i32) -> (i32, i32) {
    %c0_i32 = arith.constant 0 : i32
    %c0_i32_0 = arith.constant 0 : i32
    %c0_i32_1 = arith.constant 0 : i32
    return %c0_i32, %c0_i32_0 : i32, i32
  }
  func.func @transform_3(%arg0: i32) -> (i32, i32, i32) {
    %c0_i32 = arith.constant 0 : i32
    %c0_i32_0 = arith.constant 0 : i32
    %c0_i32_1 = arith.constant 0 : i32
    return %arg0, %c0_i32, %c0_i32_0 : i32, i32, i32
  }
}

module attributes {stable_mosaic.version = 11 : i64} {
  func.func @_resblock2_kernel(%arg0: i32, %arg1: memref<8x128xbf16, #tpu.memory_space<vmem>>, %arg2: memref<1x128xf32, #tpu.memory_space<vmem>>, %arg3: memref<1x128xf32, #tpu.memory_space<vmem>>, %arg4: memref<128x128xbf16, #tpu.memory_space<vmem>>, %arg5: memref<1x128xf32, #tpu.memory_space<vmem>>, %arg6: memref<1x128xf32, #tpu.memory_space<vmem>>, %arg7: memref<128x128xbf16, #tpu.memory_space<vmem>>, %arg8: memref<1x128xf32, #tpu.memory_space<vmem>>, %arg9: memref<1x128xf32, #tpu.memory_space<vmem>>, %arg10: memref<128x128xbf16, #tpu.memory_space<vmem>>, %arg11: memref<1x128xf32, #tpu.memory_space<vmem>>, %arg12: memref<1x128xf32, #tpu.memory_space<vmem>>, %arg13: memref<128x128xbf16, #tpu.memory_space<vmem>>, %arg14: memref<8x128xbf16, #tpu.memory_space<vmem>>) attributes {dimension_semantics = [#tpu.dimension_semantics<parallel>], iteration_bounds = array<i64: 2>, scalar_prefetch = 0 : i64, scratch_operands = 0 : i64, tpu.core_type = #tpu.core_type<tc>, window_params = [{transform_indices = @transform_0, window_bounds = array<i64: 8, 128>}, {pipeline_mode = #tpu.pipeline_mode<synchronous>, transform_indices = @transform_1, window_bounds = array<i64: 1, 128>}, {pipeline_mode = #tpu.pipeline_mode<synchronous>, transform_indices = @transform_2, window_bounds = array<i64: 1, 128>}, {pipeline_mode = #tpu.pipeline_mode<synchronous>, transform_indices = @transform_3, window_bounds = array<i64: 128, 128>}, {pipeline_mode = #tpu.pipeline_mode<synchronous>, transform_indices = @transform_4, window_bounds = array<i64: 1, 128>}, {pipeline_mode = #tpu.pipeline_mode<synchronous>, transform_indices = @transform_5, window_bounds = array<i64: 1, 128>}, {pipeline_mode = #tpu.pipeline_mode<synchronous>, transform_indices = @transform_6, window_bounds = array<i64: 128, 128>}, {pipeline_mode = #tpu.pipeline_mode<synchronous>, transform_indices = @transform_7, window_bounds = array<i64: 1, 128>}, {pipeline_mode = #tpu.pipeline_mode<synchronous>, transform_indices = @transform_8, window_bounds = array<i64: 1, 128>}, {pipeline_mode = #tpu.pipeline_mode<synchronous>, transform_indices = @transform_9, window_bounds = array<i64: 128, 128>}, {pipeline_mode = #tpu.pipeline_mode<synchronous>, transform_indices = @transform_10, window_bounds = array<i64: 1, 128>}, {pipeline_mode = #tpu.pipeline_mode<synchronous>, transform_indices = @transform_11, window_bounds = array<i64: 1, 128>}, {pipeline_mode = #tpu.pipeline_mode<synchronous>, transform_indices = @transform_12, window_bounds = array<i64: 128, 128>}, {transform_indices = @transform_13, window_bounds = array<i64: 8, 128>}]} {
    %c0 = arith.constant 0 : index
    %c0_0 = arith.constant 0 : index
    %0 = vector.load %arg1[%c0, %c0_0] : memref<8x128xbf16, #tpu.memory_space<vmem>>, vector<8x128xbf16>
    %1 = arith.extf %0 : vector<8x128xbf16> to vector<8x128xf32>
    %c0_1 = arith.constant 0 : index
    %c0_2 = arith.constant 0 : index
    %2 = vector.load %arg2[%c0_1, %c0_2] : memref<1x128xf32, #tpu.memory_space<vmem>>, vector<1x128xf32>
    %3 = vector.broadcast %2 : vector<1x128xf32> to vector<8x128xf32>
    %4 = arith.mulf %1, %3 : vector<8x128xf32>
    %c0_3 = arith.constant 0 : index
    %c0_4 = arith.constant 0 : index
    %5 = vector.load %arg3[%c0_3, %c0_4] : memref<1x128xf32, #tpu.memory_space<vmem>>, vector<1x128xf32>
    %6 = vector.broadcast %5 : vector<1x128xf32> to vector<8x128xf32>
    %7 = arith.addf %4, %6 : vector<8x128xf32>
    %cst = arith.constant 0.000000e+00 : f32
    %8 = vector.broadcast %cst : f32 to vector<8x128xf32>
    %9 = arith.maximumf %7, %8 : vector<8x128xf32>
    %10 = arith.truncf %9 : vector<8x128xf32> to vector<8x128xbf16>
    %c0_5 = arith.constant 0 : index
    %c0_6 = arith.constant 0 : index
    %11 = vector.load %arg4[%c0_5, %c0_6] : memref<128x128xbf16, #tpu.memory_space<vmem>>, vector<128x128xbf16>
    %cst_7 = arith.constant dense<0.000000e+00> : vector<8x128xf32>
    %12 = tpu.matmul %10, %11, %cst_7 {dimension_numbers = #tpu.dot_dimension_numbers<[1], [0], [0], [1], [0, 0, 1, 1], [], []>} : vector<8x128xbf16>, vector<128x128xbf16>, vector<8x128xf32> -> vector<8x128xf32>
    %c0_8 = arith.constant 0 : index
    %c0_9 = arith.constant 0 : index
    %13 = vector.load %arg5[%c0_8, %c0_9] : memref<1x128xf32, #tpu.memory_space<vmem>>, vector<1x128xf32>
    %14 = vector.broadcast %13 : vector<1x128xf32> to vector<8x128xf32>
    %15 = arith.mulf %12, %14 : vector<8x128xf32>
    %c0_10 = arith.constant 0 : index
    %c0_11 = arith.constant 0 : index
    %16 = vector.load %arg6[%c0_10, %c0_11] : memref<1x128xf32, #tpu.memory_space<vmem>>, vector<1x128xf32>
    %17 = vector.broadcast %16 : vector<1x128xf32> to vector<8x128xf32>
    %18 = arith.addf %15, %17 : vector<8x128xf32>
    %cst_12 = arith.constant 0.000000e+00 : f32
    %19 = vector.broadcast %cst_12 : f32 to vector<8x128xf32>
    %20 = arith.maximumf %18, %19 : vector<8x128xf32>
    %21 = arith.truncf %20 : vector<8x128xf32> to vector<8x128xbf16>
    %c0_13 = arith.constant 0 : index
    %c0_14 = arith.constant 0 : index
    %22 = vector.load %arg7[%c0_13, %c0_14] : memref<128x128xbf16, #tpu.memory_space<vmem>>, vector<128x128xbf16>
    %cst_15 = arith.constant dense<0.000000e+00> : vector<8x128xf32>
    %23 = tpu.matmul %21, %22, %cst_15 {dimension_numbers = #tpu.dot_dimension_numbers<[1], [0], [0], [1], [0, 0, 1, 1], [], []>} : vector<8x128xbf16>, vector<128x128xbf16>, vector<8x128xf32> -> vector<8x128xf32>
    %24 = arith.addf %1, %23 : vector<8x128xf32>
    %c0_16 = arith.constant 0 : index
    %c0_17 = arith.constant 0 : index
    %25 = vector.load %arg8[%c0_16, %c0_17] : memref<1x128xf32, #tpu.memory_space<vmem>>, vector<1x128xf32>
    %26 = vector.broadcast %25 : vector<1x128xf32> to vector<8x128xf32>
    %27 = arith.mulf %24, %26 : vector<8x128xf32>
    %c0_18 = arith.constant 0 : index
    %c0_19 = arith.constant 0 : index
    %28 = vector.load %arg9[%c0_18, %c0_19] : memref<1x128xf32, #tpu.memory_space<vmem>>, vector<1x128xf32>
    %29 = vector.broadcast %28 : vector<1x128xf32> to vector<8x128xf32>
    %30 = arith.addf %27, %29 : vector<8x128xf32>
    %cst_20 = arith.constant 0.000000e+00 : f32
    %31 = vector.broadcast %cst_20 : f32 to vector<8x128xf32>
    %32 = arith.maximumf %30, %31 : vector<8x128xf32>
    %33 = arith.truncf %32 : vector<8x128xf32> to vector<8x128xbf16>
    %c0_21 = arith.constant 0 : index
    %c0_22 = arith.constant 0 : index
    %34 = vector.load %arg10[%c0_21, %c0_22] : memref<128x128xbf16, #tpu.memory_space<vmem>>, vector<128x128xbf16>
    %cst_23 = arith.constant dense<0.000000e+00> : vector<8x128xf32>
    %35 = tpu.matmul %33, %34, %cst_23 {dimension_numbers = #tpu.dot_dimension_numbers<[1], [0], [0], [1], [0, 0, 1, 1], [], []>} : vector<8x128xbf16>, vector<128x128xbf16>, vector<8x128xf32> -> vector<8x128xf32>
    %c0_24 = arith.constant 0 : index
    %c0_25 = arith.constant 0 : index
    %36 = vector.load %arg11[%c0_24, %c0_25] : memref<1x128xf32, #tpu.memory_space<vmem>>, vector<1x128xf32>
    %37 = vector.broadcast %36 : vector<1x128xf32> to vector<8x128xf32>
    %38 = arith.mulf %35, %37 : vector<8x128xf32>
    %c0_26 = arith.constant 0 : index
    %c0_27 = arith.constant 0 : index
    %39 = vector.load %arg12[%c0_26, %c0_27] : memref<1x128xf32, #tpu.memory_space<vmem>>, vector<1x128xf32>
    %40 = vector.broadcast %39 : vector<1x128xf32> to vector<8x128xf32>
    %41 = arith.addf %38, %40 : vector<8x128xf32>
    %cst_28 = arith.constant 0.000000e+00 : f32
    %42 = vector.broadcast %cst_28 : f32 to vector<8x128xf32>
    %43 = arith.maximumf %41, %42 : vector<8x128xf32>
    %44 = arith.truncf %43 : vector<8x128xf32> to vector<8x128xbf16>
    %c0_29 = arith.constant 0 : index
    %c0_30 = arith.constant 0 : index
    %45 = vector.load %arg13[%c0_29, %c0_30] : memref<128x128xbf16, #tpu.memory_space<vmem>>, vector<128x128xbf16>
    %cst_31 = arith.constant dense<0.000000e+00> : vector<8x128xf32>
    %46 = tpu.matmul %44, %45, %cst_31 {dimension_numbers = #tpu.dot_dimension_numbers<[1], [0], [0], [1], [0, 0, 1, 1], [], []>} : vector<8x128xbf16>, vector<128x128xbf16>, vector<8x128xf32> -> vector<8x128xf32>
    %47 = arith.addf %24, %46 : vector<8x128xf32>
    %48 = arith.truncf %47 : vector<8x128xf32> to vector<8x128xbf16>
    %c0_32 = arith.constant 0 : index
    %c0_33 = arith.constant 0 : index
    %49 = vector.load %arg14[%c0_32, %c0_33] : memref<8x128xbf16, #tpu.memory_space<vmem>>, vector<8x128xbf16>
    tpu.vector_store %arg14[%c0_32, %c0_33], %48 {strides = array<i32>} : memref<8x128xbf16, #tpu.memory_space<vmem>>, vector<8x128xbf16>,
    return
  }
  func.func @transform_0(%arg0: i32) -> (i32, i32) {
    %c0_i32 = arith.constant 0 : i32
    %c0_i32_0 = arith.constant 0 : i32
    return %arg0, %c0_i32 : i32, i32
  }
  func.func @transform_1(%arg0: i32) -> (i32, i32) {
    %c0_i32 = arith.constant 0 : i32
    %c0_i32_0 = arith.constant 0 : i32
    %c0_i32_1 = arith.constant 0 : i32
    return %c0_i32, %c0_i32_0 : i32, i32
  }
  func.func @transform_2(%arg0: i32) -> (i32, i32) {
    %c0_i32 = arith.constant 0 : i32
    %c0_i32_0 = arith.constant 0 : i32
    %c0_i32_1 = arith.constant 0 : i32
    return %c0_i32, %c0_i32_0 : i32, i32
  }
  func.func @transform_3(%arg0: i32) -> (i32, i32) {
    %c0_i32 = arith.constant 0 : i32
    %c0_i32_0 = arith.constant 0 : i32
    %c0_i32_1 = arith.constant 0 : i32
    return %c0_i32, %c0_i32_0 : i32, i32
  }
  func.func @transform_4(%arg0: i32) -> (i32, i32) {
    %c0_i32 = arith.constant 0 : i32
    %c0_i32_0 = arith.constant 0 : i32
    %c0_i32_1 = arith.constant 0 : i32
    return %c0_i32, %c0_i32_0 : i32, i32
  }
  func.func @transform_5(%arg0: i32) -> (i32, i32) {
    %c0_i32 = arith.constant 0 : i32
    %c0_i32_0 = arith.constant 0 : i32
    %c0_i32_1 = arith.constant 0 : i32
    return %c0_i32, %c0_i32_0 : i32, i32
  }
  func.func @transform_6(%arg0: i32) -> (i32, i32) {
    %c0_i32 = arith.constant 0 : i32
    %c0_i32_0 = arith.constant 0 : i32
    %c0_i32_1 = arith.constant 0 : i32
    return %c0_i32, %c0_i32_0 : i32, i32
  }
  func.func @transform_7(%arg0: i32) -> (i32, i32) {
    %c0_i32 = arith.constant 0 : i32
    %c0_i32_0 = arith.constant 0 : i32
    %c0_i32_1 = arith.constant 0 : i32
    return %c0_i32, %c0_i32_0 : i32, i32
  }
  func.func @transform_8(%arg0: i32) -> (i32, i32) {
    %c0_i32 = arith.constant 0 : i32
    %c0_i32_0 = arith.constant 0 : i32
    %c0_i32_1 = arith.constant 0 : i32
    return %c0_i32, %c0_i32_0 : i32, i32
  }
  func.func @transform_9(%arg0: i32) -> (i32, i32) {
    %c0_i32 = arith.constant 0 : i32
    %c0_i32_0 = arith.constant 0 : i32
    %c0_i32_1 = arith.constant 0 : i32
    return %c0_i32, %c0_i32_0 : i32, i32
  }
  func.func @transform_10(%arg0: i32) -> (i32, i32) {
    %c0_i32 = arith.constant 0 : i32
    %c0_i32_0 = arith.constant 0 : i32
    %c0_i32_1 = arith.constant 0 : i32
    return %c0_i32, %c0_i32_0 : i32, i32
  }
  func.func @transform_11(%arg0: i32) -> (i32, i32) {
    %c0_i32 = arith.constant 0 : i32
    %c0_i32_0 = arith.constant 0 : i32
    %c0_i32_1 = arith.constant 0 : i32
    return %c0_i32, %c0_i32_0 : i32, i32
  }
  func.func @transform_12(%arg0: i32) -> (i32, i32) {
    %c0_i32 = arith.constant 0 : i32
    %c0_i32_0 = arith.constant 0 : i32
    %c0_i32_1 = arith.constant 0 : i32
    return %c0_i32, %c0_i32_0 : i32, i32
  }
  func.func @transform_13(%arg0: i32) -> (i32, i32) {
    %c0_i32 = arith.constant 0 : i32
    %c0_i32_0 = arith.constant 0 : i32
    return %arg0, %c0_i32 : i32, i32
  }
}

module attributes {stable_mosaic.version = 11 : i64} {
  func.func @_mask_combine_last_kernel(%arg0: i32, %arg1: memref<8x128xbf16, #tpu.memory_space<vmem>>, %arg2: memref<8x128xbf16, #tpu.memory_space<vmem>>, %arg3: memref<1x128xf32, #tpu.memory_space<vmem>>, %arg4: memref<1x128xf32, #tpu.memory_space<vmem>>, %arg5: memref<128x128xbf16, #tpu.memory_space<vmem>>, %arg6: memref<1x128xf32, #tpu.memory_space<vmem>>, %arg7: memref<1x128xf32, #tpu.memory_space<vmem>>, %arg8: memref<128x128xbf16, #tpu.memory_space<vmem>>, %arg9: memref<1x128xf32, #tpu.memory_space<vmem>>, %arg10: memref<1x128xf32, #tpu.memory_space<vmem>>, %arg11: memref<128x128xbf16, #tpu.memory_space<vmem>>, %arg12: memref<1x128xf32, #tpu.memory_space<vmem>>, %arg13: memref<1x128xf32, #tpu.memory_space<vmem>>, %arg14: memref<128x128xbf16, #tpu.memory_space<vmem>>, %arg15: memref<1xf32, #tpu.memory_space<smem>>, %arg16: memref<1xf32, #tpu.memory_space<smem>>, %arg17: memref<8x128xf32, #tpu.memory_space<vmem>>) attributes {dimension_semantics = [#tpu.dimension_semantics<parallel>], iteration_bounds = array<i64: 2>, scalar_prefetch = 0 : i64, scratch_operands = 0 : i64, tpu.core_type = #tpu.core_type<tc>, window_params = [{transform_indices = @transform_0, window_bounds = array<i64: 8, 128>}, {transform_indices = @transform_1, window_bounds = array<i64: 8, 128>}, {pipeline_mode = #tpu.pipeline_mode<synchronous>, transform_indices = @transform_2, window_bounds = array<i64: 1, 128>}, {pipeline_mode = #tpu.pipeline_mode<synchronous>, transform_indices = @transform_3, window_bounds = array<i64: 1, 128>}, {pipeline_mode = #tpu.pipeline_mode<synchronous>, transform_indices = @transform_4, window_bounds = array<i64: 128, 128>}, {pipeline_mode = #tpu.pipeline_mode<synchronous>, transform_indices = @transform_5, window_bounds = array<i64: 1, 128>}, {pipeline_mode = #tpu.pipeline_mode<synchronous>, transform_indices = @transform_6, window_bounds = array<i64: 1, 128>}, {pipeline_mode = #tpu.pipeline_mode<synchronous>, transform_indices = @transform_7, window_bounds = array<i64: 128, 128>}, {pipeline_mode = #tpu.pipeline_mode<synchronous>, transform_indices = @transform_8, window_bounds = array<i64: 1, 128>}, {pipeline_mode = #tpu.pipeline_mode<synchronous>, transform_indices = @transform_9, window_bounds = array<i64: 1, 128>}, {pipeline_mode = #tpu.pipeline_mode<synchronous>, transform_indices = @transform_10, window_bounds = array<i64: 128, 128>}, {pipeline_mode = #tpu.pipeline_mode<synchronous>, transform_indices = @transform_11, window_bounds = array<i64: 1, 128>}, {pipeline_mode = #tpu.pipeline_mode<synchronous>, transform_indices = @transform_12, window_bounds = array<i64: 1, 128>}, {pipeline_mode = #tpu.pipeline_mode<synchronous>, transform_indices = @transform_13, window_bounds = array<i64: 128, 128>}, {transform_indices = @transform_14, window_bounds = array<i64: 1>}, {transform_indices = @transform_15, window_bounds = array<i64: 1>}, {transform_indices = @transform_16, window_bounds = array<i64: 8, 128>}]} {
    %c0 = arith.constant 0 : index
    %c0_0 = arith.constant 0 : index
    %0 = vector.load %arg2[%c0, %c0_0] : memref<8x128xbf16, #tpu.memory_space<vmem>>, vector<8x128xbf16>
    %1 = arith.extf %0 : vector<8x128xbf16> to vector<8x128xf32>
    %c0_1 = arith.constant 0 : index
    %c0_2 = arith.constant 0 : index
    %2 = vector.load %arg1[%c0_1, %c0_2] : memref<8x128xbf16, #tpu.memory_space<vmem>>, vector<8x128xbf16>
    %3 = arith.extf %2 : vector<8x128xbf16> to vector<8x128xf32>
    %c0_3 = arith.constant 0 : index
    %c0_4 = arith.constant 0 : index
    %4 = vector.load %arg3[%c0_3, %c0_4] : memref<1x128xf32, #tpu.memory_space<vmem>>, vector<1x128xf32>
    %5 = vector.broadcast %4 : vector<1x128xf32> to vector<8x128xf32>
    %6 = arith.mulf %3, %5 : vector<8x128xf32>
    %c0_5 = arith.constant 0 : index
    %c0_6 = arith.constant 0 : index
    %7 = vector.load %arg4[%c0_5, %c0_6] : memref<1x128xf32, #tpu.memory_space<vmem>>, vector<1x128xf32>
    %8 = vector.broadcast %7 : vector<1x128xf32> to vector<8x128xf32>
    %9 = arith.addf %6, %8 : vector<8x128xf32>
    %cst = arith.constant 0.000000e+00 : f32
    %10 = vector.broadcast %cst : f32 to vector<8x128xf32>
    %11 = arith.maximumf %9, %10 : vector<8x128xf32>
    %12 = arith.truncf %11 : vector<8x128xf32> to vector<8x128xbf16>
    %c0_7 = arith.constant 0 : index
    %c0_8 = arith.constant 0 : index
    %13 = vector.load %arg5[%c0_7, %c0_8] : memref<128x128xbf16, #tpu.memory_space<vmem>>, vector<128x128xbf16>
    %cst_9 = arith.constant dense<0.000000e+00> : vector<8x128xf32>
    %14 = tpu.matmul %12, %13, %cst_9 {dimension_numbers = #tpu.dot_dimension_numbers<[1], [0], [0], [1], [0, 0, 1, 1], [], []>} : vector<8x128xbf16>, vector<128x128xbf16>, vector<8x128xf32> -> vector<8x128xf32>
    %c0_10 = arith.constant 0 : index
    %c0_11 = arith.constant 0 : index
    %15 = vector.load %arg6[%c0_10, %c0_11] : memref<1x128xf32, #tpu.memory_space<vmem>>, vector<1x128xf32>
    %16 = vector.broadcast %15 : vector<1x128xf32> to vector<8x128xf32>
    %17 = arith.mulf %14, %16 : vector<8x128xf32>
    %c0_12 = arith.constant 0 : index
    %c0_13 = arith.constant 0 : index
    %18 = vector.load %arg7[%c0_12, %c0_13] : memref<1x128xf32, #tpu.memory_space<vmem>>, vector<1x128xf32>
    %19 = vector.broadcast %18 : vector<1x128xf32> to vector<8x128xf32>
    %20 = arith.addf %17, %19 : vector<8x128xf32>
    %cst_14 = arith.constant 0.000000e+00 : f32
    %21 = vector.broadcast %cst_14 : f32 to vector<8x128xf32>
    %22 = arith.maximumf %20, %21 : vector<8x128xf32>
    %23 = arith.truncf %22 : vector<8x128xf32> to vector<8x128xbf16>
    %c0_15 = arith.constant 0 : index
    %c0_16 = arith.constant 0 : index
    %24 = vector.load %arg8[%c0_15, %c0_16] : memref<128x128xbf16, #tpu.memory_space<vmem>>, vector<128x128xbf16>
    %cst_17 = arith.constant dense<0.000000e+00> : vector<8x128xf32>
    %25 = tpu.matmul %23, %24, %cst_17 {dimension_numbers = #tpu.dot_dimension_numbers<[1], [0], [0], [1], [0, 0, 1, 1], [], []>} : vector<8x128xbf16>, vector<128x128xbf16>, vector<8x128xf32> -> vector<8x128xf32>
    %26 = arith.negf %25 : vector<8x128xf32>
    %27 = math.exp %26 : vector<8x128xf32>
    %cst_18 = arith.constant 1.000000e+00 : f32
    %28 = vector.broadcast %cst_18 : f32 to vector<8x128xf32>
    %29 = arith.addf %28, %27 : vector<8x128xf32>
    %30 = arith.divf %28, %29 : vector<8x128xf32>
    %c0_19 = arith.constant 0 : index
    %31 = memref.load %arg15[%c0_19] : memref<1xf32, #tpu.memory_space<smem>>
    %32 = arith.mulf %30, %1 : vector<8x128xf32>
    %33 = vector.broadcast %31 : f32 to vector<8x128xf32>
    %34 = arith.mulf %33, %32 : vector<8x128xf32>
    %c0_20 = arith.constant 0 : index
    %35 = memref.load %arg16[%c0_20] : memref<1xf32, #tpu.memory_space<smem>>
    %36 = vector.broadcast %35 : f32 to vector<8x128xf32>
    %37 = arith.mulf %36, %1 : vector<8x128xf32>
    %38 = arith.addf %34, %37 : vector<8x128xf32>
    %c0_21 = arith.constant 0 : index
    %c0_22 = arith.constant 0 : index
    %39 = vector.load %arg9[%c0_21, %c0_22] : memref<1x128xf32, #tpu.memory_space<vmem>>, vector<1x128xf32>
    %40 = vector.broadcast %39 : vector<1x128xf32> to vector<8x128xf32>
    %41 = arith.mulf %38, %40 : vector<8x128xf32>
    %c0_23 = arith.constant 0 : index
    %c0_24 = arith.constant 0 : index
    %42 = vector.load %arg10[%c0_23, %c0_24] : memref<1x128xf32, #tpu.memory_space<vmem>>, vector<1x128xf32>
    %43 = vector.broadcast %42 : vector<1x128xf32> to vector<8x128xf32>
    %44 = arith.addf %41, %43 : vector<8x128xf32>
    %cst_25 = arith.constant 0.000000e+00 : f32
    %45 = vector.broadcast %cst_25 : f32 to vector<8x128xf32>
    %46 = arith.maximumf %44, %45 : vector<8x128xf32>
    %47 = arith.truncf %46 : vector<8x128xf32> to vector<8x128xbf16>
    %c0_26 = arith.constant 0 : index
    %c0_27 = arith.constant 0 : index
    %48 = vector.load %arg11[%c0_26, %c0_27] : memref<128x128xbf16, #tpu.memory_space<vmem>>, vector<128x128xbf16>
    %cst_28 = arith.constant dense<0.000000e+00> : vector<8x128xf32>
    %49 = tpu.matmul %47, %48, %cst_28 {dimension_numbers = #tpu.dot_dimension_numbers<[1], [0], [0], [1], [0, 0, 1, 1], [], []>} : vector<8x128xbf16>, vector<128x128xbf16>, vector<8x128xf32> -> vector<8x128xf32>
    %c0_29 = arith.constant 0 : index
    %c0_30 = arith.constant 0 : index
    %50 = vector.load %arg12[%c0_29, %c0_30] : memref<1x128xf32, #tpu.memory_space<vmem>>, vector<1x128xf32>
    %51 = vector.broadcast %50 : vector<1x128xf32> to vector<8x128xf32>
    %52 = arith.mulf %49, %51 : vector<8x128xf32>
    %c0_31 = arith.constant 0 : index
    %c0_32 = arith.constant 0 : index
    %53 = vector.load %arg13[%c0_31, %c0_32] : memref<1x128xf32, #tpu.memory_space<vmem>>, vector<1x128xf32>
    %54 = vector.broadcast %53 : vector<1x128xf32> to vector<8x128xf32>
    %55 = arith.addf %52, %54 : vector<8x128xf32>
    %cst_33 = arith.constant 0.000000e+00 : f32
    %56 = vector.broadcast %cst_33 : f32 to vector<8x128xf32>
    %57 = arith.maximumf %55, %56 : vector<8x128xf32>
    %58 = arith.truncf %57 : vector<8x128xf32> to vector<8x128xbf16>
    %c0_34 = arith.constant 0 : index
    %c0_35 = arith.constant 0 : index
    %59 = vector.load %arg14[%c0_34, %c0_35] : memref<128x128xbf16, #tpu.memory_space<vmem>>, vector<128x128xbf16>
    %cst_36 = arith.constant dense<0.000000e+00> : vector<8x128xf32>
    %60 = tpu.matmul %58, %59, %cst_36 {dimension_numbers = #tpu.dot_dimension_numbers<[1], [0], [0], [1], [0, 0, 1, 1], [], []>} : vector<8x128xbf16>, vector<128x128xbf16>, vector<8x128xf32> -> vector<8x128xf32>
    %61 = arith.addf %38, %60 : vector<8x128xf32>
    %c0_37 = arith.constant 0 : index
    %c0_38 = arith.constant 0 : index
    %62 = vector.load %arg17[%c0_37, %c0_38] : memref<8x128xf32, #tpu.memory_space<vmem>>, vector<8x128xf32>
    tpu.vector_store %arg17[%c0_37, %c0_38], %61 {strides = array<i32>} : memref<8x128xf32, #tpu.memory_space<vmem>>, vector<8x128xf32>,
    return
  }
  func.func @transform_0(%arg0: i32) -> (i32, i32) {
    %c0_i32 = arith.constant 0 : i32
    %c0_i32_0 = arith.constant 0 : i32
    return %arg0, %c0_i32 : i32, i32
  }
  func.func @transform_1(%arg0: i32) -> (i32, i32) {
    %c0_i32 = arith.constant 0 : i32
    %c0_i32_0 = arith.constant 0 : i32
    return %arg0, %c0_i32 : i32, i32
  }
  func.func @transform_2(%arg0: i32) -> (i32, i32) {
    %c0_i32 = arith.constant 0 : i32
    %c0_i32_0 = arith.constant 0 : i32
    %c0_i32_1 = arith.constant 0 : i32
    return %c0_i32, %c0_i32_0 : i32, i32
  }
  func.func @transform_3(%arg0: i32) -> (i32, i32) {
    %c0_i32 = arith.constant 0 : i32
    %c0_i32_0 = arith.constant 0 : i32
    %c0_i32_1 = arith.constant 0 : i32
    return %c0_i32, %c0_i32_0 : i32, i32
  }
  func.func @transform_4(%arg0: i32) -> (i32, i32) {
    %c0_i32 = arith.constant 0 : i32
    %c0_i32_0 = arith.constant 0 : i32
    %c0_i32_1 = arith.constant 0 : i32
    return %c0_i32, %c0_i32_0 : i32, i32
  }
  func.func @transform_5(%arg0: i32) -> (i32, i32) {
    %c0_i32 = arith.constant 0 : i32
    %c0_i32_0 = arith.constant 0 : i32
    %c0_i32_1 = arith.constant 0 : i32
    return %c0_i32, %c0_i32_0 : i32, i32
  }
  func.func @transform_6(%arg0: i32) -> (i32, i32) {
    %c0_i32 = arith.constant 0 : i32
    %c0_i32_0 = arith.constant 0 : i32
    %c0_i32_1 = arith.constant 0 : i32
    return %c0_i32, %c0_i32_0 : i32, i32
  }
  func.func @transform_7(%arg0: i32) -> (i32, i32) {
    %c0_i32 = arith.constant 0 : i32
    %c0_i32_0 = arith.constant 0 : i32
    %c0_i32_1 = arith.constant 0 : i32
    return %c0_i32, %c0_i32_0 : i32, i32
  }
  func.func @transform_8(%arg0: i32) -> (i32, i32) {
    %c0_i32 = arith.constant 0 : i32
    %c0_i32_0 = arith.constant 0 : i32
    %c0_i32_1 = arith.constant 0 : i32
    return %c0_i32, %c0_i32_0 : i32, i32
  }
  func.func @transform_9(%arg0: i32) -> (i32, i32) {
    %c0_i32 = arith.constant 0 : i32
    %c0_i32_0 = arith.constant 0 : i32
    %c0_i32_1 = arith.constant 0 : i32
    return %c0_i32, %c0_i32_0 : i32, i32
  }
  func.func @transform_10(%arg0: i32) -> (i32, i32) {
    %c0_i32 = arith.constant 0 : i32
    %c0_i32_0 = arith.constant 0 : i32
    %c0_i32_1 = arith.constant 0 : i32
    return %c0_i32, %c0_i32_0 : i32, i32
  }
  func.func @transform_11(%arg0: i32) -> (i32, i32) {
    %c0_i32 = arith.constant 0 : i32
    %c0_i32_0 = arith.constant 0 : i32
    %c0_i32_1 = arith.constant 0 : i32
    return %c0_i32, %c0_i32_0 : i32, i32
  }
  func.func @transform_12(%arg0: i32) -> (i32, i32) {
    %c0_i32 = arith.constant 0 : i32
    %c0_i32_0 = arith.constant 0 : i32
    %c0_i32_1 = arith.constant 0 : i32
    return %c0_i32, %c0_i32_0 : i32, i32
  }
  func.func @transform_13(%arg0: i32) -> (i32, i32) {
    %c0_i32 = arith.constant 0 : i32
    %c0_i32_0 = arith.constant 0 : i32
    %c0_i32_1 = arith.constant 0 : i32
    return %c0_i32, %c0_i32_0 : i32, i32
  }
  func.func @transform_14(%arg0: i32) -> i32 {
    %c0_i32 = arith.constant 0 : i32
    %c0_i32_0 = arith.constant 0 : i32
    return %c0_i32 : i32
  }
  func.func @transform_15(%arg0: i32) -> i32 {
    %c0_i32 = arith.constant 0 : i32
    %c0_i32_0 = arith.constant 0 : i32
    return %c0_i32 : i32
  }
  func.func @transform_16(%arg0: i32) -> (i32, i32) {
    %c0_i32 = arith.constant 0 : i32
    %c0_i32_0 = arith.constant 0 : i32
    return %arg0, %c0_i32 : i32, i32
  }
}

</mosaic_0001>

<bundles_post_ra>
// kernel: ranet_forward.14
= control target key start
LH: loop header
LB: loop body
LE: loop exit
PB: predicated region body
PF: predicated region fallthrough
CT: control target
= control target key end

     0   :  { %s658_s24 = smov 0   ;;  %s739_s0 = inlined_call_operand.vmem [shape: f32[16,128], index: 0, kind: input, shape index: {}]   ;;  %s740_s1 = inlined_call_operand.vmem [shape: f32[1,128], index: 1, kind: input, shape index: {}]   ;;  %s741_s2 = inlined_call_operand.vmem [shape: f32[1,128], index: 2, kind: input, shape index: {}]   ;;  %s742_s3 = inlined_call_operand.vmem [shape: bf16[128,128], index: 3, kind: input, shape index: {}]   ;;  %s743_s4 = inlined_call_operand.vmem [shape: f32[1,128], index: 4, kind: input, shape index: {}]   ;;  %s744_s5 = inlined_call_operand.vmem [shape: f32[1,128], index: 5, kind: input, shape index: {}]   ;;  %s745_s6 = inlined_call_operand.vmem [shape: bf16[128,128], index: 6, kind: input, shape index: {}]   ;;  %s746_s7 = inlined_call_operand.vmem [shape: bf16[16,128], index: 7, kind: output, shape index: {}]  }
   0x1 LB: > { %s509_s25 = sadd.s32 4294967295, %s616_s24   ;;  %p513_p0 = scmp.ge.s32.totalorder %s616_s24, 1  ;;  %s616_s24 = sphi %s658_s24, %s17_s24  }
   0x2   : > { %p236_p1 = scmp.lt.s32.totalorder %s616_s24, 3 }
   0x4   : > { %p237_p2 = pnand %p513_p0, %p236_p1 }
   0x5   : > { %p266_p3 = scmp.lt.s32.totalorder (!%p237_p2), %s509_s25, 1 }
   0x6   : > { %240 = sbr.rel (%p237_p2) target bundleno = 311 (0x137), region = 48 }
   0xb   : > { %v589_v0 = vld [vmem:[%s742_s3 + $0x38] sm:$0xff]  ;;  %v588_v1 = vld [vmem:[%s742_s3 + $0x30] sm:$0xff]  ;;  %s748_s25 = smov (!%p266_p3, %s509_s25), 1  ;;  %v587_v3 = vld [vmem:[%s742_s3 + $0x28] sm:$0xff] }
   0xc   : > { %351 = vmatpush.bf16.msra.mxu0 %v589_v0  ;;  %v597_v2 = vld [vmem:[%s745_s6 + $0x38] sm:$0xff]  ;;  %v596_v4 = vld [vmem:[%s745_s6 + $0x30] sm:$0xff]  ;;  %s514_s13 = sshll.u32 %s748_s25, 3  ;;  %v586_v5 = vld [vmem:[%s742_s3 + $0x20] sm:$0xff]  ;;  %s515_s28 = sshll.u32 %s748_s25, 2 }
   0xd   : > { %440 = vmatpush.bf16.msra.mxu1 %v597_v2  ;;  %v595_v6 = vld [vmem:[%s745_s6 + $0x28] sm:$0xff]  ;;  %s269_s20 = scalar_lea.vmem %s739_s0, %s514_s13  ;;  %v606_v7 = vld [vmem:[%s740_s1] ss:$0 sm:$0xff]  ;;  %v585_v8 = vld [vmem:[%s742_s3 + $0x18] sm:$0xff]  ;;  %s273_s8 = scalar_lea.vmem %s746_s7, %s515_s28 }
   0xe   : > { %v274_v9 = vld [vmem:[%s269_s20] sm:$0xff]  ;;  %v584_v13 = vld [vmem:[%s742_s3 + $0x10] sm:$0xff]  ;;  %v593_v14 = vld [vmem:[%s745_s6 + $0x18] sm:$0xff] }
   0xf   : > { %v594_v10 = vld [vmem:[%s745_s6 + $0x20] sm:$0xff]  ;;  %v279_v11 = vmul.f32 %v606_v7, %v274_v9  ;;  %v583_v16 = vld [vmem:[%s742_s3 + $0x8] sm:$0xff]  ;;  %v592_v17 = vld [vmem:[%s745_s6 + $0x10] sm:$0xff] }
  0x10   : > { %352 = vmatpush.bf16.msra.mxu0 %v588_v1  ;;  %v607_v12 = vld [vmem:[%s741_s2] ss:$0 sm:$0xff]  ;;  %v591_v21 = vld [vmem:[%s745_s6 + $0x8] sm:$0xff] }
  0x11   : > { %441 = vmatpush.bf16.msra.mxu1 %v596_v4  ;;  %v284_v15 = vadd.f32 %v607_v12, %v279_v11  ;;  %v582_v19 = vld [vmem:[%s742_s3] sm:$0xff] }
  0x12   : > { %v590_v22 = vld [vmem:[%s745_s6] sm:$0xff] }
  0x13   : > { %v285_v18 = vmax.f32 %v284_v15, 0.0  ;;  %v608_v23 = vld [vmem:[%s743_s4] ss:$0 sm:$0xff] }
  0x14   : > { %353 = vmatpush.bf16.msra.mxu0 %v587_v3  ;;  %v609_v24 = vld [vmem:[%s744_s5] ss:$0 sm:$0xff] }
  0x15   : > { %442 = vmatpush.bf16.msra.mxu1 %v595_v6  ;;  %v286_v20 = vpack.c.bf16 %v285_v18, %v285_v18 }
  0x18   : > { %354 = vmatpush.bf16.msra.mxu0 %v586_v5 }
  0x19   : > { %443 = vmatpush.bf16.msra.mxu1 %v594_v10 }
  0x1c   : > { %355 = vmatpush.bf16.msra.mxu0 %v585_v8 }
  0x1d   : > { %444 = vmatpush.bf16.msra.mxu1 %v593_v14 }
  0x20   : > { %356 = vmatpush.bf16.msra.mxu0 %v584_v13 }
  0x21   : > { %445 = vmatpush.bf16.msra.mxu1 %v592_v17 }
  0x24   : > { %357 = vmatpush.bf16.msra.mxu0 %v583_v16 }
  0x25   : > { %446 = vmatpush.bf16.msra.mxu1 %v591_v21 }
  0x28   : > { %358 = vmatpush.bf16.msra.mxu0 %v582_v19 }
  0x29   : > { %447 = vmatpush.bf16.msra.mxu1 %v590_v22 }
  0x2b   : > { %359 = vmatmul.bf16.vlgmr.msra.gmra.mxu0 %v286_v20 }
  0xa8   : > { %v360_v25 = vpop.f32.mrf.mxu0 }
  0xa9   : > { %v368_v26 = vmul.f32 %v608_v23, %v360_v25 }
  0xab   : > { %v373_v27 = vadd.f32 %v609_v24, %v368_v26 }
  0xad   : > { %v374_v28 = vmax.f32 %v373_v27, 0.0 }
  0xaf   : > { %v375_v29 = vpack.c.bf16 %v374_v28, %v374_v28 }
  0xb0   : > { %v362_v30 = vpop.f32.mrf.mxu0 }
  0xb1   : > { %448 = vmatmul.bf16.vlgmr.msra.gmra.mxu1 %v375_v29 }
 0x12e   : > { %v449_v31 = vpop.f32.mrf.mxu1 }
 0x12f   : > { %v453_v32 = vadd.f32 %v449_v31, %v274_v9 }
 0x131   : > { %v454_v33 = vpack.c.bf16 %v453_v32, %v453_v32 }
 0x133   : > { %455 = vst [vmem:[%s273_s8] sm:$0xf] %v454_v33 }
 0x136   : > { %v451_v34 = vpop.f32.mrf.mxu1 }
 0x137 PF: > { %s17_s24 = sadd.s32 1, %s616_s24  }
 0x138   : > { %p14_p4 = scmp.ge.s32.totalorder %s17_s24, 4  }
 0x13a   :  { %16 = sbr.rel (!%p14_p4) target bundleno = 1 (0x1), region = 78 }

// kernel: ranet_forward.16
= control target key start
LH: loop header
LB: loop body
LE: loop exit
PB: predicated region body
PF: predicated region fallthrough
CT: control target
= control target key end

     0   :  { %s560_s6 = smov 0   ;;  %s679_s0 = inlined_call_operand.vmem [shape: bf16[2,8,2,8,8], index: 0, kind: input, shape index: {}]   ;;  %s680_s1 = inlined_call_operand.vmem [shape: bf16[2,8,8,4], index: 1, kind: output, shape index: {}]  }
   0x1 LB: > { %s458_s7 = sadd.s32 4294967295, %s546_s6   ;;  %p462_p0 = scmp.ge.s32.totalorder %s546_s6, 1  ;;  %s546_s6 = sphi %s560_s6, %s11_s6  }
   0x2   : > { %p87_p1 = scmp.lt.s32.totalorder %s546_s6, 3 }
   0x4   : > { %p88_p2 = pnand %p462_p0, %p87_p1 }
   0x5   : > { %p107_p3 = scmp.lt.s32.totalorder (!%p88_p2), %s458_s7, 1  ;;  %s549_s12 = smov (!%p88_p2), 124  }
   0x6   : > { %91 = sbr.rel (%p88_p2) target bundleno = 184 (0xb8), region = 24 }
   0xb   : > { %s684_s7 = smov (!%p107_p3, %s458_s7), 1  ;;  %v548_v3 = vmov 4286644096   ;;  %vm295_vm0 = vcmask 1040384   ;;  %vm296_vm1 = vsmask.f32 256 }
   0xc   : > { %s469_s8 = sshll.u32 %s684_s7, 6  ;;  %v174_v4 = vunpack.c.l.bf16 %v548_v3  ;;  %vm626_vm2 = vmand %vm295_vm0, %vm296_vm1  ;;  %s470_s13 = sshll.u32 %s684_s7, 5  ;;  %vm394_vm3 = vcmask 27648  }
   0xd   : > { %s111_s11 = scalar_lea.vmem %s679_s0, %s469_s8  ;;  %s637_s16 = scalar_lea.vmem %s680_s1, %s470_s13 }
   0xe   : > { %v503_v0 = vld [vmem:[%s111_s11 + $0x8] sm:$0xff]   ;;  %v504_v1 = vld [vmem:[%s111_s11 + $0x10] sm:$0xff]   ;;  %v472_v2 = vld [vmem:[%s111_s11] sm:$0xff]  }
   0xf   : > { %v478_v5 = vunpack.c.h.bf16 %v503_v0  ;;  %v481_v6 = vunpack.c.l.bf16 %v504_v1  ;;  %v482_v7 = vunpack.c.h.bf16 %v504_v1  ;;  %v477_v8 = vunpack.c.l.bf16 %v503_v0  ;;  %v505_v9 = vld [vmem:[%s111_s11 + $0x18] sm:$0xff]   ;;  %v508_v10 = vld [vmem:[%s111_s11 + $0x30] sm:$0xff]   ;;  %v507_v16 = vld [vmem:[%s111_s11 + $0x28] sm:$0xff]  }
  0x10   : > { %v509_v11 = vld [vmem:[%s111_s11 + $0x38] sm:$0xff]   ;;  %v473_v12 = vunpack.c.l.bf16 %v472_v2  ;;  %v474_v13 = vunpack.c.h.bf16 %v472_v2  ;;  %v485_v14 = vunpack.c.l.bf16 %v505_v9  ;;  %v486_v15 = vunpack.c.h.bf16 %v505_v9  ;;  %v506_v17 = vld [vmem:[%s111_s11 + $0x20] sm:$0xff]  }
  0x11   : > { %v152_v18 = vmax.f32 %v481_v6, %v482_v7  ;;  %v151_v19 = vmax.f32 %v477_v8, %v478_v5  ;;  %v498_v20 = vunpack.c.h.bf16 %v508_v10  ;;  %v501_v21 = vunpack.c.l.bf16 %v509_v11 }
  0x12   : > { %v150_v22 = vmax.f32 %v473_v12, %v474_v13  ;;  %v153_v23 = vmax.f32 %v485_v14, %v486_v15  ;;  %v502_v24 = vunpack.c.h.bf16 %v509_v11  ;;  %v494_v25 = vunpack.c.h.bf16 %v507_v16 }
  0x13   : > { %v574_v26 = vmax.f32 %v152_v18, %v478_v5  ;;  %v576_v27 = vmax.f32 %v151_v19, %v474_v13  ;;  %v497_v28 = vunpack.c.l.bf16 %v508_v10  ;;  %v489_v29 = vunpack.c.l.bf16 %v506_v17 }
  0x14   : > { %v578_v30 = vmax.f32 %v150_v22, %v174_v4  ;;  %v580_v31 = vmax.f32 %v153_v23, %v482_v7  ;;  %v157_v32 = vmax.f32 %v501_v21, %v502_v24  ;;  %v490_v33 = vunpack.c.h.bf16 %v506_v17 }
  0x15   : > { %v185_v34 = vpack.c.bf16 %v574_v26, %v574_v26  ;;  %v184_v35 = vpack.c.bf16 %v576_v27, %v576_v27  ;;  %v156_v36 = vmax.f32 %v497_v28, %v498_v20  ;;  %v493_v46 = vunpack.c.l.bf16 %v507_v16 }
  0x16   : > { %v183_v37 = vpack.c.bf16 %v578_v30, %v578_v30  ;;  %v186_v38 = vpack.c.bf16 %v580_v31, %v580_v31  ;;  %v590_v39 = vmax.f32 %v157_v32, %v498_v20  ;;  %v154_v40 = vmax.f32 %v489_v29, %v490_v33 }
  0x17   : > { %v201_v41 = vunpack.c.l.b16 %v185_v34  ;;  %v200_v42 = vunpack.c.l.b16 %v184_v35  ;;  %v592_v43 = vmax.f32 %v156_v36, %v494_v25  ;;  %v520_v53 = vpack.i.bf16 %v576_v27, %v578_v30 }
  0x18   : > { %v199_v44 = vunpack.c.l.b16 %v183_v37  ;;  %v202_v45 = vunpack.c.l.b16 %v186_v38  ;;  %v190_v49 = vpack.c.bf16 %v590_v39, %v590_v39  ;;  %v600_v54 = vmax.f32 %v154_v40, %v486_v15 }
  0x19   : > { %v209_v47 = vpack.c.b16 %v201_v41, %v201_v41  ;;  %v208_v48 = vpack.c.b16 %v200_v42, %v200_v42  ;;  %v189_v50 = vpack.c.bf16 %v592_v43, %v592_v43  ;;  %521 = vrot.lane.b32.xlu2 %v520_v53, %s549_s12  ;;  %v155_v2 = vmax.f32 %v493_v46, %v494_v25 }
  0x1a   : > { %v207_v51 = vpack.c.b16 %v199_v44, %v199_v44  ;;  %v210_v52 = vpack.c.b16 %v202_v45, %v202_v45  ;;  %v206_v62 = vunpack.c.l.b16 %v190_v49  ;;  %v187_v1 = vpack.c.bf16 %v600_v54, %v600_v54 }
  0x1b   : > { %v230_v55 = vshrl.u32 %v209_v47, 16  ;;  %v233_v56 = vshll.u32 %v209_v47, 16  ;;  %v223_v61 = vshrl.u32 %v208_v48, 16  ;;  %v205_v0 = vunpack.c.l.b16 %v189_v50 }
  0x1c   : > { %v216_v57 = vshrl.u32 %v207_v51, 16  ;;  %v219_v58 = vshll.u32 %v207_v51, 16  ;;  %v237_v60 = vshrl.u32 %v210_v52, 16  ;;  %v203_v5 = vunpack.c.l.b16 %v187_v1 }
  0x1d   : > { %v232_v59 = vrot.slane %v230_v55, 7  ;;  %v240_v7 = vshll.u32 %v210_v52, 16  ;;  %v214_v8 = vpack.c.b16 %v206_v62, %v206_v62  ;;  %v606_v9 = vmax.f32 %v155_v2, %v490_v33 }
  0x1e   : > { %v218_v63 = vrot.slane %v216_v57, 7  ;;  %v239_v6 = vrot.slane %v237_v60, 7  ;;  %v225_v10 = vrot.slane %v223_v61, 7  ;;  %v226_v11 = vshll.u32 %v208_v48, 16 }
  0x1f   : > { %v235_v3 = vor.u32 %v233_v56, %v232_v59  ;;  %v213_v12 = vpack.c.b16 %v205_v0, %v205_v0  ;;  %v211_v13 = vpack.c.b16 %v203_v5, %v203_v5  ;;  %v188_v14 = vpack.c.bf16 %v606_v9, %v606_v9 }
  0x20   : > { %v221_v4 = vor.u32 %v219_v58, %v218_v63  ;;  %v242_v17 = vor.u32 %v240_v7, %v239_v6  ;;  %v265_v18 = vshrl.u32 %v214_v8, 16  ;;  %v228_v20 = vor.u32 %v226_v11, %v225_v10 }
  0x21   : > { %275 = vrot.lane.b32.xlu1 %v235_v3, %s549_s12  ;;  %v244_v15 = vshrl.u32 %v211_v13, 16  ;;  %v247_v16 = vshll.u32 %v211_v13, 16  ;;  %v204_v19 = vunpack.c.l.b16 %v188_v14  ;;  %v258_v21 = vshrl.u32 %v213_v12, 16 }
  0x22   : > { %271 = vrot.lane.b32.xlu0 %v221_v4, %s549_s12  ;;  %v267_v25 = vrot.slane %v265_v18, 7  ;;  %v268_v28 = vshll.u32 %v214_v8, 16  ;;  %v261_v33 = vshll.u32 %v213_v12, 16  ;;  %v530_v40 = vpack.i.bf16 %v606_v9, %v600_v54 }
  0x23   : > { %v246_v22 = vrot.slane %v244_v15, 7  ;;  %v212_v23 = vpack.c.b16 %v204_v19, %v204_v19  ;;  %v260_v32 = vrot.slane %v258_v21, 7  ;;  %v525_v41 = vpack.i.bf16 %v580_v31, %v574_v26 }
  0x24   : > { %v270_v36 = vor.u32 %v268_v28, %v267_v25  ;;  %v535_v42 = vpack.i.bf16 %v590_v39, %v592_v43 }
  0x25   : > { %v249_v24 = vor.u32 %v247_v16, %v246_v22  ;;  %v251_v29 = vshrl.u32 %v212_v23, 16  ;;  %v254_v34 = vshll.u32 %v212_v23, 16  ;;  %v263_v37 = vor.u32 %v261_v33, %v260_v32 }
  0x27   : > { %279 = vrot.lane.b32.xlu2 %v249_v24, %s549_s12  ;;  %v253_v35 = vrot.slane %v251_v29, 7 }
  0x29   : > { %277 = vrot.lane.b32.xlu1 %v242_v17, %s549_s12  ;;  %v256_v38 = vor.u32 %v254_v34, %v253_v35 }
  0x2a   : > { %273 = vrot.lane.b32.xlu0 %v228_v20, %s549_s12 }
  0x2f   : > { %281 = vrot.lane.b32.xlu2 %v256_v38, %s549_s12 }
  0x31   : > { %285 = vrot.lane.b32.xlu1 %v270_v36, %s549_s12 }
  0x32   : > { %283 = vrot.lane.b32.xlu0 %v263_v37, %s549_s12 }
  0x37   : > { %536 = vrot.lane.b32.xlu2 %v535_v42, %s549_s12 }
  0x39   : > { %531 = vrot.lane.b32.xlu1 %v530_v40, %s549_s12 }
  0x3a   : > { %526 = vrot.lane.b32.xlu0 %v525_v41, %s549_s12 }
  0x73   : > { %v522_v44 = vpop.permute.xlu2 %521 }
  0x74   : > { %v523_v46 = vunpack.i.l.bf16 %v522_v44  ;;  %v524_v56 = vunpack.i.h.bf16 %v522_v44 }
  0x76   : > { %v346_v50 = vmax.f32 %v578_v30, %v523_v46  ;;  %v347_v61 = vmax.f32 %v576_v27, %v524_v56 }
  0x81   : > { %v280_v45 = vpop.permute.xlu2 %279 }
  0x89   : > { %v282_v48 = vpop.permute.xlu2 %281 }
  0x91   : > { %v537_v59 = vpop.permute.xlu2 %536 }
  0x92   : > { %v539_v63 = vunpack.i.h.bf16 %v537_v59  ;;  %v538_v1 = vunpack.i.l.bf16 %v537_v59 }
  0x93   : > { %v276_v49 = vpop.permute.xlu1 %275 }
  0x94   : > { %v272_v51 = vpop.permute.xlu0 %271  ;;  %v353_v3 = vmax.f32 %v590_v39, %v539_v63  ;;  %v352_v5 = vmax.f32 %v592_v43, %v538_v1  ;;  %v302_v39 = vsel %vm626_vm2, 4286644096, %v280_v45  ;;  %v303_v43 = vsel %vm626_vm2, 4286644096, %v282_v48 }
  0x95   : > { %v298_v52 = vsel %vm626_vm2, 4286644096, %v272_v51  ;;  %v300_v16 = vsel %vm626_vm2, 4286644096, %v276_v49  ;;  %v374_v23 = vunpack.c.l.bf16 %v302_v39  ;;  %v375_v24 = vunpack.c.l.bf16 %v303_v43 }
  0x96   : > { %v370_v53 = vunpack.c.l.bf16 %v298_v52  ;;  %v372_v29 = vunpack.c.l.bf16 %v300_v16 }
  0x98   : > { %v378_v55 = vmax.f32 %v346_v50, %v370_v53 }
  0x9a   : > { %v386_v57 = vpack.c.bf16 %v378_v55, %v378_v55 }
  0x9b   : > { %v278_v58 = vpop.permute.xlu1 %277 }
  0x9c   : > { %395 = vst.msk [vmem:[%s637_s16] sm:$0xf] %vm394_vm3, %v386_v57  ;;  %v274_v30 = vpop.permute.xlu0 %273  ;;  %v301_v17 = vsel %vm626_vm2, 4286644096, %v278_v58 }
  0x9d   : > { %v299_v60 = vsel %vm626_vm2, 4286644096, %v274_v30  ;;  %v373_v32 = vunpack.c.l.bf16 %v301_v17 }
  0x9e   : > { %v371_v62 = vunpack.c.l.bf16 %v299_v60 }
  0xa0   : > { %v379_v0 = vmax.f32 %v347_v61, %v371_v62 }
  0xa2   : > { %v387_v2 = vpack.c.bf16 %v379_v0, %v379_v0 }
  0xa3   : > { %v286_v4 = vpop.permute.xlu1 %285 }
  0xa4   : > { %396 = vst.msk [vmem:[%s637_s16 + $0x4] sm:$0xf] %vm394_vm3, %v387_v2  ;;  %v305_v6 = vsel %vm626_vm2, 4286644096, %v286_v4  ;;  %v284_v7 = vpop.permute.xlu0 %283 }
  0xa5   : > { %v377_v8 = vunpack.c.l.bf16 %v305_v6  ;;  %v304_v27 = vsel %vm626_vm2, 4286644096, %v284_v7 }
  0xa6   : > { %v376_v10 = vunpack.c.l.bf16 %v304_v27 }
  0xa7   : > { %v385_v11 = vmax.f32 %v353_v3, %v377_v8 }
  0xa8   : > { %v384_v12 = vmax.f32 %v352_v5, %v376_v10 }
  0xa9   : > { %v393_v13 = vpack.c.bf16 %v385_v11, %v385_v11 }
  0xaa   : > { %v392_v14 = vpack.c.bf16 %v384_v12, %v384_v12 }
  0xab   : > { %402 = vst.msk [vmem:[%s637_s16 + $0x1c] sm:$0xf] %vm394_vm3, %v393_v13  ;;  %v532_v15 = vpop.permute.xlu1 %531 }
  0xac   : > { %401 = vst.msk [vmem:[%s637_s16 + $0x18] sm:$0xf] %vm394_vm3, %v392_v14  ;;  %v534_v18 = vunpack.i.h.bf16 %v532_v15  ;;  %v533_v19 = vunpack.i.l.bf16 %v532_v15  ;;  %v527_v20 = vpop.permute.xlu0 %526 }
  0xad   : > { %v529_v21 = vunpack.i.h.bf16 %v527_v20  ;;  %v528_v22 = vunpack.i.l.bf16 %v527_v20 }
  0xae   : > { %v351_v25 = vmax.f32 %v606_v9, %v534_v18  ;;  %v350_v28 = vmax.f32 %v600_v54, %v533_v19 }
  0xaf   : > { %v349_v33 = vmax.f32 %v580_v31, %v529_v21  ;;  %v348_v34 = vmax.f32 %v574_v26, %v528_v22 }
  0xb0   : > { %v382_v35 = vmax.f32 %v350_v28, %v374_v23  ;;  %v383_v36 = vmax.f32 %v351_v25, %v375_v24 }
  0xb1   : > { %v381_v37 = vmax.f32 %v349_v33, %v373_v32  ;;  %v380_v38 = vmax.f32 %v348_v34, %v372_v29 }
  0xb2   : > { %v390_v40 = vpack.c.bf16 %v382_v35, %v382_v35  ;;  %v391_v41 = vpack.c.bf16 %v383_v36, %v383_v36 }
  0xb3   : > { %v389_v42 = vpack.c.bf16 %v381_v37, %v381_v37  ;;  %v388_v44 = vpack.c.bf16 %v380_v38, %v380_v38 }
  0xb4   : > { %399 = vst.msk [vmem:[%s637_s16 + $0x10] sm:$0xf] %vm394_vm3, %v390_v40 }
  0xb5   : > { %400 = vst.msk [vmem:[%s637_s16 + $0x14] sm:$0xf] %vm394_vm3, %v391_v41 }
  0xb6   : > { %398 = vst.msk [vmem:[%s637_s16 + $0xc] sm:$0xf] %vm394_vm3, %v389_v42 }
  0xb7   : > { %397 = vst.msk [vmem:[%s637_s16 + $0x8] sm:$0xf] %vm394_vm3, %v388_v44 }
  0xb8 PF: > { %s11_s6 = sadd.s32 1, %s546_s6  }
  0xb9   : > { %p8_p4 = scmp.ge.s32.totalorder %s11_s6, 4  }
  0xbb   :  { %10 = sbr.rel (!%p8_p4) target bundleno = 1 (0x1), region = 54 }

// kernel: ranet_forward.17
= control target key start
LH: loop header
LB: loop body
LE: loop exit
PB: predicated region body
PF: predicated region fallthrough
CT: control target
= control target key end

     0   :  { %s797_s3 = inlined_call_operand.vmem [shape: bf16[128,128], index: 3, kind: input, shape index: {}]   ;;  %s798_s6 = inlined_call_operand.vmem [shape: bf16[128,128], index: 6, kind: input, shape index: {}]   ;;  %s799_s1 = inlined_call_operand.vmem [shape: f32[1,128], index: 1, kind: input, shape index: {}]   ;;  %s800_s2 = inlined_call_operand.vmem [shape: f32[1,128], index: 2, kind: input, shape index: {}]   ;;  %s801_s4 = inlined_call_operand.vmem [shape: f32[1,128], index: 4, kind: input, shape index: {}]   ;;  %s802_s0 = inlined_call_operand.vmem [shape: bf16[4,128], index: 0, kind: input, shape index: {}]   ;;  %s803_s5 = inlined_call_operand.vmem [shape: f32[1,128], index: 5, kind: input, shape index: {}]   ;;  %s804_s9 = inlined_call_operand.vmem [shape: bf16[128,128], index: 9, kind: input, shape index: {}]   ;;  %s805_s7 = inlined_call_operand.vmem [shape: f32[1,128], index: 7, kind: input, shape index: {}]   ;;  %s806_s8 = inlined_call_operand.vmem [shape: f32[1,128], index: 8, kind: input, shape index: {}]   ;;  %s807_s10 = inlined_call_operand.vmem [shape: f32[1,128], index: 10, kind: input, shape index: {}]   ;;  %s808_s12 = inlined_call_operand.vmem [shape: bf16[128,128], index: 12, kind: input, shape index: {}]   ;;  %s809_s13 = inlined_call_operand.vmem [shape: bf16[4,128], index: 13, kind: output, shape index: {0}]   ;;  %s810_s11 = inlined_call_operand.vmem [shape: f32[1,128], index: 11, kind: input, shape index: {}]   ;;  %s811_s14 = inlined_call_operand.vmem [shape: bf16[4,128], index: 14, kind: output, shape index: {1}]  }
   0x1   :  { %v553_v0 = vld [vmem:[%s797_s3 + $0x38] sm:$0xff]  ;;  %v552_v1 = vld [vmem:[%s797_s3 + $0x30] sm:$0xff]  ;;  %v551_v3 = vld [vmem:[%s797_s3 + $0x28] sm:$0xff] }
   0x2   :  { %124 = vmatpush.bf16.msra.mxu0 %v553_v0  ;;  %v561_v2 = vld [vmem:[%s798_s6 + $0x38] sm:$0xff]  ;;  %v560_v4 = vld [vmem:[%s798_s6 + $0x30] sm:$0xff]  ;;  %v550_v5 = vld [vmem:[%s797_s3 + $0x20] sm:$0xff] }
   0x3   :  { %213 = vmatpush.bf16.msra.mxu1 %v561_v2  ;;  %v682_v6 = vld [vmem:[%s802_s0] sm:$0x3]  ;;  %v559_v7 = vld [vmem:[%s798_s6 + $0x28] sm:$0xff]  ;;  %v549_v10 = vld [vmem:[%s797_s3 + $0x18] sm:$0xff] }
   0x4   :  { %v47_v8 = vunpack.c.l.bf16 %v682_v6  ;;  %v578_v9 = vld [vmem:[%s799_s1] ss:$0 sm:$0xff]  ;;  %v548_v14 = vld [vmem:[%s797_s3 + $0x10] sm:$0xff]  ;;  %v557_v15 = vld [vmem:[%s798_s6 + $0x18] sm:$0xff] }
   0x5   :  { %v558_v11 = vld [vmem:[%s798_s6 + $0x20] sm:$0xff]  ;;  %v547_v17 = vld [vmem:[%s797_s3 + $0x8] sm:$0xff]  ;;  %v556_v18 = vld [vmem:[%s798_s6 + $0x10] sm:$0xff] }
   0x6   :  { %125 = vmatpush.bf16.msra.mxu0 %v552_v1  ;;  %v52_v12 = vmul.f32 %v578_v9, %v47_v8  ;;  %v579_v13 = vld [vmem:[%s800_s2] ss:$0 sm:$0xff]  ;;  %v555_v22 = vld [vmem:[%s798_s6 + $0x8] sm:$0xff]  ;;  %v569_v24 = vld [vmem:[%s804_s9 + $0x38] sm:$0xff] }
   0x7   :  { %214 = vmatpush.bf16.msra.mxu1 %v560_v4  ;;  %v546_v20 = vld [vmem:[%s797_s3] sm:$0xff]  ;;  %305 = vmatpush.bf16.msra.mxu2 %v569_v24  ;;  %v568_v25 = vld [vmem:[%s804_s9 + $0x30] sm:$0xff]  ;;  %v567_v26 = vld [vmem:[%s804_s9 + $0x28] sm:$0xff] }
   0x8   :  { %v57_v16 = vadd.f32 %v579_v13, %v52_v12  ;;  %v554_v23 = vld [vmem:[%s798_s6] sm:$0xff]  ;;  %v565_v28 = vld [vmem:[%s804_s9 + $0x18] sm:$0xff]  ;;  %v564_v37 = vld [vmem:[%s804_s9 + $0x10] sm:$0xff] }
   0x9   :  { %v566_v27 = vld [vmem:[%s804_s9 + $0x20] sm:$0xff]  ;;  %v563_v38 = vld [vmem:[%s804_s9 + $0x8] sm:$0xff]  ;;  %v577_v40 = vld [vmem:[%s808_s12 + $0x38] sm:$0xff] }
   0xa   :  { %126 = vmatpush.bf16.msra.mxu0 %v551_v3  ;;  %v58_v19 = vmax.f32 %v57_v16, 0.0  ;;  %v580_v29 = vld [vmem:[%s801_s4] ss:$0 sm:$0xff]  ;;  %394 = vmatpush.bf16.msra.mxu3 %v577_v40  ;;  %v576_v41 = vld [vmem:[%s808_s12 + $0x30] sm:$0xff]  ;;  %v575_v42 = vld [vmem:[%s808_s12 + $0x28] sm:$0xff] }
   0xb   :  { %215 = vmatpush.bf16.msra.mxu1 %v559_v7  ;;  %306 = vmatpush.bf16.msra.mxu2 %v568_v25  ;;  %v581_v30 = vld [vmem:[%s803_s5] ss:$0 sm:$0xff]  ;;  %v573_v44 = vld [vmem:[%s808_s12 + $0x18] sm:$0xff]  ;;  %v572_v45 = vld [vmem:[%s808_s12 + $0x10] sm:$0xff] }
   0xc   :  { %v59_v21 = vpack.c.bf16 %v58_v19, %v58_v19  ;;  %v562_v39 = vld [vmem:[%s804_s9] sm:$0xff]  ;;  %v571_v56 = vld [vmem:[%s808_s12 + $0x8] sm:$0xff] }
   0xd   :  { %v574_v43 = vld [vmem:[%s808_s12 + $0x20] sm:$0xff] }
   0xe   :  { %127 = vmatpush.bf16.msra.mxu0 %v550_v5  ;;  %395 = vmatpush.bf16.msra.mxu3 %v576_v41  ;;  %v582_v46 = vld [vmem:[%s805_s7] ss:$0 sm:$0xff] }
   0xf   :  { %216 = vmatpush.bf16.msra.mxu1 %v558_v11  ;;  %307 = vmatpush.bf16.msra.mxu2 %v567_v26  ;;  %v583_v49 = vld [vmem:[%s806_s8] ss:$0 sm:$0xff] }
  0x10   :  { %v570_v57 = vld [vmem:[%s808_s12] sm:$0xff] }
  0x11   :  { %v584_v58 = vld [vmem:[%s807_s10] ss:$0 sm:$0xff] }
  0x12   :  { %128 = vmatpush.bf16.msra.mxu0 %v549_v10  ;;  %396 = vmatpush.bf16.msra.mxu3 %v575_v42  ;;  %v585_v59 = vld [vmem:[%s810_s11] ss:$0 sm:$0xff] }
  0x13   :  { %217 = vmatpush.bf16.msra.mxu1 %v557_v15  ;;  %308 = vmatpush.bf16.msra.mxu2 %v566_v27 }
  0x16   :  { %129 = vmatpush.bf16.msra.mxu0 %v548_v14  ;;  %397 = vmatpush.bf16.msra.mxu3 %v574_v43 }
  0x17   :  { %218 = vmatpush.bf16.msra.mxu1 %v556_v18  ;;  %309 = vmatpush.bf16.msra.mxu2 %v565_v28 }
  0x1a   :  { %130 = vmatpush.bf16.msra.mxu0 %v547_v17  ;;  %398 = vmatpush.bf16.msra.mxu3 %v573_v44 }
  0x1b   :  { %219 = vmatpush.bf16.msra.mxu1 %v555_v22  ;;  %310 = vmatpush.bf16.msra.mxu2 %v564_v37 }
  0x1e   :  { %131 = vmatpush.bf16.msra.mxu0 %v546_v20  ;;  %399 = vmatpush.bf16.msra.mxu3 %v572_v45 }
  0x1f   :  { %220 = vmatpush.bf16.msra.mxu1 %v554_v23  ;;  %311 = vmatpush.bf16.msra.mxu2 %v563_v38 }
  0x21   :  { %132 = vmatmul.bf16.vlgmr.msra.gmra.mxu0 %v59_v21 }
  0x22   :  { %400 = vmatpush.bf16.msra.mxu3 %v571_v56 }
  0x23   :  { %312 = vmatpush.bf16.msra.mxu2 %v562_v39 }
  0x26   :  { %401 = vmatpush.bf16.msra.mxu3 %v570_v57 }
  0x9e   :  { %v133_v31 = vpop.f32.mrf.mxu0 }
  0x9f   :  { %v141_v32 = vmul.f32 %v580_v29, %v133_v31 }
  0xa1   :  { %v146_v33 = vadd.f32 %v581_v30, %v141_v32 }
  0xa3   :  { %v147_v34 = vmax.f32 %v146_v33, 0.0 }
  0xa5   :  { %v148_v35 = vpack.c.bf16 %v147_v34, %v147_v34 }
  0xa6   :  { %v135_v36 = vpop.f32.mrf.mxu0 }
  0xa7   :  { %221 = vmatmul.bf16.vlgmr.msra.gmra.mxu1 %v148_v35 }
 0x124   :  { %v222_v47 = vpop.f32.mrf.mxu1 }
 0x125   :  { %v226_v48 = vadd.f32 %v222_v47, %v47_v8 }
 0x127   :  { %v227_v50 = vpack.c.bf16 %v226_v48, %v226_v48  ;;  %v233_v51 = vmul.f32 %v582_v46, %v226_v48 }
 0x129   :  { %228 = vst [vmem:[%s809_s13] sm:$0x3] %v227_v50  ;;  %v238_v52 = vadd.f32 %v583_v49, %v233_v51 }
 0x12b   :  { %v239_v53 = vmax.f32 %v238_v52, 0.0 }
 0x12c   :  { %v224_v54 = vpop.f32.mrf.mxu1 }
 0x12d   :  { %v240_v55 = vpack.c.bf16 %v239_v53, %v239_v53 }
 0x12f   :  { %313 = vmatmul.bf16.vlgmr.msra.gmra.mxu2 %v240_v55 }
 0x1b2   :  { %v314_v60 = vpop.f32.mrf.mxu2 }
 0x1b3   :  { %v322_v61 = vmul.f32 %v584_v58, %v314_v60 }
 0x1b5   :  { %v327_v62 = vadd.f32 %v585_v59, %v322_v61 }
 0x1b7   :  { %v328_v63 = vmax.f32 %v327_v62, 0.0 }
 0x1b9   :  { %v329_v0 = vpack.c.bf16 %v328_v63, %v328_v63 }
 0x1ba   :  { %v316_v1 = vpop.f32.mrf.mxu2 }
 0x1bb   :  { %402 = vmatmul.bf16.vlgmr.msra.gmra.mxu3 %v329_v0 }
 0x23e   :  { %v403_v2 = vpop.f32.mrf.mxu3 }
 0x23f   :  { %v407_v3 = vadd.f32 %v403_v2, %v226_v48 }
 0x241   :  { %v408_v4 = vpack.c.bf16 %v407_v3, %v407_v3 }
 0x243   :  { %409 = vst [vmem:[%s811_s14] sm:$0x3] %v408_v4 }
 0x246   :  { %v405_v5 = vpop.f32.mrf.mxu3 }

// kernel: ranet_forward.18
= control target key start
LH: loop header
LB: loop body
LE: loop exit
PB: predicated region body
PF: predicated region fallthrough
CT: control target
= control target key end

     0   :  { %s371_s6 = smov 0   ;;  %s414_s0 = inlined_call_operand.vmem [shape: bf16[2,4,2,4,8], index: 0, kind: input, shape index: {}]   ;;  %s415_s1 = inlined_call_operand.vmem [shape: bf16[2,4,4,4], index: 1, kind: output, shape index: {}]  }
   0x1 LB: > { %s318_s7 = sadd.s32 4294967295, %s357_s6   ;;  %p322_p0 = scmp.ge.s32.totalorder %s357_s6, 1  ;;  %s357_s6 = sphi %s371_s6, %s11_s6  }
   0x2   : > { %p87_p1 = scmp.lt.s32.totalorder %s357_s6, 3 }
   0x4   : > { %p88_p2 = pnand %p322_p0, %p87_p1 }
   0x5   : > { %p107_p3 = scmp.lt.s32.totalorder (!%p88_p2), %s318_s7, 1  ;;  %s360_s12 = smov (!%p88_p2), 124  }
   0x6   : > { %91 = sbr.rel (%p88_p2) target bundleno = 165 (0xa5), region = 24 }
   0xb   : > { %s419_s7 = smov (!%p107_p3, %s318_s7), 1  ;;  %v359_v12 = vmov 4286644096   ;;  %vm207_vm0 = vcmask 1040384   ;;  %vm208_vm1 = vsmask.f32 256 }
   0xc   : > { %s329_s8 = sshll.u32 %s419_s7, 4  ;;  %v146_v13 = vunpack.c.l.bf16 %v359_v12  ;;  %vm390_vm2 = vmand %vm207_vm0, %vm208_vm1  ;;  %s330_s13 = sshll.u32 %s419_s7, 3  ;;  %vm258_vm3 = vcmask 25600  }
   0xd   : > { %s111_s11 = scalar_lea.vmem %s414_s0, %s329_s8  ;;  %s116_s16 = scalar_lea.vmem %s415_s1, %s330_s13 }
   0xe   : > { %v121_v0 = vld [vmem:[%s111_s11 + $0x6] sm:$0x3]  ;;  %v122_v1 = vld [vmem:[%s111_s11 + $0x8] sm:$0x3]  ;;  %v123_v2 = vld [vmem:[%s111_s11 + $0xa] sm:$0x3] }
   0xf   : > { %v128_v3 = vunpack.c.l.bf16 %v122_v1  ;;  %v131_v4 = vunpack.c.l.bf16 %v121_v0  ;;  %v132_v5 = vunpack.c.l.bf16 %v123_v2  ;;  %v120_v6 = vld [vmem:[%s111_s11 + $0x4] sm:$0x3]  ;;  %v118_v7 = vld [vmem:[%s111_s11] sm:$0x3]  ;;  %v119_v8 = vld [vmem:[%s111_s11 + $0x2] sm:$0x3] }
  0x10   : > { %v127_v9 = vunpack.c.l.bf16 %v120_v6  ;;  %v126_v10 = vunpack.c.l.bf16 %v118_v7  ;;  %v130_v11 = vunpack.c.l.bf16 %v119_v8  ;;  %v124_v14 = vld [vmem:[%s111_s11 + $0xc] sm:$0x3]  ;;  %v125_v15 = vld [vmem:[%s111_s11 + $0xe] sm:$0x3] }
  0x11   : > { %v136_v16 = vmax.f32 %v128_v3, %v132_v5  ;;  %v129_v17 = vunpack.c.l.bf16 %v124_v14  ;;  %v133_v18 = vunpack.c.l.bf16 %v125_v15 }
  0x12   : > { %v135_v19 = vmax.f32 %v127_v9, %v131_v4  ;;  %v134_v20 = vmax.f32 %v126_v10, %v130_v11 }
  0x13   : > { %v149_v21 = vmax.f32 %v136_v16, %v131_v4  ;;  %v137_v22 = vmax.f32 %v129_v17, %v133_v18 }
  0x14   : > { %v147_v23 = vmax.f32 %v134_v20, %v146_v13  ;;  %v385_v24 = vmax.f32 %v135_v19, %v130_v11 }
  0x15   : > { %v153_v25 = vpack.c.bf16 %v149_v21, %v149_v21  ;;  %v150_v26 = vmax.f32 %v137_v22, %v132_v5 }
  0x16   : > { %v151_v27 = vpack.c.bf16 %v147_v23, %v147_v23  ;;  %v152_v28 = vpack.c.bf16 %v385_v24, %v385_v24  ;;  %v341_v37 = vpack.i.bf16 %v385_v24, %v147_v23 }
  0x17   : > { %v161_v29 = vunpack.c.l.b16 %v153_v25  ;;  %v154_v30 = vpack.c.bf16 %v150_v26, %v150_v26  ;;  %v346_v49 = vpack.i.bf16 %v150_v26, %v149_v21 }
  0x18   : > { %v159_v31 = vunpack.c.l.b16 %v151_v27  ;;  %v160_v32 = vunpack.c.l.b16 %v152_v28  ;;  %342 = vrot.lane.b32.xlu2 %v341_v37, %s360_s12 }
  0x19   : > { %v165_v33 = vpack.c.b16 %v161_v29, %v161_v29  ;;  %v162_v34 = vunpack.c.l.b16 %v154_v30 }
  0x1a   : > { %v163_v35 = vpack.c.b16 %v159_v31, %v159_v31  ;;  %v164_v36 = vpack.c.b16 %v160_v32, %v160_v32 }
  0x1b   : > { %v182_v38 = vshrl.u32 %v165_v33, 16  ;;  %v185_v39 = vshll.u32 %v165_v33, 16  ;;  %v166_v40 = vpack.c.b16 %v162_v34, %v162_v34 }
  0x1c   : > { %v168_v41 = vshrl.u32 %v163_v35, 16  ;;  %v171_v42 = vshll.u32 %v163_v35, 16  ;;  %v175_v46 = vshrl.u32 %v164_v36, 16  ;;  %v178_v53 = vshll.u32 %v164_v36, 16 }
  0x1d   : > { %v184_v43 = vrot.slane %v182_v38, 7  ;;  %v189_v44 = vshrl.u32 %v166_v40, 16  ;;  %v192_v51 = vshll.u32 %v166_v40, 16 }
  0x1e   : > { %v170_v45 = vrot.slane %v168_v41, 7  ;;  %v177_v52 = vrot.slane %v175_v46, 7 }
  0x1f   : > { %v187_v47 = vor.u32 %v185_v39, %v184_v43  ;;  %v191_v50 = vrot.slane %v189_v44, 7 }
  0x20   : > { %v173_v48 = vor.u32 %v171_v42, %v170_v45  ;;  %347 = vrot.lane.b32.xlu2 %v346_v49, %s360_s12  ;;  %v180_v55 = vor.u32 %v178_v53, %v177_v52 }
  0x21   : > { %199 = vrot.lane.b32.xlu1 %v187_v47, %s360_s12  ;;  %v194_v54 = vor.u32 %v192_v51, %v191_v50 }
  0x22   : > { %195 = vrot.lane.b32.xlu0 %v173_v48, %s360_s12 }
  0x29   : > { %201 = vrot.lane.b32.xlu1 %v194_v54, %s360_s12 }
  0x2a   : > { %197 = vrot.lane.b32.xlu0 %v180_v55, %s360_s12 }
  0x72   : > { %v343_v56 = vpop.permute.xlu2 %342 }
  0x73   : > { %v344_v59 = vunpack.i.l.bf16 %v343_v56  ;;  %v345_v9 = vunpack.i.h.bf16 %v343_v56 }
  0x75   : > { %v234_v63 = vmax.f32 %v147_v23, %v344_v59  ;;  %v235_v17 = vmax.f32 %v385_v24, %v345_v9 }
  0x7a   : > { %v348_v57 = vpop.permute.xlu2 %347 }
  0x7b   : > { %v349_v58 = vunpack.i.l.bf16 %v348_v57  ;;  %v350_v5 = vunpack.i.h.bf16 %v348_v57 }
  0x7d   : > { %v236_v61 = vmax.f32 %v149_v21, %v349_v58  ;;  %v237_v11 = vmax.f32 %v150_v26, %v350_v5 }
  0x93   : > { %v200_v62 = vpop.permute.xlu1 %199 }
  0x94   : > { %v212_v0 = vsel %vm390_vm2, 4286644096, %v200_v62  ;;  %v196_v1 = vpop.permute.xlu0 %195 }
  0x95   : > { %v248_v2 = vunpack.c.l.bf16 %v212_v0  ;;  %v210_v3 = vsel %vm390_vm2, 4286644096, %v196_v1 }
  0x96   : > { %v246_v4 = vunpack.c.l.bf16 %v210_v3 }
  0x97   : > { %v252_v6 = vmax.f32 %v236_v61, %v248_v2 }
  0x98   : > { %v250_v7 = vmax.f32 %v234_v63, %v246_v4 }
  0x99   : > { %v256_v8 = vpack.c.bf16 %v252_v6, %v252_v6 }
  0x9a   : > { %v254_v10 = vpack.c.bf16 %v250_v7, %v250_v7 }
  0x9b   : > { %261 = vst.msk [vmem:[%s116_s16 + $0x4] sm:$0x3] %vm258_vm3, %v256_v8  ;;  %v202_v12 = vpop.permute.xlu1 %201 }
  0x9c   : > { %259 = vst.msk [vmem:[%s116_s16] sm:$0x3] %vm258_vm3, %v254_v10  ;;  %v213_v13 = vsel %vm390_vm2, 4286644096, %v202_v12  ;;  %v198_v14 = vpop.permute.xlu0 %197 }
  0x9d   : > { %v249_v15 = vunpack.c.l.bf16 %v213_v13  ;;  %v211_v16 = vsel %vm390_vm2, 4286644096, %v198_v14 }
  0x9e   : > { %v247_v18 = vunpack.c.l.bf16 %v211_v16 }
  0x9f   : > { %v253_v19 = vmax.f32 %v237_v11, %v249_v15 }
  0xa0   : > { %v251_v20 = vmax.f32 %v235_v17, %v247_v18 }
  0xa1   : > { %v257_v21 = vpack.c.bf16 %v253_v19, %v253_v19 }
  0xa2   : > { %v255_v22 = vpack.c.bf16 %v251_v20, %v251_v20 }
  0xa3   : > { %262 = vst.msk [vmem:[%s116_s16 + $0x6] sm:$0x3] %vm258_vm3, %v257_v21 }
  0xa4   : > { %260 = vst.msk [vmem:[%s116_s16 + $0x2] sm:$0x3] %vm258_vm3, %v255_v22 }
  0xa5 PF: > { %s11_s6 = sadd.s32 1, %s357_s6  }
  0xa6   : > { %p8_p4 = scmp.ge.s32.totalorder %s11_s6, 4  }
  0xa8   :  { %10 = sbr.rel (!%p8_p4) target bundleno = 1 (0x1), region = 54 }

// kernel: ranet_forward.19
= control target key start
LH: loop header
LB: loop body
LE: loop exit
PB: predicated region body
PF: predicated region fallthrough
CT: control target
= control target key end

     0   :  { %vm216_vm0 = vcmask 1040384   ;;  %vm217_vm1 = vsmask.f32 256  ;;  %s786_s3 = inlined_call_operand.vmem [shape: bf16[128,128], index: 3, kind: input, shape index: {}]   ;;  %s787_s6 = inlined_call_operand.vmem [shape: bf16[128,128], index: 6, kind: input, shape index: {}]   ;;  %s788_s0 = inlined_call_operand.vmem [shape: bf16[1,128], index: 0, kind: input, shape index: {}]   ;;  %s789_s1 = inlined_call_operand.vmem [shape: f32[1,128], index: 1, kind: input, shape index: {}]   ;;  %s790_s2 = inlined_call_operand.vmem [shape: f32[1,128], index: 2, kind: input, shape index: {}]   ;;  %s791_s9 = inlined_call_operand.vmem [shape: bf16[128,128], index: 9, kind: input, shape index: {}]   ;;  %s792_s4 = inlined_call_operand.vmem [shape: f32[1,128], index: 4, kind: input, shape index: {}]   ;;  %s793_s5 = inlined_call_operand.vmem [shape: f32[1,128], index: 5, kind: input, shape index: {}]   ;;  %s794_s12 = inlined_call_operand.vmem [shape: bf16[128,128], index: 12, kind: input, shape index: {}]   ;;  %s795_s7 = inlined_call_operand.vmem [shape: f32[1,128], index: 7, kind: input, shape index: {}]   ;;  %s796_s8 = inlined_call_operand.vmem [shape: f32[1,128], index: 8, kind: input, shape index: {}]   ;;  %s797_s13 = inlined_call_operand.vmem [shape: bf16[1,128], index: 13, kind: output, shape index: {0}]   ;;  %s798_s10 = inlined_call_operand.vmem [shape: f32[1,128], index: 10, kind: input, shape index: {}]   ;;  %s799_s11 = inlined_call_operand.vmem [shape: f32[1,128], index: 11, kind: input, shape index: {}]   ;;  %s800_s14 = inlined_call_operand.vmem [shape: bf16[1,128], index: 14, kind: output, shape index: {1}]  }
   0x1   :  { %v536_v0 = vld [vmem:[%s786_s3 + $0x38] sm:$0xff]  ;;  %v535_v1 = vld [vmem:[%s786_s3 + $0x30] sm:$0xff]  ;;  %v534_v4 = vld [vmem:[%s786_s3 + $0x28] sm:$0xff] }
   0x2   :  { %118 = vmatpush.bf16.msra.mxu0 %v536_v0  ;;  %v544_v2 = vld [vmem:[%s787_s6 + $0x38] sm:$0xff]  ;;  %v543_v3 = vld [vmem:[%s787_s6 + $0x30] sm:$0xff]  ;;  %v542_v5 = vld [vmem:[%s787_s6 + $0x28] sm:$0xff] }
   0x3   :  { %201 = vmatpush.bf16.msra.mxu1 %v544_v2  ;;  %v533_v6 = vld [vmem:[%s786_s3 + $0x20] sm:$0xff]  ;;  %v532_v10 = vld [vmem:[%s786_s3 + $0x18] sm:$0xff]  ;;  %v531_v14 = vld [vmem:[%s786_s3 + $0x10] sm:$0xff] }
   0x4   :  { %v660_v7 = vld [vmem:[%s788_s0] sm:$0x1]  ;;  %v540_v13 = vld [vmem:[%s787_s6 + $0x18] sm:$0xff]  ;;  %v539_v17 = vld [vmem:[%s787_s6 + $0x10] sm:$0xff] }
   0x5   :  { %v47_v8 = vunpack.c.l.bf16 %v660_v7  ;;  %v541_v9 = vld [vmem:[%s787_s6 + $0x20] sm:$0xff]  ;;  %v530_v18 = vld [vmem:[%s786_s3 + $0x8] sm:$0xff]  ;;  %v552_v24 = vld [vmem:[%s791_s9 + $0x38] sm:$0xff] }
   0x6   :  { %119 = vmatpush.bf16.msra.mxu0 %v535_v1  ;;  %v48_v11 = vld [vmem:[%s789_s1] sm:$0x1]  ;;  %v538_v22 = vld [vmem:[%s787_s6 + $0x8] sm:$0xff]  ;;  %292 = vmatpush.bf16.msra.mxu2 %v552_v24  ;;  %v551_v25 = vld [vmem:[%s791_s9 + $0x30] sm:$0xff] }
   0x7   :  { %202 = vmatpush.bf16.msra.mxu1 %v543_v3  ;;  %v49_v12 = vmul.f32 %v48_v11, %v47_v8  ;;  %v50_v15 = vld [vmem:[%s790_s2] sm:$0x1]  ;;  %v550_v26 = vld [vmem:[%s791_s9 + $0x28] sm:$0xff]  ;;  %v548_v28 = vld [vmem:[%s791_s9 + $0x18] sm:$0xff] }
   0x8   :  { %v529_v20 = vld [vmem:[%s786_s3] sm:$0xff]  ;;  %v547_v37 = vld [vmem:[%s791_s9 + $0x10] sm:$0xff]  ;;  %v546_v38 = vld [vmem:[%s791_s9 + $0x8] sm:$0xff] }
   0x9   :  { %v51_v16 = vadd.f32 %v50_v15, %v49_v12  ;;  %v537_v23 = vld [vmem:[%s787_s6] sm:$0xff]  ;;  %v560_v40 = vld [vmem:[%s794_s12 + $0x38] sm:$0xff]  ;;  %v559_v41 = vld [vmem:[%s794_s12 + $0x30] sm:$0xff] }
   0xa   :  { %120 = vmatpush.bf16.msra.mxu0 %v534_v4  ;;  %293 = vmatpush.bf16.msra.mxu2 %v551_v25  ;;  %v549_v27 = vld [vmem:[%s791_s9 + $0x20] sm:$0xff]  ;;  %v558_v42 = vld [vmem:[%s794_s12 + $0x28] sm:$0xff]  ;;  %v556_v44 = vld [vmem:[%s794_s12 + $0x18] sm:$0xff] }
   0xb   :  { %203 = vmatpush.bf16.msra.mxu1 %v542_v5  ;;  %v52_v19 = vmax.f32 %v51_v16, 0.0  ;;  %v131_v29 = vld [vmem:[%s792_s4] sm:$0x1]  ;;  %375 = vmatpush.bf16.msra.mxu3 %v560_v40  ;;  %v555_v45 = vld [vmem:[%s794_s12 + $0x10] sm:$0xff]  ;;  %vm754_vm2 = vmand %vm216_vm0, %vm217_vm1 }
   0xc   :  { %v133_v31 = vld [vmem:[%s793_s5] sm:$0x1]  ;;  %v554_v59 = vld [vmem:[%s794_s12 + $0x8] sm:$0xff] }
   0xd   :  { %v53_v21 = vpack.c.bf16 %v52_v19, %v52_v19  ;;  %v545_v39 = vld [vmem:[%s791_s9] sm:$0xff] }
   0xe   :  { %121 = vmatpush.bf16.msra.mxu0 %v533_v6  ;;  %294 = vmatpush.bf16.msra.mxu2 %v550_v26  ;;  %v557_v43 = vld [vmem:[%s794_s12 + $0x20] sm:$0xff] }
   0xf   :  { %204 = vmatpush.bf16.msra.mxu1 %v541_v9  ;;  %376 = vmatpush.bf16.msra.mxu3 %v559_v41  ;;  %v222_v47 = vld [vmem:[%s795_s7] sm:$0x1] }
  0x10   :  { %v224_v49 = vld [vmem:[%s796_s8] sm:$0x1] }
  0x11   :  { %v219_v51 = vld [vmem:[%s797_s13] sm:$0x1] }
  0x12   :  { %122 = vmatpush.bf16.msra.mxu0 %v532_v10  ;;  %295 = vmatpush.bf16.msra.mxu2 %v549_v27  ;;  %v553_v60 = vld [vmem:[%s794_s12] sm:$0xff] }
  0x13   :  { %205 = vmatpush.bf16.msra.mxu1 %v540_v13  ;;  %377 = vmatpush.bf16.msra.mxu3 %v558_v42  ;;  %v305_v61 = vld [vmem:[%s798_s10] sm:$0x1] }
  0x14   :  { %v307_v63 = vld [vmem:[%s799_s11] sm:$0x1] }
  0x15   :  { %v390_v7 = vld [vmem:[%s800_s14] sm:$0x1] }
  0x16   :  { %123 = vmatpush.bf16.msra.mxu0 %v531_v14  ;;  %296 = vmatpush.bf16.msra.mxu2 %v548_v28 }
  0x17   :  { %206 = vmatpush.bf16.msra.mxu1 %v539_v17  ;;  %378 = vmatpush.bf16.msra.mxu3 %v557_v43 }
  0x1a   :  { %124 = vmatpush.bf16.msra.mxu0 %v530_v18  ;;  %297 = vmatpush.bf16.msra.mxu2 %v547_v37 }
  0x1b   :  { %207 = vmatpush.bf16.msra.mxu1 %v538_v22  ;;  %379 = vmatpush.bf16.msra.mxu3 %v556_v44 }
  0x1e   :  { %125 = vmatpush.bf16.msra.mxu0 %v529_v20  ;;  %298 = vmatpush.bf16.msra.mxu2 %v546_v38 }
  0x1f   :  { %208 = vmatpush.bf16.msra.mxu1 %v537_v23  ;;  %380 = vmatpush.bf16.msra.mxu3 %v555_v45 }
  0x21   :  { %126 = vmatmul.bf16.vlgmr.msra.gmra.mxu0 %v53_v21 }
  0x22   :  { %299 = vmatpush.bf16.msra.mxu2 %v545_v39 }
  0x23   :  { %381 = vmatpush.bf16.msra.mxu3 %v554_v59 }
  0x27   :  { %382 = vmatpush.bf16.msra.mxu3 %v553_v60 }
  0x9e   :  { %v127_v30 = vpop.f32.mrf.mxu0 }
  0x9f   :  { %v132_v32 = vmul.f32 %v131_v29, %v127_v30 }
  0xa1   :  { %v134_v33 = vadd.f32 %v133_v31, %v132_v32 }
  0xa3   :  { %v135_v34 = vmax.f32 %v134_v33, 0.0 }
  0xa5   :  { %v136_v35 = vpack.c.bf16 %v135_v34, %v135_v34 }
  0xa6   :  { %v129_v36 = vpop.f32.mrf.mxu0 }
  0xa7   :  { %209 = vmatmul.bf16.vlgmr.msra.gmra.mxu1 %v136_v35 }
 0x124   :  { %v210_v46 = vpop.f32.mrf.mxu1 }
 0x125   :  { %v214_v48 = vadd.f32 %v210_v46, %v47_v8 }
 0x127   :  { %v215_v52 = vpack.c.bf16 %v214_v48, %v214_v48  ;;  %v223_v53 = vmul.f32 %v222_v47, %v214_v48 }
 0x129   :  { %v225_v54 = vadd.f32 %v224_v49, %v223_v53  ;;  %v220_v55 = vsel %vm754_vm2, %v215_v52, %v219_v51 }
 0x12a   :  { %221 = vst [vmem:[%s797_s13] sm:$0x1] %v220_v55 }
 0x12b   :  { %v226_v56 = vmax.f32 %v225_v54, 0.0 }
 0x12c   :  { %v212_v57 = vpop.f32.mrf.mxu1 }
 0x12d   :  { %v227_v58 = vpack.c.bf16 %v226_v56, %v226_v56 }
 0x12f   :  { %300 = vmatmul.bf16.vlgmr.msra.gmra.mxu2 %v227_v58 }
 0x1b2   :  { %v301_v62 = vpop.f32.mrf.mxu2 }
 0x1b3   :  { %v306_v0 = vmul.f32 %v305_v61, %v301_v62 }
 0x1b5   :  { %v308_v1 = vadd.f32 %v307_v63, %v306_v0 }
 0x1b7   :  { %v309_v2 = vmax.f32 %v308_v1, 0.0 }
 0x1b9   :  { %v310_v3 = vpack.c.bf16 %v309_v2, %v309_v2 }
 0x1ba   :  { %v303_v4 = vpop.f32.mrf.mxu2 }
 0x1bb   :  { %383 = vmatmul.bf16.vlgmr.msra.gmra.mxu3 %v310_v3 }
 0x23e   :  { %v384_v5 = vpop.f32.mrf.mxu3 }
 0x23f   :  { %v388_v6 = vadd.f32 %v384_v5, %v214_v48 }
 0x241   :  { %v389_v8 = vpack.c.bf16 %v388_v6, %v388_v6 }
 0x243   :  { %v391_v9 = vsel %vm754_vm2, %v389_v8, %v390_v7 }
 0x244   :  { %392 = vst [vmem:[%s800_s14] sm:$0x1] %v391_v9 }
 0x246   :  { %v386_v10 = vpop.f32.mrf.mxu3 }

// kernel: ranet_forward.20
= control target key start
LH: loop header
LB: loop body
LE: loop exit
PB: predicated region body
PF: predicated region fallthrough
CT: control target
= control target key end

     0   :  { %s282_s6 = smov 0   ;;  %s303_s0 = inlined_call_operand.vmem [shape: bf16[2,2,2,2,8], index: 0, kind: input, shape index: {}]   ;;  %s304_s1 = inlined_call_operand.vmem [shape: bf16[2,2,2,4], index: 1, kind: output, shape index: {}]  }
   0x1 LB: > { %s233_s7 = sadd.s32 4294967295, %s268_s6   ;;  %p237_p0 = scmp.ge.s32.totalorder %s268_s6, 1  ;;  %s268_s6 = sphi %s282_s6, %s11_s6  }
   0x2   : > { %p86_p1 = scmp.lt.s32.totalorder %s268_s6, 3 }
   0x4   : > { %p87_p2 = pnand %p237_p0, %p86_p1 }
   0x5   : > { %p104_p3 = scmp.lt.s32.totalorder (!%p87_p2), %s233_s7, 1  ;;  %s271_s12 = smov (!%p87_p2), 124  }
   0x6   : > { %90 = sbr.rel (%p87_p2) target bundleno = 165 (0xa5), region = 24 }
   0xb   : > { %s306_s7 = smov (!%p104_p3, %s233_s7), 1  ;;  %v270_v7 = vmov 4286644096   ;;  %vm150_vm0 = vcmask 1040384   ;;  %vm151_vm1 = vsmask.f32 256 }
   0xc   : > { %s238_s8 = sshll.u32 %s306_s7, 2  ;;  %v127_v8 = vunpack.c.l.bf16 %v270_v7  ;;  %vm152_vm2 = vmand %vm150_vm0, %vm151_vm1  ;;  %s239_s13 = sshll.u32 %s306_s7, 1  ;;  %vm177_vm3 = vcmask 24576  }
   0xd   : > { %s107_s11 = scalar_lea.vmem %s303_s0, %s238_s8  ;;  %s111_s16 = scalar_lea.vmem %s304_s1, %s239_s13 }
   0xe   : > { %v113_v0 = vld [vmem:[%s107_s11] sm:$0x1]  ;;  %v114_v1 = vld [vmem:[%s107_s11 + $0x1] sm:$0x1]  ;;  %v115_v2 = vld [vmem:[%s107_s11 + $0x2] sm:$0x1] }
   0xf   : > { %v116_v3 = vld [vmem:[%s107_s11 + $0x3] sm:$0x1]  ;;  %v117_v4 = vunpack.c.l.bf16 %v113_v0  ;;  %v118_v5 = vunpack.c.l.bf16 %v115_v2  ;;  %v119_v6 = vunpack.c.l.bf16 %v114_v1 }
  0x10   : > { %v120_v9 = vunpack.c.l.bf16 %v116_v3 }
  0x11   : > { %v121_v10 = vmax.f32 %v117_v4, %v119_v6 }
  0x12   : > { %v122_v11 = vmax.f32 %v118_v5, %v120_v9 }
  0x13   : > { %v128_v12 = vmax.f32 %v121_v10, %v127_v8 }
  0x14   : > { %v129_v13 = vmax.f32 %v122_v11, %v119_v6 }
  0x15   : > { %v130_v14 = vpack.c.bf16 %v128_v12, %v128_v12 }
  0x16   : > { %v131_v15 = vpack.c.bf16 %v129_v13, %v129_v13  ;;  %v257_v23 = vpack.i.bf16 %v129_v13, %v128_v12 }
  0x17   : > { %v134_v16 = vunpack.c.l.b16 %v130_v14 }
  0x18   : > { %v135_v17 = vunpack.c.l.b16 %v131_v15 }
  0x19   : > { %v136_v18 = vpack.c.b16 %v134_v16, %v134_v16 }
  0x1a   : > { %v137_v19 = vpack.c.b16 %v135_v17, %v135_v17 }
  0x1b   : > { %v139_v20 = vshll.u32 %v136_v18, 16 }
  0x1c   : > { %v142_v21 = vshll.u32 %v137_v19, 16 }
  0x1e   : > { %v252_v22 = vpack.i.bf16 %v142_v21, %v139_v20 }
  0x20   : > { %253 = vrot.lane.b32.xlu0 %v252_v22, %s271_s12 }
  0x28   : > { %258 = vrot.lane.b32.xlu0 %v257_v23, %s271_s12 }
  0x92   : > { %v254_v24 = vpop.permute.xlu0 %253 }
  0x93   : > { %v256_v25 = vunpack.i.h.bf16 %v254_v24  ;;  %v255_v26 = vunpack.i.l.bf16 %v254_v24 }
  0x95   : > { %v154_v27 = vsel %vm152_vm2, 4286644096, %v256_v25  ;;  %v153_v28 = vsel %vm152_vm2, 4286644096, %v255_v26 }
  0x96   : > { %v172_v32 = vunpack.c.l.bf16 %v154_v27  ;;  %v171_v33 = vunpack.c.l.bf16 %v153_v28 }
  0x9a   : > { %v259_v29 = vpop.permute.xlu0 %258 }
  0x9b   : > { %v261_v30 = vunpack.i.h.bf16 %v259_v29  ;;  %v260_v31 = vunpack.i.l.bf16 %v259_v29 }
  0x9d   : > { %v166_v34 = vmax.f32 %v129_v13, %v261_v30  ;;  %v165_v35 = vmax.f32 %v128_v12, %v260_v31 }
  0x9f   : > { %v173_v36 = vmax.f32 %v165_v35, %v171_v33  ;;  %v174_v37 = vmax.f32 %v166_v34, %v172_v32 }
  0xa1   : > { %v175_v38 = vpack.c.bf16 %v173_v36, %v173_v36  ;;  %v176_v39 = vpack.c.bf16 %v174_v37, %v174_v37 }
  0xa3   : > { %178 = vst.msk [vmem:[%s111_s16] sm:$0x1] %vm177_vm3, %v175_v38 }
  0xa4   : > { %179 = vst.msk [vmem:[%s111_s16 + $0x1] sm:$0x1] %vm177_vm3, %v176_v39 }
  0xa5 PF: > { %s11_s6 = sadd.s32 1, %s268_s6  }
  0xa6   : > { %p8_p4 = scmp.ge.s32.totalorder %s11_s6, 4  }
  0xa8   :  { %10 = sbr.rel (!%p8_p4) target bundleno = 1 (0x1), region = 54 }

// kernel: ranet_forward.22
= control target key start
LH: loop header
LB: loop body
LE: loop exit
PB: predicated region body
PF: predicated region fallthrough
CT: control target
= control target key end

     0   :  { %s309_s12 = smov 0   ;;  %s332_s0 = inlined_call_operand.vmem [shape: bf16[2,2,8], index: 0, kind: input, shape index: {}]   ;;  %s333_s1 = inlined_call_operand.vmem [shape: bf16[4,2], index: 1, kind: input, shape index: {}]   ;;  %s334_s2 = inlined_call_operand.vmem [shape: bf16[8,16], index: 2, kind: input, shape index: {}]   ;;  %s335_s3 = inlined_call_operand.vmem [shape: bf16[2,4,16], index: 3, kind: output, shape index: {}]  }
   0x1 LB: > { %s263_s13 = sadd.s32 4294967295, %s287_s12   ;;  %p267_p0 = scmp.ge.s32.totalorder %s287_s12, 1  ;;  %s287_s12 = sphi %s309_s12, %s13_s12  }
   0x2   : > { %p135_p1 = scmp.lt.s32.totalorder %s287_s12, 3 }
   0x4   : > { %p136_p2 = pnand %p267_p0, %p135_p1 }
   0x5   : > { %p156_p3 = scmp.lt.s32.totalorder (!%p136_p2), %s263_s13, 1 }
   0x6   : > { %139 = sbr.rel (%p136_p2) target bundleno = 280 (0x118), region = 32 }
   0xb   : > { %s337_s13 = smov (!%p156_p3, %s263_s13), 1  ;;  %vm170_vm0 = vcmask 1040384   ;;  %v165_v2 = vld [vmem:[%s333_s1] sm:$0x3]  ;;  %vm166_vm1 = vcmask 15360   ;;  %vm193_vm2 = vcmask 1043456  }
   0xc   : > { %s158_s16 = scalar_lea.vmem %s332_s0, %s337_s13  ;;  %v188_v3 = vld [vmem:[%s334_s2] sm:$0xf]  ;;  %vm189_vm3 = vcmask 64512   ;;  %s268_s21 = sshll.u32 %s337_s13, 1  ;;  %vm211_vm4 = vcmask 123904  }
   0xd   : > { %v164_v0 = vld [vmem:[%s158_s16] sm:$0x1]  ;;  %v195_v4 = vsel %vm193_vm2, %v188_v3, 0  ;;  %s162_s24 = scalar_lea.vmem %s335_s3, %s268_s21 }
   0xe   : > { %v172_v1 = vsel %vm170_vm0, %v164_v0, 0  ;;  %204 = vmatpush.bf16.msra.mxu1 %v195_v4 }
   0xf   : > { %181 = vmatpush.bf16.msra.mxu0 %v172_v1 }
  0x12   : > { %269 = vmatmul.msk.bf16.vlgmr.msra.gmra.mxu0 %vm166_vm1, %v165_v2 }
  0x8f   : > { %v183_v5 = vpop.f32.mrf.mxu0 }
  0x90   : > { %v187_v6 = vpack.c.bf16 %v183_v5, %v183_v5 }
  0x92   : > { %270 = vmatmul.msk.bf16.vlgmr.msra.gmra.mxu1 %vm189_vm3, %v187_v6 }
  0x97   : > { %v185_v7 = vpop.f32.mrf.mxu0 }
 0x10f   : > { %v206_v8 = vpop.f32.mrf.mxu1 }
 0x110   : > { %v210_v9 = vpack.c.bf16 %v206_v8, %v206_v8 }
 0x112   : > { %212 = vst.msk [vmem:[%s162_s24] sm:$0x3] %vm211_vm4, %v210_v9 }
 0x117   : > { %v208_v10 = vpop.f32.mrf.mxu1 }
 0x118 PF: > { %s13_s12 = sadd.s32 1, %s287_s12  }
 0x119   : > { %p10_p4 = scmp.ge.s32.totalorder %s13_s12, 4  }
 0x11b   :  { %12 = sbr.rel (!%p10_p4) target bundleno = 1 (0x1), region = 62 }

// kernel: ranet_forward.21
= control target key start
LH: loop header
LB: loop body
LE: loop exit
PB: predicated region body
PF: predicated region fallthrough
CT: control target
= control target key end

     0   :  { %vm69_vm0 = vcmask 261120   ;;  %vm203_vm1 = vcmask 253952   ;;  %vm204_vm2 = vsmask.f32 256  ;;  %s388_s3 = inlined_call_operand.vmem [shape: bf16[32,32], index: 3, kind: input, shape index: {}]   ;;  %s389_s0 = inlined_call_operand.vmem [shape: bf16[1,32], index: 0, kind: input, shape index: {}]   ;;  %s390_s1 = inlined_call_operand.vmem [shape: f32[1,32], index: 1, kind: input, shape index: {}]   ;;  %s391_s2 = inlined_call_operand.vmem [shape: f32[1,32], index: 2, kind: input, shape index: {}]   ;;  %s392_s6 = inlined_call_operand.vmem [shape: bf16[32,32], index: 6, kind: input, shape index: {}]   ;;  %s393_s4 = inlined_call_operand.vmem [shape: f32[1,32], index: 4, kind: input, shape index: {}]   ;;  %s394_s5 = inlined_call_operand.vmem [shape: f32[1,32], index: 5, kind: input, shape index: {}]   ;;  %s395_s9 = inlined_call_operand.vmem [shape: bf16[32,32], index: 9, kind: input, shape index: {}]   ;;  %s396_s7 = inlined_call_operand.vmem [shape: f32[1,32], index: 7, kind: input, shape index: {}]   ;;  %s397_s8 = inlined_call_operand.vmem [shape: f32[1,32], index: 8, kind: input, shape index: {}]   ;;  %s398_s12 = inlined_call_operand.vmem [shape: bf16[32,32], index: 12, kind: input, shape index: {}]   ;;  %s399_s10 = inlined_call_operand.vmem [shape: f32[1,32], index: 10, kind: input, shape index: {}]   ;;  %s400_s11 = inlined_call_operand.vmem [shape: f32[1,32], index: 11, kind: input, shape index: {}]   ;;  %s401_s13 = inlined_call_operand.vmem [shape: bf16[1,32], index: 13, kind: output, shape index: {}]  }
   0x1   :  { %v250_v0 = vld [vmem:[%s388_s3 + $0x8] sm:$0xff]  ;;  %v45_v1 = vld [vmem:[%s389_s0] sm:$0x1]  ;;  %vm205_vm3 = vmand %vm203_vm1, %vm204_vm2 }
   0x2   :  { %v46_v2 = vunpack.c.l.bf16 %v45_v1  ;;  %v47_v3 = vld [vmem:[%s390_s1] sm:$0x1]  ;;  %79 = vmatpush.bf16.msra.mxu0 %v250_v0  ;;  %v252_v10 = vld [vmem:[%s392_s6 + $0x8] sm:$0xff] }
   0x3   :  { %v249_v4 = vld [vmem:[%s388_s3] sm:$0xff]  ;;  %117 = vmatpush.bf16.msra.mxu1 %v252_v10  ;;  %v254_v20 = vld [vmem:[%s395_s9 + $0x8] sm:$0xff] }
   0x4   :  { %v49_v5 = vld [vmem:[%s391_s2] sm:$0x1]  ;;  %v48_v6 = vmul.f32 %v47_v3, %v46_v2  ;;  %156 = vmatpush.bf16.msra.mxu2 %v254_v20  ;;  %v256_v31 = vld [vmem:[%s398_s12 + $0x8] sm:$0xff] }
   0x5   :  { %v251_v11 = vld [vmem:[%s392_s6] sm:$0xff]  ;;  %194 = vmatpush.bf16.msra.mxu3 %v256_v31 }
   0x6   :  { %v50_v7 = vadd.f32 %v49_v5, %v48_v6  ;;  %80 = vmatpush.bf16.msra.mxu0 %v249_v4  ;;  %v86_v12 = vld [vmem:[%s393_s4] sm:$0x1] }
   0x7   :  { %118 = vmatpush.bf16.msra.mxu1 %v251_v11  ;;  %v88_v14 = vld [vmem:[%s394_s5] sm:$0x1] }
   0x8   :  { %v51_v8 = vmax.f32 %v50_v7, 0.0  ;;  %v253_v21 = vld [vmem:[%s395_s9] sm:$0xff] }
   0x9   :  { %157 = vmatpush.bf16.msra.mxu2 %v253_v21  ;;  %v125_v23 = vld [vmem:[%s396_s7] sm:$0x1] }
   0xa   :  { %v52_v9 = vpack.c.bf16 %v51_v8, %v51_v8  ;;  %v127_v25 = vld [vmem:[%s397_s8] sm:$0x1] }
   0xb   :  { %v255_v32 = vld [vmem:[%s398_s12] sm:$0xff] }
   0xc   :  { %221 = vmatmul.msk.bf16.vlgmr.msra.gmra.mxu0 %vm69_vm0, %v52_v9  ;;  %195 = vmatpush.bf16.msra.mxu3 %v255_v32  ;;  %v163_v33 = vld [vmem:[%s399_s10] sm:$0x1] }
   0xd   :  { %v165_v35 = vld [vmem:[%s400_s11] sm:$0x1] }
   0xe   :  { %v206_v43 = vld [vmem:[%s401_s13] sm:$0x1] }
  0x89   :  { %v82_v13 = vpop.f32.mrf.mxu0 }
  0x8a   :  { %v87_v15 = vmul.f32 %v86_v12, %v82_v13 }
  0x8c   :  { %v89_v16 = vadd.f32 %v88_v14, %v87_v15 }
  0x8e   :  { %v90_v17 = vmax.f32 %v89_v16, 0.0 }
  0x90   :  { %v91_v18 = vpack.c.bf16 %v90_v17, %v90_v17 }
  0x91   :  { %v84_v19 = vpop.f32.mrf.mxu0 }
  0x92   :  { %230 = vmatmul.msk.bf16.vlgmr.msra.gmra.mxu1 %vm69_vm0, %v91_v18 }
 0x10f   :  { %v120_v22 = vpop.f32.mrf.mxu1 }
 0x110   :  { %v124_v24 = vadd.f32 %v120_v22, %v46_v2 }
 0x112   :  { %v126_v26 = vmul.f32 %v125_v23, %v124_v24 }
 0x114   :  { %v128_v27 = vadd.f32 %v127_v25, %v126_v26 }
 0x116   :  { %v129_v28 = vmax.f32 %v128_v27, 0.0 }
 0x117   :  { %v122_v29 = vpop.f32.mrf.mxu1 }
 0x118   :  { %v130_v30 = vpack.c.bf16 %v129_v28, %v129_v28 }
 0x11a   :  { %239 = vmatmul.msk.bf16.vlgmr.msra.gmra.mxu2 %vm69_vm0, %v130_v30 }
 0x19d   :  { %v159_v34 = vpop.f32.mrf.mxu2 }
 0x19e   :  { %v164_v36 = vmul.f32 %v163_v33, %v159_v34 }
 0x1a0   :  { %v166_v37 = vadd.f32 %v165_v35, %v164_v36 }
 0x1a2   :  { %v167_v38 = vmax.f32 %v166_v37, 0.0 }
 0x1a4   :  { %v168_v39 = vpack.c.bf16 %v167_v38, %v167_v38 }
 0x1a5   :  { %v161_v40 = vpop.f32.mrf.mxu2 }
 0x1a6   :  { %248 = vmatmul.msk.bf16.vlgmr.msra.gmra.mxu3 %vm69_vm0, %v168_v39 }
 0x229   :  { %v197_v41 = vpop.f32.mrf.mxu3 }
 0x22a   :  { %v201_v42 = vadd.f32 %v197_v41, %v124_v24 }
 0x22c   :  { %v202_v44 = vpack.c.bf16 %v201_v42, %v201_v42 }
 0x22e   :  { %v207_v45 = vsel %vm205_vm3, %v202_v44, %v206_v43 }
 0x22f   :  { %208 = vst [vmem:[%s401_s13] sm:$0x1] %v207_v45 }
 0x231   :  { %v199_v46 = vpop.f32.mrf.mxu3 }

// kernel: ranet_forward.23
= control target key start
LH: loop header
LB: loop body
LE: loop exit
PB: predicated region body
PF: predicated region fallthrough
CT: control target
= control target key end

     0   :  { %vm202_vm0 = vcmask 1040384   ;;  %vm203_vm1 = vsmask.f32 256  ;;  %s409_s4 = inlined_call_operand.vmem [shape: bf16[128,128], index: 4, kind: input, shape index: {}]   ;;  %s410_s7 = inlined_call_operand.vmem [shape: bf16[128,128], index: 7, kind: input, shape index: {}]   ;;  %s411_s0 = inlined_call_operand.vmem [shape: bf16[1,128], index: 0, kind: input, shape index: {}]   ;;  %s412_s1 = inlined_call_operand.vmem [shape: bf16[1,128], index: 1, kind: input, shape index: {}]   ;;  %s413_s2 = inlined_call_operand.vmem [shape: f32[1,128], index: 2, kind: input, shape index: {}]   ;;  %s414_s3 = inlined_call_operand.vmem [shape: f32[1,128], index: 3, kind: input, shape index: {}]   ;;  %s415_s5 = inlined_call_operand.vmem [shape: f32[1,128], index: 5, kind: input, shape index: {}]   ;;  %s416_s6 = inlined_call_operand.vmem [shape: f32[1,128], index: 6, kind: input, shape index: {}]   ;;  %s417_s8 = inlined_call_operand.vmem [shape: bf16[1,128], index: 8, kind: output, shape index: {}]  }
   0x1   :  { %v283_v0 = vld [vmem:[%s409_s4 + $0x38] sm:$0xff]  ;;  %v282_v1 = vld [vmem:[%s409_s4 + $0x30] sm:$0xff]  ;;  %v281_v3 = vld [vmem:[%s409_s4 + $0x28] sm:$0xff] }
   0x2   :  { %104 = vmatpush.bf16.msra.mxu0 %v283_v0  ;;  %v291_v2 = vld [vmem:[%s410_s7 + $0x38] sm:$0xff]  ;;  %v29_v4 = vld [vmem:[%s411_s0] sm:$0x1]  ;;  %v290_v6 = vld [vmem:[%s410_s7 + $0x30] sm:$0xff] }
   0x3   :  { %v31_v5 = vld [vmem:[%s412_s1] sm:$0x1]  ;;  %187 = vmatpush.bf16.msra.mxu1 %v291_v2  ;;  %v30_v7 = vunpack.c.l.bf16 %v29_v4  ;;  %v289_v10 = vld [vmem:[%s410_s7 + $0x28] sm:$0xff]  ;;  %v279_v12 = vld [vmem:[%s409_s4 + $0x18] sm:$0xff] }
   0x4   :  { %v32_v8 = vunpack.c.l.bf16 %v31_v5  ;;  %v280_v9 = vld [vmem:[%s409_s4 + $0x20] sm:$0xff]  ;;  %v278_v16 = vld [vmem:[%s409_s4 + $0x10] sm:$0xff]  ;;  %v287_v18 = vld [vmem:[%s410_s7 + $0x18] sm:$0xff] }
   0x5   :  { %v34_v13 = vld [vmem:[%s413_s2] sm:$0x1]  ;;  %v277_v20 = vld [vmem:[%s409_s4 + $0x8] sm:$0xff]  ;;  %v286_v21 = vld [vmem:[%s410_s7 + $0x10] sm:$0xff] }
   0x6   :  { %105 = vmatpush.bf16.msra.mxu0 %v282_v1  ;;  %v33_v11 = vadd.f32 %v32_v8, %v30_v7  ;;  %v288_v14 = vld [vmem:[%s410_s7 + $0x20] sm:$0xff]  ;;  %v285_v25 = vld [vmem:[%s410_s7 + $0x8] sm:$0xff]  ;;  %vm204_vm2 = vmand %vm202_vm0, %vm203_vm1 }
   0x7   :  { %188 = vmatpush.bf16.msra.mxu1 %v290_v6  ;;  %v36_v17 = vld [vmem:[%s414_s3] sm:$0x1] }
   0x8   :  { %v35_v15 = vmul.f32 %v34_v13, %v33_v11  ;;  %v276_v23 = vld [vmem:[%s409_s4] sm:$0xff] }
   0x9   :  { %v284_v26 = vld [vmem:[%s410_s7] sm:$0xff] }
   0xa   :  { %106 = vmatpush.bf16.msra.mxu0 %v281_v3  ;;  %v37_v19 = vadd.f32 %v36_v17, %v35_v15  ;;  %v117_v27 = vld [vmem:[%s415_s5] sm:$0x1] }
   0xb   :  { %189 = vmatpush.bf16.msra.mxu1 %v289_v10  ;;  %v119_v29 = vld [vmem:[%s416_s6] sm:$0x1] }
   0xc   :  { %v38_v22 = vmax.f32 %v37_v19, 0.0  ;;  %v205_v37 = vld [vmem:[%s417_s8] sm:$0x1] }
   0xe   :  { %107 = vmatpush.bf16.msra.mxu0 %v280_v9  ;;  %v39_v24 = vpack.c.bf16 %v38_v22, %v38_v22 }
   0xf   :  { %190 = vmatpush.bf16.msra.mxu1 %v288_v14 }
  0x12   :  { %108 = vmatpush.bf16.msra.mxu0 %v279_v12 }
  0x13   :  { %191 = vmatpush.bf16.msra.mxu1 %v287_v18 }
  0x16   :  { %109 = vmatpush.bf16.msra.mxu0 %v278_v16 }
  0x17   :  { %192 = vmatpush.bf16.msra.mxu1 %v286_v21 }
  0x1a   :  { %110 = vmatpush.bf16.msra.mxu0 %v277_v20 }
  0x1b   :  { %193 = vmatpush.bf16.msra.mxu1 %v285_v25 }
  0x1e   :  { %111 = vmatpush.bf16.msra.mxu0 %v276_v23 }
  0x1f   :  { %194 = vmatpush.bf16.msra.mxu1 %v284_v26 }
  0x21   :  { %112 = vmatmul.bf16.vlgmr.msra.gmra.mxu0 %v39_v24 }
  0x9e   :  { %v113_v28 = vpop.f32.mrf.mxu0 }
  0x9f   :  { %v118_v30 = vmul.f32 %v117_v27, %v113_v28 }
  0xa1   :  { %v120_v31 = vadd.f32 %v119_v29, %v118_v30 }
  0xa3   :  { %v121_v32 = vmax.f32 %v120_v31, 0.0 }
  0xa5   :  { %v122_v33 = vpack.c.bf16 %v121_v32, %v121_v32 }
  0xa6   :  { %v115_v34 = vpop.f32.mrf.mxu0 }
  0xa7   :  { %195 = vmatmul.bf16.vlgmr.msra.gmra.mxu1 %v122_v33 }
 0x124   :  { %v196_v35 = vpop.f32.mrf.mxu1 }
 0x125   :  { %v200_v36 = vadd.f32 %v196_v35, %v33_v11 }
 0x127   :  { %v201_v38 = vpack.c.bf16 %v200_v36, %v200_v36 }
 0x129   :  { %v206_v39 = vsel %vm204_vm2, %v201_v38, %v205_v37 }
 0x12a   :  { %207 = vst [vmem:[%s417_s8] sm:$0x1] %v206_v39 }
 0x12c   :  { %v198_v40 = vpop.f32.mrf.mxu1 }

// kernel: ranet_forward.24
= control target key start
LH: loop header
LB: loop body
LE: loop exit
PB: predicated region body
PF: predicated region fallthrough
CT: control target
= control target key end

     0   :  { %s324_s12 = smov 0   ;;  %s347_s0 = inlined_call_operand.vmem [shape: bf16[2,4,16], index: 0, kind: input, shape index: {}]   ;;  %s348_s1 = inlined_call_operand.vmem [shape: bf16[8,4], index: 1, kind: input, shape index: {}]   ;;  %s349_s2 = inlined_call_operand.vmem [shape: bf16[16,32], index: 2, kind: input, shape index: {}]   ;;  %s350_s3 = inlined_call_operand.vmem [shape: bf16[2,8,32], index: 3, kind: output, shape index: {}]  }
   0x1 LB: > { %s272_s13 = sadd.s32 4294967295, %s302_s12   ;;  %p276_p0 = scmp.ge.s32.totalorder %s302_s12, 1  ;;  %s302_s12 = sphi %s324_s12, %s13_s12  }
   0x2   : > { %p136_p1 = scmp.lt.s32.totalorder %s302_s12, 3 }
   0x4   : > { %p137_p2 = pnand %p276_p0, %p136_p1 }
   0x5   : > { %p158_p3 = scmp.lt.s32.totalorder (!%p137_p2), %s272_s13, 1 }
   0x6   : > { %140 = sbr.rel (%p137_p2) target bundleno = 281 (0x119), region = 32 }
   0xb   : > { %s352_s13 = smov (!%p158_p3, %s272_s13), 1  ;;  %vm173_vm0 = vcmask 1041408   ;;  %v168_v2 = vld [vmem:[%s348_s1] sm:$0xf]  ;;  %vm169_vm1 = vcmask 31744   ;;  %vm199_vm2 = vcmask 130048  }
   0xc   : > { %s277_s14 = sshll.u32 %s352_s13, 1  ;;  %v287_v3 = vld [vmem:[%s349_s2] sm:$0xff]  ;;  %s278_s22 = sshll.u32 %s352_s13, 2  ;;  %vm217_vm3 = vcmask 257024  }
   0xd   : > { %s161_s17 = scalar_lea.vmem %s347_s0, %s277_s14  ;;  %210 = vmatpush.bf16.msra.mxu1 %v287_v3  ;;  %s165_s25 = scalar_lea.vmem %s350_s3, %s278_s22 }
   0xe   : > { %v167_v0 = vld [vmem:[%s161_s17] sm:$0x3] }
   0xf   : > { %v175_v1 = vsel %vm173_vm0, %v167_v0, 0 }
  0x10   : > { %184 = vmatpush.bf16.msra.mxu0 %v175_v1 }
  0x13   : > { %279 = vmatmul.msk.bf16.vlgmr.msra.gmra.mxu0 %vm169_vm1, %v168_v2 }
  0x90   : > { %v186_v4 = vpop.f32.mrf.mxu0 }
  0x91   : > { %v190_v5 = vpack.c.bf16 %v186_v4, %v186_v4 }
  0x93   : > { %284 = vmatmul.msk.bf16.vlgmr.msra.gmra.mxu1 %vm199_vm2, %v190_v5 }
  0x98   : > { %v188_v6 = vpop.f32.mrf.mxu0 }
 0x110   : > { %v212_v7 = vpop.f32.mrf.mxu1 }
 0x111   : > { %v216_v8 = vpack.c.bf16 %v212_v7, %v212_v7 }
 0x113   : > { %218 = vst.msk [vmem:[%s165_s25] sm:$0xf] %vm217_vm3, %v216_v8 }
 0x118   : > { %v214_v9 = vpop.f32.mrf.mxu1 }
 0x119 PF: > { %s13_s12 = sadd.s32 1, %s302_s12  }
 0x11a   : > { %p10_p4 = scmp.ge.s32.totalorder %s13_s12, 4  }
 0x11c   :  { %12 = sbr.rel (!%p10_p4) target bundleno = 1 (0x1), region = 62 }

// kernel: ranet_forward.25
= control target key start
LH: loop header
LB: loop body
LE: loop exit
PB: predicated region body
PF: predicated region fallthrough
CT: control target
= control target key end

     0   :  { %s417_s4 = inlined_call_operand.vmem [shape: bf16[128,128], index: 4, kind: input, shape index: {}]   ;;  %s418_s7 = inlined_call_operand.vmem [shape: bf16[128,128], index: 7, kind: input, shape index: {}]   ;;  %s419_s0 = inlined_call_operand.vmem [shape: bf16[4,128], index: 0, kind: input, shape index: {}]   ;;  %s420_s2 = inlined_call_operand.vmem [shape: f32[1,128], index: 2, kind: input, shape index: {}]   ;;  %s421_s1 = inlined_call_operand.vmem [shape: bf16[4,128], index: 1, kind: input, shape index: {}]   ;;  %s422_s3 = inlined_call_operand.vmem [shape: f32[1,128], index: 3, kind: input, shape index: {}]   ;;  %s423_s5 = inlined_call_operand.vmem [shape: f32[1,128], index: 5, kind: input, shape index: {}]   ;;  %s424_s6 = inlined_call_operand.vmem [shape: f32[1,128], index: 6, kind: input, shape index: {}]   ;;  %s425_s8 = inlined_call_operand.vmem [shape: bf16[4,128], index: 8, kind: output, shape index: {}]  }
   0x1   :  { %v290_v0 = vld [vmem:[%s417_s4 + $0x38] sm:$0xff]  ;;  %v289_v1 = vld [vmem:[%s417_s4 + $0x30] sm:$0xff]  ;;  %v288_v3 = vld [vmem:[%s417_s4 + $0x28] sm:$0xff] }
   0x2   :  { %110 = vmatpush.bf16.msra.mxu0 %v290_v0  ;;  %v298_v2 = vld [vmem:[%s418_s7 + $0x38] sm:$0xff]  ;;  %v29_v4 = vld [vmem:[%s419_s0] sm:$0x3]  ;;  %v297_v6 = vld [vmem:[%s418_s7 + $0x30] sm:$0xff] }
   0x3   :  { %v31_v5 = vld [vmem:[%s421_s1] sm:$0x3]  ;;  %199 = vmatpush.bf16.msra.mxu1 %v298_v2  ;;  %v30_v7 = vunpack.c.l.bf16 %v29_v4  ;;  %v296_v10 = vld [vmem:[%s418_s7 + $0x28] sm:$0xff]  ;;  %v286_v13 = vld [vmem:[%s417_s4 + $0x18] sm:$0xff] }
   0x4   :  { %v32_v8 = vunpack.c.l.bf16 %v31_v5  ;;  %v287_v9 = vld [vmem:[%s417_s4 + $0x20] sm:$0xff]  ;;  %v285_v17 = vld [vmem:[%s417_s4 + $0x10] sm:$0xff]  ;;  %v294_v18 = vld [vmem:[%s418_s7 + $0x18] sm:$0xff] }
   0x5   :  { %v299_v12 = vld [vmem:[%s420_s2] ss:$0 sm:$0xff]  ;;  %v284_v20 = vld [vmem:[%s417_s4 + $0x8] sm:$0xff]  ;;  %v293_v21 = vld [vmem:[%s418_s7 + $0x10] sm:$0xff] }
   0x6   :  { %111 = vmatpush.bf16.msra.mxu0 %v289_v1  ;;  %v33_v11 = vadd.f32 %v32_v8, %v30_v7  ;;  %v295_v14 = vld [vmem:[%s418_s7 + $0x20] sm:$0xff]  ;;  %v292_v25 = vld [vmem:[%s418_s7 + $0x8] sm:$0xff] }
   0x7   :  { %200 = vmatpush.bf16.msra.mxu1 %v297_v6  ;;  %v300_v16 = vld [vmem:[%s422_s3] ss:$0 sm:$0xff] }
   0x8   :  { %v38_v15 = vmul.f32 %v299_v12, %v33_v11  ;;  %v283_v23 = vld [vmem:[%s417_s4] sm:$0xff] }
   0x9   :  { %v291_v26 = vld [vmem:[%s418_s7] sm:$0xff] }
   0xa   :  { %112 = vmatpush.bf16.msra.mxu0 %v288_v3  ;;  %v43_v19 = vadd.f32 %v300_v16, %v38_v15  ;;  %v301_v27 = vld [vmem:[%s423_s5] ss:$0 sm:$0xff] }
   0xb   :  { %201 = vmatpush.bf16.msra.mxu1 %v296_v10  ;;  %v302_v28 = vld [vmem:[%s424_s6] ss:$0 sm:$0xff] }
   0xc   :  { %v44_v22 = vmax.f32 %v43_v19, 0.0 }
   0xe   :  { %113 = vmatpush.bf16.msra.mxu0 %v287_v9  ;;  %v45_v24 = vpack.c.bf16 %v44_v22, %v44_v22 }
   0xf   :  { %202 = vmatpush.bf16.msra.mxu1 %v295_v14 }
  0x12   :  { %114 = vmatpush.bf16.msra.mxu0 %v286_v13 }
  0x13   :  { %203 = vmatpush.bf16.msra.mxu1 %v294_v18 }
  0x16   :  { %115 = vmatpush.bf16.msra.mxu0 %v285_v17 }
  0x17   :  { %204 = vmatpush.bf16.msra.mxu1 %v293_v21 }
  0x1a   :  { %116 = vmatpush.bf16.msra.mxu0 %v284_v20 }
  0x1b   :  { %205 = vmatpush.bf16.msra.mxu1 %v292_v25 }
  0x1e   :  { %117 = vmatpush.bf16.msra.mxu0 %v283_v23 }
  0x1f   :  { %206 = vmatpush.bf16.msra.mxu1 %v291_v26 }
  0x21   :  { %118 = vmatmul.bf16.vlgmr.msra.gmra.mxu0 %v45_v24 }
  0x9e   :  { %v119_v29 = vpop.f32.mrf.mxu0 }
  0x9f   :  { %v127_v30 = vmul.f32 %v301_v27, %v119_v29 }
  0xa1   :  { %v132_v31 = vadd.f32 %v302_v28, %v127_v30 }
  0xa3   :  { %v133_v32 = vmax.f32 %v132_v31, 0.0 }
  0xa5   :  { %v134_v33 = vpack.c.bf16 %v133_v32, %v133_v32 }
  0xa6   :  { %v121_v34 = vpop.f32.mrf.mxu0 }
  0xa7   :  { %207 = vmatmul.bf16.vlgmr.msra.gmra.mxu1 %v134_v33 }
 0x124   :  { %v208_v35 = vpop.f32.mrf.mxu1 }
 0x125   :  { %v212_v36 = vadd.f32 %v208_v35, %v33_v11 }
 0x127   :  { %v213_v37 = vpack.c.bf16 %v212_v36, %v212_v36 }
 0x129   :  { %214 = vst [vmem:[%s425_s8] sm:$0x3] %v213_v37 }
 0x12c   :  { %v210_v38 = vpop.f32.mrf.mxu1 }

// kernel: ranet_forward.26
= control target key start
LH: loop header
LB: loop body
LE: loop exit
PB: predicated region body
PF: predicated region fallthrough
CT: control target
= control target key end

     0   :  { %s358_s12 = smov 0   ;;  %s384_s0 = inlined_call_operand.vmem [shape: bf16[2,8,32], index: 0, kind: input, shape index: {}]   ;;  %s385_s1 = inlined_call_operand.vmem [shape: bf16[16,8], index: 1, kind: input, shape index: {}]   ;;  %s386_s2 = inlined_call_operand.vmem [shape: bf16[32,64], index: 2, kind: input, shape index: {}]   ;;  %s387_s3 = inlined_call_operand.vmem [shape: bf16[2,16,64], index: 3, kind: output, shape index: {}]  }
   0x1 LB: > { %s294_s13 = sadd.s32 4294967295, %s336_s12   ;;  %p298_p0 = scmp.ge.s32.totalorder %s336_s12, 1  ;;  %s336_s12 = sphi %s358_s12, %s13_s12  }
   0x2   : > { %p136_p1 = scmp.lt.s32.totalorder %s336_s12, 3 }
   0x4   : > { %p137_p2 = pnand %p298_p0, %p136_p1 }
   0x5   : > { %p159_p3 = scmp.lt.s32.totalorder (!%p137_p2), %s294_s13, 1 }
   0x6   : > { %140 = sbr.rel (%p137_p2) target bundleno = 292 (0x124), region = 32 }
   0xb   : > { %s389_s13 = smov (!%p159_p3, %s294_s13), 1  ;;  %vm181_vm0 = vcmask 1043456   ;;  %v319_v2 = vld [vmem:[%s385_s1] sm:$0xff]  ;;  %vm177_vm1 = vcmask 64512   ;;  %v321_v3 = vld [vmem:[%s386_s2 + $0x8] sm:$0xff]  ;;  %vm216_vm2 = vcmask 261120  }
   0xc   : > { %s299_s14 = sshll.u32 %s389_s13, 2  ;;  %226 = vmatpush.bf16.msra.mxu1 %v321_v3  ;;  %v320_v4 = vld [vmem:[%s386_s2] sm:$0xff]  ;;  %s318_s24 = sshll.u32 %s389_s13, 3  ;;  %vm236_vm3 = vcmask 519168  }
   0xd   : > { %s162_s17 = scalar_lea.vmem %s384_s0, %s299_s14  ;;  %s167_s27 = scalar_lea.vmem %s387_s3, %s318_s24 }
   0xe   : > { %v169_v0 = vld [vmem:[%s162_s17] sm:$0xf] }
   0xf   : > { %v183_v1 = vsel %vm181_vm0, %v169_v0, 0 }
  0x10   : > { %192 = vmatpush.bf16.msra.mxu0 %v183_v1  ;;  %227 = vmatpush.bf16.msra.mxu1 %v320_v4 }
  0x13   : > { %306 = vmatmul.msk.bf16.vlgmr.msra.gmra.mxu0 %vm177_vm1, %v319_v2 }
  0x90   : > { %v194_v5 = vpop.f32.mrf.mxu0 }
  0x98   : > { %v196_v6 = vpop.f32.mrf.mxu0 }
  0x99   : > { %v199_v7 = vpack.c.bf16 %v196_v6, %v194_v5 }
  0x9b   : > { %315 = vmatmul.msk.bf16.vlgmr.msra.gmra.mxu1 %vm216_vm2, %v199_v7 }
 0x118   : > { %v229_v8 = vpop.f32.mrf.mxu1 }
 0x119   : > { %v234_v9 = vpack.c.bf16 %v229_v8, %v229_v8 }
 0x11b   : > { %237 = vst.msk [vmem:[%s167_s27] sm:$0xf] %vm236_vm3, %v234_v9 }
 0x120   : > { %v231_v10 = vpop.f32.mrf.mxu1 }
 0x121   : > { %v235_v11 = vpack.c.bf16 %v231_v10, %v231_v10 }
 0x123   : > { %238 = vst.msk [vmem:[%s167_s27 + $0x4] sm:$0xf] %vm236_vm3, %v235_v11 }
 0x124 PF: > { %s13_s12 = sadd.s32 1, %s336_s12  }
 0x125   : > { %p10_p4 = scmp.ge.s32.totalorder %s13_s12, 4  }
 0x127   :  { %12 = sbr.rel (!%p10_p4) target bundleno = 1 (0x1), region = 62 }

// kernel: ranet_forward.15
= control target key start
LH: loop header
LB: loop body
LE: loop exit
PB: predicated region body
PF: predicated region fallthrough
CT: control target
= control target key end

     0   :  { %s1114_s25 = smov 0   ;;  %s1265_s0 = inlined_call_operand.vmem [shape: bf16[16,128], index: 0, kind: input, shape index: {}]   ;;  %s1266_s1 = inlined_call_operand.vmem [shape: f32[1,128], index: 1, kind: input, shape index: {}]   ;;  %s1267_s2 = inlined_call_operand.vmem [shape: f32[1,128], index: 2, kind: input, shape index: {}]   ;;  %s1268_s3 = inlined_call_operand.vmem [shape: bf16[128,128], index: 3, kind: input, shape index: {}]   ;;  %s1269_s4 = inlined_call_operand.vmem [shape: f32[1,128], index: 4, kind: input, shape index: {}]   ;;  %s1270_s5 = inlined_call_operand.vmem [shape: f32[1,128], index: 5, kind: input, shape index: {}]   ;;  %s1271_s6 = inlined_call_operand.vmem [shape: bf16[128,128], index: 6, kind: input, shape index: {}]   ;;  %s1272_s7 = inlined_call_operand.vmem [shape: f32[1,128], index: 7, kind: input, shape index: {}]   ;;  %s1273_s8 = inlined_call_operand.vmem [shape: f32[1,128], index: 8, kind: input, shape index: {}]   ;;  %s1274_s9 = inlined_call_operand.vmem [shape: bf16[128,128], index: 9, kind: input, shape index: {}]   ;;  %s1275_s10 = inlined_call_operand.vmem [shape: f32[1,128], index: 10, kind: input, shape index: {}]   ;;  %s1276_s11 = inlined_call_operand.vmem [shape: f32[1,128], index: 11, kind: input, shape index: {}]   ;;  %s1277_s12 = inlined_call_operand.vmem [shape: bf16[128,128], index: 12, kind: input, shape index: {}]   ;;  %s1278_s13 = inlined_call_operand.vmem [shape: bf16[16,128], index: 13, kind: output, shape index: {}]  }
   0x1 LB: > { %s851_s26 = sadd.s32 4294967295, %s1042_s25   ;;  %p855_p0 = scmp.ge.s32.totalorder %s1042_s25, 1  ;;  %s1042_s25 = sphi %s1114_s25, %s23_s25  }
   0x2   : > { %p386_p1 = scmp.lt.s32.totalorder %s1042_s25, 3 }
   0x4   : > { %p387_p2 = pnand %p855_p0, %p386_p1 }
   0x5   : > { %p428_p3 = scmp.lt.s32.totalorder (!%p387_p2), %s851_s26, 1 }
   0x6   : > { %390 = sbr.rel (%p387_p2) target bundleno = 593 (0x251), region = 72 }
   0xb   : > { %v995_v0 = vld [vmem:[%s1268_s3 + $0x38] sm:$0xff]  ;;  %v994_v1 = vld [vmem:[%s1268_s3 + $0x30] sm:$0xff]  ;;  %s1280_s26 = smov (!%p428_p3, %s851_s26), 1  ;;  %v993_v3 = vld [vmem:[%s1268_s3 + $0x28] sm:$0xff] }
   0xc   : > { %514 = vmatpush.bf16.msra.mxu0 %v995_v0  ;;  %s856_s14 = sshll.u32 %s1280_s26, 2  ;;  %v1003_v2 = vld [vmem:[%s1271_s6 + $0x38] sm:$0xff]  ;;  %v1002_v4 = vld [vmem:[%s1271_s6 + $0x30] sm:$0xff]  ;;  %v992_v5 = vld [vmem:[%s1268_s3 + $0x20] sm:$0xff] }
   0xd   : > { %603 = vmatpush.bf16.msra.mxu1 %v1003_v2  ;;  %s431_s23 = scalar_lea.vmem %s1265_s0, %s856_s14  ;;  %v1001_v7 = vld [vmem:[%s1271_s6 + $0x28] sm:$0xff]  ;;  %v1028_v9 = vld [vmem:[%s1266_s1] ss:$0 sm:$0xff]  ;;  %v991_v10 = vld [vmem:[%s1268_s3 + $0x18] sm:$0xff]  ;;  %s435_s28 = scalar_lea.vmem %s1278_s13, %s856_s14 }
   0xe   : > { %v1148_v6 = vld [vmem:[%s431_s23] sm:$0xf]  ;;  %v990_v14 = vld [vmem:[%s1268_s3 + $0x10] sm:$0xff]  ;;  %v999_v15 = vld [vmem:[%s1271_s6 + $0x18] sm:$0xff] }
   0xf   : > { %v437_v8 = vunpack.c.l.bf16 %v1148_v6  ;;  %v1000_v11 = vld [vmem:[%s1271_s6 + $0x20] sm:$0xff]  ;;  %v989_v17 = vld [vmem:[%s1268_s3 + $0x8] sm:$0xff]  ;;  %v998_v18 = vld [vmem:[%s1271_s6 + $0x10] sm:$0xff] }
  0x10   : > { %515 = vmatpush.bf16.msra.mxu0 %v994_v1  ;;  %v1029_v13 = vld [vmem:[%s1267_s2] ss:$0 sm:$0xff]  ;;  %v997_v22 = vld [vmem:[%s1271_s6 + $0x8] sm:$0xff]  ;;  %v1011_v24 = vld [vmem:[%s1274_s9 + $0x38] sm:$0xff] }
  0x11   : > { %604 = vmatpush.bf16.msra.mxu1 %v1002_v4  ;;  %v442_v12 = vmul.f32 %v1028_v9, %v437_v8  ;;  %v988_v20 = vld [vmem:[%s1268_s3] sm:$0xff]  ;;  %693 = vmatpush.bf16.msra.mxu2 %v1011_v24  ;;  %v1010_v25 = vld [vmem:[%s1274_s9 + $0x30] sm:$0xff]  ;;  %v1009_v26 = vld [vmem:[%s1274_s9 + $0x28] sm:$0xff] }
  0x12   : > { %v996_v23 = vld [vmem:[%s1271_s6] sm:$0xff]  ;;  %v1007_v28 = vld [vmem:[%s1274_s9 + $0x18] sm:$0xff]  ;;  %v1006_v37 = vld [vmem:[%s1274_s9 + $0x10] sm:$0xff] }
  0x13   : > { %v447_v16 = vadd.f32 %v1029_v13, %v442_v12  ;;  %v1008_v27 = vld [vmem:[%s1274_s9 + $0x20] sm:$0xff]  ;;  %v1005_v38 = vld [vmem:[%s1274_s9 + $0x8] sm:$0xff]  ;;  %v1019_v40 = vld [vmem:[%s1277_s12 + $0x38] sm:$0xff] }
  0x14   : > { %516 = vmatpush.bf16.msra.mxu0 %v993_v3  ;;  %v1030_v29 = vld [vmem:[%s1269_s4] ss:$0 sm:$0xff]  ;;  %782 = vmatpush.bf16.msra.mxu3 %v1019_v40  ;;  %v1018_v41 = vld [vmem:[%s1277_s12 + $0x30] sm:$0xff]  ;;  %v1017_v42 = vld [vmem:[%s1277_s12 + $0x28] sm:$0xff] }
  0x15   : > { %605 = vmatpush.bf16.msra.mxu1 %v1001_v7  ;;  %v448_v19 = vmax.f32 %v447_v16, 0.0  ;;  %694 = vmatpush.bf16.msra.mxu2 %v1010_v25  ;;  %v1031_v30 = vld [vmem:[%s1270_s5] ss:$0 sm:$0xff]  ;;  %v1015_v44 = vld [vmem:[%s1277_s12 + $0x18] sm:$0xff]  ;;  %v1014_v45 = vld [vmem:[%s1277_s12 + $0x10] sm:$0xff] }
  0x16   : > { %v1004_v39 = vld [vmem:[%s1274_s9] sm:$0xff]  ;;  %v1013_v55 = vld [vmem:[%s1277_s12 + $0x8] sm:$0xff] }
  0x17   : > { %v449_v21 = vpack.c.bf16 %v448_v19, %v448_v19  ;;  %v1016_v43 = vld [vmem:[%s1277_s12 + $0x20] sm:$0xff] }
  0x18   : > { %517 = vmatpush.bf16.msra.mxu0 %v992_v5  ;;  %783 = vmatpush.bf16.msra.mxu3 %v1018_v41  ;;  %v1032_v46 = vld [vmem:[%s1272_s7] ss:$0 sm:$0xff] }
  0x19   : > { %606 = vmatpush.bf16.msra.mxu1 %v1000_v11  ;;  %695 = vmatpush.bf16.msra.mxu2 %v1009_v26  ;;  %v1033_v49 = vld [vmem:[%s1273_s8] ss:$0 sm:$0xff] }
  0x1a   : > { %v1012_v56 = vld [vmem:[%s1277_s12] sm:$0xff] }
  0x1b   : > { %v1034_v57 = vld [vmem:[%s1275_s10] ss:$0 sm:$0xff] }
  0x1c   : > { %518 = vmatpush.bf16.msra.mxu0 %v991_v10  ;;  %784 = vmatpush.bf16.msra.mxu3 %v1017_v42  ;;  %v1035_v58 = vld [vmem:[%s1276_s11] ss:$0 sm:$0xff] }
  0x1d   : > { %607 = vmatpush.bf16.msra.mxu1 %v999_v15  ;;  %696 = vmatpush.bf16.msra.mxu2 %v1008_v27 }
  0x20   : > { %519 = vmatpush.bf16.msra.mxu0 %v990_v14  ;;  %785 = vmatpush.bf16.msra.mxu3 %v1016_v43 }
  0x21   : > { %608 = vmatpush.bf16.msra.mxu1 %v998_v18  ;;  %697 = vmatpush.bf16.msra.mxu2 %v1007_v28 }
  0x24   : > { %520 = vmatpush.bf16.msra.mxu0 %v989_v17  ;;  %786 = vmatpush.bf16.msra.mxu3 %v1015_v44 }
  0x25   : > { %609 = vmatpush.bf16.msra.mxu1 %v997_v22  ;;  %698 = vmatpush.bf16.msra.mxu2 %v1006_v37 }
  0x28   : > { %521 = vmatpush.bf16.msra.mxu0 %v988_v20  ;;  %787 = vmatpush.bf16.msra.mxu3 %v1014_v45 }
  0x29   : > { %610 = vmatpush.bf16.msra.mxu1 %v996_v23  ;;  %699 = vmatpush.bf16.msra.mxu2 %v1005_v38 }
  0x2b   : > { %522 = vmatmul.bf16.vlgmr.msra.gmra.mxu0 %v449_v21 }
  0x2c   : > { %788 = vmatpush.bf16.msra.mxu3 %v1013_v55 }
  0x2d   : > { %700 = vmatpush.bf16.msra.mxu2 %v1004_v39 }
  0x30   : > { %789 = vmatpush.bf16.msra.mxu3 %v1012_v56 }
  0xa8   : > { %v523_v31 = vpop.f32.mrf.mxu0 }
  0xa9   : > { %v531_v32 = vmul.f32 %v1030_v29, %v523_v31 }
  0xab   : > { %v536_v33 = vadd.f32 %v1031_v30, %v531_v32 }
  0xad   : > { %v537_v34 = vmax.f32 %v536_v33, 0.0 }
  0xaf   : > { %v538_v35 = vpack.c.bf16 %v537_v34, %v537_v34 }
  0xb0   : > { %v525_v36 = vpop.f32.mrf.mxu0 }
  0xb1   : > { %611 = vmatmul.bf16.vlgmr.msra.gmra.mxu1 %v538_v35 }
 0x12e   : > { %v612_v47 = vpop.f32.mrf.mxu1 }
 0x12f   : > { %v616_v48 = vadd.f32 %v612_v47, %v437_v8 }
 0x131   : > { %v621_v50 = vmul.f32 %v1032_v46, %v616_v48 }
 0x133   : > { %v626_v51 = vadd.f32 %v1033_v49, %v621_v50 }
 0x135   : > { %v627_v52 = vmax.f32 %v626_v51, 0.0 }
 0x136   : > { %v614_v53 = vpop.f32.mrf.mxu1 }
 0x137   : > { %v628_v54 = vpack.c.bf16 %v627_v52, %v627_v52 }
 0x139   : > { %701 = vmatmul.bf16.vlgmr.msra.gmra.mxu2 %v628_v54 }
 0x1bc   : > { %v702_v59 = vpop.f32.mrf.mxu2 }
 0x1bd   : > { %v710_v60 = vmul.f32 %v1034_v57, %v702_v59 }
 0x1bf   : > { %v715_v61 = vadd.f32 %v1035_v58, %v710_v60 }
 0x1c1   : > { %v716_v62 = vmax.f32 %v715_v61, 0.0 }
 0x1c3   : > { %v717_v63 = vpack.c.bf16 %v716_v62, %v716_v62 }
 0x1c4   : > { %v704_v0 = vpop.f32.mrf.mxu2 }
 0x1c5   : > { %790 = vmatmul.bf16.vlgmr.msra.gmra.mxu3 %v717_v63 }
 0x248   : > { %v791_v1 = vpop.f32.mrf.mxu3 }
 0x249   : > { %v795_v2 = vadd.f32 %v791_v1, %v616_v48 }
 0x24b   : > { %v796_v3 = vpack.c.bf16 %v795_v2, %v795_v2 }
 0x24d   : > { %797 = vst [vmem:[%s435_s28] sm:$0xf] %v796_v3 }
 0x250   : > { %v793_v4 = vpop.f32.mrf.mxu3 }
 0x251 PF: > { %s23_s25 = sadd.s32 1, %s1042_s25  }
 0x252   : > { %p20_p4 = scmp.ge.s32.totalorder %s23_s25, 4  }
 0x254   :  { %22 = sbr.rel (!%p20_p4) target bundleno = 1 (0x1), region = 102 }

// kernel: ranet_forward.27
= control target key start
LH: loop header
LB: loop body
LE: loop exit
PB: predicated region body
PF: predicated region fallthrough
CT: control target
= control target key end

     0   :  { %s1280_s25 = smov 0   ;;  %s1428_s0 = inlined_call_operand.vmem [shape: bf16[16,128], index: 0, kind: input, shape index: {}]   ;;  %s1429_s1 = inlined_call_operand.vmem [shape: bf16[16,128], index: 1, kind: input, shape index: {}]   ;;  %s1430_s2 = inlined_call_operand.vmem [shape: f32[1,128], index: 2, kind: input, shape index: {}]   ;;  %s1431_s3 = inlined_call_operand.vmem [shape: f32[1,128], index: 3, kind: input, shape index: {}]   ;;  %s1432_s4 = inlined_call_operand.vmem [shape: bf16[128,128], index: 4, kind: input, shape index: {}]   ;;  %s1433_s5 = inlined_call_operand.vmem [shape: f32[1,128], index: 5, kind: input, shape index: {}]   ;;  %s1434_s6 = inlined_call_operand.vmem [shape: f32[1,128], index: 6, kind: input, shape index: {}]   ;;  %s1435_s7 = inlined_call_operand.vmem [shape: bf16[128,128], index: 7, kind: input, shape index: {}]   ;;  %s1436_s8 = inlined_call_operand.vmem [shape: f32[1,128], index: 8, kind: input, shape index: {}]   ;;  %s1437_s9 = inlined_call_operand.vmem [shape: f32[1,128], index: 9, kind: input, shape index: {}]   ;;  %s1438_s10 = inlined_call_operand.vmem [shape: bf16[128,128], index: 10, kind: input, shape index: {}]   ;;  %s1439_s11 = inlined_call_operand.vmem [shape: f32[1,128], index: 11, kind: input, shape index: {}]   ;;  %s1440_s12 = inlined_call_operand.vmem [shape: f32[1,128], index: 12, kind: input, shape index: {}]   ;;  %s1441_s13 = inlined_call_operand.vmem [shape: bf16[128,128], index: 13, kind: input, shape index: {}]   ;;  %s1442_s14 = inlined_call_operand.<no memory space> [shape: f32[1], index: 14, kind: input, shape index: {}]   ;;  %s1443_s15 = inlined_call_operand.<no memory space> [shape: f32[1], index: 15, kind: input, shape index: {}]   ;;  %s1444_s16 = inlined_call_operand.vmem [shape: f32[16,128], index: 16, kind: output, shape index: {}]  }
   0x1   :  { %1445 = sst [smem:[#allocation4_spill]] %s1428_s0 }
   0x2   :  { %21 = sst [smem:[#allocation2]] %s1442_s14 }
   0x3   :  { %22 = sst [smem:[#allocation3]] %s1443_s15 }
   0x4 LB: > { %s990_s26 = sadd.s32 4294967295, %s1187_s25   ;;  %p994_p0 = scmp.ge.s32.totalorder %s1187_s25, 1  ;;  %s1187_s25 = sphi %s1280_s25, %s28_s25  }
   0x5   : > { %p472_p1 = scmp.lt.s32.totalorder %s1187_s25, 3 }
   0x7   : > { %p473_p2 = pnand %p994_p0, %p472_p1 }
   0x8   : > { %p524_p3 = scmp.lt.s32.totalorder (!%p473_p2), %s990_s26, 1  ;;  %s1446_s23 = sld [smem:[#allocation4_spill]] (!%p473_p2) }
   0x9   : > { %476 = sbr.rel (%p473_p2) target bundleno = 628 (0x274), region = 84  ;;  %s741_s21 = sld [smem:[#allocation3]] (!%p473_p2) }
   0xa   : > { %s737_s14 = sld [smem:[#allocation2]] (!%p473_p2) }
   0xe   : > { %v1136_v0 = vld [vmem:[%s1432_s4 + $0x38] sm:$0xff]  ;;  %v1135_v1 = vld [vmem:[%s1432_s4 + $0x30] sm:$0xff]  ;;  %s1448_s26 = smov (!%p524_p3, %s990_s26), 1  ;;  %v1134_v3 = vld [vmem:[%s1432_s4 + $0x28] sm:$0xff] }
   0xf   : > { %616 = vmatpush.bf16.msra.mxu0 %v1136_v0  ;;  %s995_s29 = sshll.u32 %s1448_s26, 2  ;;  %v1144_v2 = vld [vmem:[%s1435_s7 + $0x38] sm:$0xff]  ;;  %v1143_v4 = vld [vmem:[%s1435_s7 + $0x30] sm:$0xff]  ;;  %v1133_v5 = vld [vmem:[%s1432_s4 + $0x20] sm:$0xff]  ;;  %v742_v60 = vstv %s741_s21  ;;  %s997_s30 = sshll.u32 %s1448_s26, 3 }
  0x10   : > { %705 = vmatpush.bf16.msra.mxu1 %v1144_v2  ;;  %s527_s24 = scalar_lea.vmem %s1446_s23, %s995_s29  ;;  %v1142_v7 = vld [vmem:[%s1435_s7 + $0x28] sm:$0xff]  ;;  %v1169_v9 = vld [vmem:[%s1430_s2] ss:$0 sm:$0xff]  ;;  %v1132_v10 = vld [vmem:[%s1432_s4 + $0x18] sm:$0xff]  ;;  %v739_v63 = vstv %s737_s14  ;;  %s535_s17 = scalar_lea.vmem %s1444_s16, %s997_s30 }
  0x11   : > { %v538_v6 = vld [vmem:[%s527_s24] sm:$0xf]  ;;  %v1131_v14 = vld [vmem:[%s1432_s4 + $0x10] sm:$0xff]  ;;  %v1140_v15 = vld [vmem:[%s1435_s7 + $0x18] sm:$0xff]  ;;  %s531_s24 = scalar_lea.vmem %s1429_s1, %s995_s29 }
  0x12   : > { %v539_v8 = vunpack.c.l.bf16 %v538_v6  ;;  %v1141_v11 = vld [vmem:[%s1435_s7 + $0x20] sm:$0xff]  ;;  %v1130_v17 = vld [vmem:[%s1432_s4 + $0x8] sm:$0xff]  ;;  %v1139_v18 = vld [vmem:[%s1435_s7 + $0x10] sm:$0xff] }
  0x13   : > { %617 = vmatpush.bf16.msra.mxu0 %v1135_v1  ;;  %v1170_v13 = vld [vmem:[%s1431_s3] ss:$0 sm:$0xff]  ;;  %v1138_v22 = vld [vmem:[%s1435_s7 + $0x8] sm:$0xff]  ;;  %v1152_v32 = vld [vmem:[%s1438_s10 + $0x38] sm:$0xff] }
  0x14   : > { %706 = vmatpush.bf16.msra.mxu1 %v1143_v4  ;;  %v544_v12 = vmul.f32 %v1169_v9, %v539_v8  ;;  %v1129_v20 = vld [vmem:[%s1432_s4] sm:$0xff]  ;;  %821 = vmatpush.bf16.msra.mxu2 %v1152_v32  ;;  %v1151_v33 = vld [vmem:[%s1438_s10 + $0x30] sm:$0xff]  ;;  %v1150_v34 = vld [vmem:[%s1438_s10 + $0x28] sm:$0xff] }
  0x15   : > { %v1137_v23 = vld [vmem:[%s1435_s7] sm:$0xff]  ;;  %v1148_v36 = vld [vmem:[%s1438_s10 + $0x18] sm:$0xff]  ;;  %v1147_v37 = vld [vmem:[%s1438_s10 + $0x10] sm:$0xff] }
  0x16   : > { %v549_v16 = vadd.f32 %v1170_v13, %v544_v12  ;;  %v1171_v24 = vld [vmem:[%s1433_s5] ss:$0 sm:$0xff]  ;;  %v1146_v39 = vld [vmem:[%s1438_s10 + $0x8] sm:$0xff]  ;;  %v1160_v45 = vld [vmem:[%s1441_s13 + $0x38] sm:$0xff] }
  0x17   : > { %618 = vmatpush.bf16.msra.mxu0 %v1134_v3  ;;  %v1172_v25 = vld [vmem:[%s1434_s6] ss:$0 sm:$0xff]  ;;  %910 = vmatpush.bf16.msra.mxu3 %v1160_v45  ;;  %v1159_v46 = vld [vmem:[%s1441_s13 + $0x30] sm:$0xff]  ;;  %v1158_v47 = vld [vmem:[%s1441_s13 + $0x28] sm:$0xff] }
  0x18   : > { %707 = vmatpush.bf16.msra.mxu1 %v1142_v7  ;;  %v550_v19 = vmax.f32 %v549_v16, 0.0  ;;  %822 = vmatpush.bf16.msra.mxu2 %v1151_v33  ;;  %v1149_v35 = vld [vmem:[%s1438_s10 + $0x20] sm:$0xff]  ;;  %v1156_v58 = vld [vmem:[%s1441_s13 + $0x18] sm:$0xff]  ;;  %v1155_v2 = vld [vmem:[%s1441_s13 + $0x10] sm:$0xff] }
  0x19   : > { %v1145_v41 = vld [vmem:[%s1438_s10] sm:$0xff] }
  0x1a   : > { %v551_v21 = vpack.c.bf16 %v550_v19, %v550_v19  ;;  %v1157_v51 = vld [vmem:[%s1441_s13 + $0x20] sm:$0xff] }
  0x1b   : > { %619 = vmatpush.bf16.msra.mxu0 %v1133_v5  ;;  %911 = vmatpush.bf16.msra.mxu3 %v1159_v46  ;;  %v536_v52 = vld [vmem:[%s531_s24] sm:$0xf] }
  0x1c   : > { %708 = vmatpush.bf16.msra.mxu1 %v1141_v11  ;;  %823 = vmatpush.bf16.msra.mxu2 %v1150_v34  ;;  %v537_v56 = vunpack.c.l.bf16 %v536_v52  ;;  %v1173_v4 = vld [vmem:[%s1436_s8] ss:$0 sm:$0xff]  ;;  %v1154_v11 = vld [vmem:[%s1441_s13 + $0x8] sm:$0xff] }
  0x1d   : > { %v1174_v6 = vld [vmem:[%s1437_s9] ss:$0 sm:$0xff] }
  0x1e   : > { %v743_v1 = vmul.f32 %v742_v60, %v537_v56  ;;  %v1153_v12 = vld [vmem:[%s1441_s13] sm:$0xff] }
  0x1f   : > { %620 = vmatpush.bf16.msra.mxu0 %v1132_v10  ;;  %912 = vmatpush.bf16.msra.mxu3 %v1158_v47  ;;  %v1175_v13 = vld [vmem:[%s1439_s11] ss:$0 sm:$0xff] }
  0x20   : > { %709 = vmatpush.bf16.msra.mxu1 %v1140_v15  ;;  %824 = vmatpush.bf16.msra.mxu2 %v1149_v35 }
  0x23   : > { %621 = vmatpush.bf16.msra.mxu0 %v1131_v14  ;;  %913 = vmatpush.bf16.msra.mxu3 %v1157_v51  ;;  %v1176_v14 = vld [vmem:[%s1440_s12] ss:$0 sm:$0xff] }
  0x24   : > { %710 = vmatpush.bf16.msra.mxu1 %v1139_v18  ;;  %825 = vmatpush.bf16.msra.mxu2 %v1148_v36 }
  0x27   : > { %622 = vmatpush.bf16.msra.mxu0 %v1130_v17  ;;  %914 = vmatpush.bf16.msra.mxu3 %v1156_v58 }
  0x28   : > { %711 = vmatpush.bf16.msra.mxu1 %v1138_v22  ;;  %826 = vmatpush.bf16.msra.mxu2 %v1147_v37 }
  0x2b   : > { %623 = vmatpush.bf16.msra.mxu0 %v1129_v20  ;;  %915 = vmatpush.bf16.msra.mxu3 %v1155_v2 }
  0x2c   : > { %712 = vmatpush.bf16.msra.mxu1 %v1137_v23  ;;  %827 = vmatpush.bf16.msra.mxu2 %v1146_v39 }
  0x2e   : > { %624 = vmatmul.bf16.vlgmr.msra.gmra.mxu0 %v551_v21 }
  0x2f   : > { %916 = vmatpush.bf16.msra.mxu3 %v1154_v11 }
  0x30   : > { %828 = vmatpush.bf16.msra.mxu2 %v1145_v41 }
  0x33   : > { %917 = vmatpush.bf16.msra.mxu3 %v1153_v12 }
  0xab   : > { %v625_v26 = vpop.f32.mrf.mxu0 }
  0xac   : > { %v633_v27 = vmul.f32 %v1171_v24, %v625_v26 }
  0xae   : > { %v638_v28 = vadd.f32 %v1172_v25, %v633_v27 }
  0xb0   : > { %v639_v29 = vmax.f32 %v638_v28, 0.0 }
  0xb2   : > { %v640_v30 = vpack.c.bf16 %v639_v29, %v639_v29 }
  0xb3   : > { %v627_v31 = vpop.f32.mrf.mxu0 }
  0xb4   : > { %713 = vmatmul.bf16.vlgmr.msra.gmra.mxu1 %v640_v30 }
 0x131   : > { %v714_v38 = vpop.f32.mrf.mxu1 }
 0x132   : > { %v1062_v40 = vmul.f32 -1.442695, %v714_v38 }
 0x134   : > { %1177 = vpow2.f32 %v1062_v40 }
 0x139   : > { %v716_v42 = vpop.f32.mrf.mxu1 }
 0x13a   : > { %v1178_v43 = vpop.eup %1177 }
 0x13b   : > { %v721_v44 = vadd.f32 1.0, %v1178_v43 }
 0x13d   : > { %1179 = vrcp.f32 %v721_v44  ;;  %v733_v53 = vand.u32 2147483648, %v721_v44  ;;  %v731_v55 = vand.u32 2147483647, %v721_v44  ;;  %vm727_vm1 = vweird.f32 %v721_v44 }
 0x13f   : > { %v734_v59 = vor.u32 1.1754944e-38, %v733_v53  ;;  %vm732_vm3 = vcmp.eq.f32.partialorder %v731_v55, 8.507059e+37 }
 0x143   : > { %v1180_v48 = vpop.eup %1179 }
 0x144   : > { %v723_v49 = vmul.f32 %v1180_v48, %v721_v44  ;;  %vm728_vm0 = vweird.f32 %v1180_v48 }
 0x145   : > { %vm729_vm2 = vmor %vm727_vm1, %vm728_vm0 }
 0x146   : > { %v724_v50 = vsub.f32 1.0, %v723_v49 }
 0x148   : > { %v725_v54 = vmul.f32 %v1180_v48, %v724_v50 }
 0x14a   : > { %v726_v57 = vadd.f32 %v1180_v48, %v725_v54 }
 0x14c   : > { %v730_v61 = vsel %vm729_vm2, %v1180_v48, %v726_v57 }
 0x14d   : > { %v735_v62 = vsel %vm732_vm3, %v734_v59, %v730_v61 }
 0x14e   : > { %v738_v0 = vmul.f32 %v735_v62, %v537_v56 }
 0x150   : > { %v740_v3 = vmul.f32 %v739_v63, %v738_v0 }
 0x152   : > { %v744_v5 = vadd.f32 %v743_v1, %v740_v3 }
 0x154   : > { %v749_v7 = vmul.f32 %v1173_v4, %v744_v5 }
 0x156   : > { %v754_v8 = vadd.f32 %v1174_v6, %v749_v7 }
 0x158   : > { %v755_v9 = vmax.f32 %v754_v8, 0.0 }
 0x15a   : > { %v756_v10 = vpack.c.bf16 %v755_v9, %v755_v9 }
 0x15c   : > { %829 = vmatmul.bf16.vlgmr.msra.gmra.mxu2 %v756_v10 }
 0x1df   : > { %v830_v15 = vpop.f32.mrf.mxu2 }
 0x1e0   : > { %v838_v16 = vmul.f32 %v1175_v13, %v830_v15 }
 0x1e2   : > { %v843_v17 = vadd.f32 %v1176_v14, %v838_v16 }
 0x1e4   : > { %v844_v18 = vmax.f32 %v843_v17, 0.0 }
 0x1e6   : > { %v845_v19 = vpack.c.bf16 %v844_v18, %v844_v18 }
 0x1e7   : > { %v832_v20 = vpop.f32.mrf.mxu2 }
 0x1e8   : > { %918 = vmatmul.bf16.vlgmr.msra.gmra.mxu3 %v845_v19 }
 0x26b   : > { %v919_v21 = vpop.f32.mrf.mxu3 }
 0x26c   : > { %v923_v22 = vadd.f32 %v919_v21, %v744_v5 }
 0x26e   : > { %924 = vst [vmem:[%s535_s17] sm:$0xff] %v923_v22 }
 0x273   : > { %v921_v23 = vpop.f32.mrf.mxu3 }
 0x274 PF: > { %s28_s25 = sadd.s32 1, %s1187_s25  }
 0x275   : > { %p25_p4 = scmp.ge.s32.totalorder %s28_s25, 4  }
 0x277   :  { %27 = sbr.rel (!%p25_p4) target bundleno = 4 (0x4), region = 117 }

</bundles_post_ra>
